<compile_context>
chip_gen: v7x
topology: tpu7x:2x2x1
jax: 0.10.0
libtpu: 0.0.40
codegen_flags: <defaults>
</compile_context>

<pallas_src>
import functools

import jax
import jax.numpy as jnp
from jax.experimental import pallas as pl
from jax.experimental.pallas import tpu as pltpu


def _vq_kernel(z_ref, cbn_ref, d_ref, prob_ref, enc_ref, idx_ref, zq_ref,
               cos_ref):
    z = z_ref[...]                       # (TN, D) float32
    cbn = cbn_ref[...]                   # (K,  D) float32, rows L2-normalized

    # _cosine_sim: d = (z @ cb_norm.T) / (||z|| * ||cb_norm|| + 1e-6).
    # ||cb_norm|| == 1 (rows normalized in the wrapper), so the denominator is
    # just ||z|| + 1e-6; use an EUP reciprocal + broadcast mul instead of a
    # full (TN, K) divide.
    dots = jnp.dot(z, cbn.T, preferred_element_type=jnp.float32)        # (TN, K)
    z_nrm = jnp.sqrt(jnp.sum(z * z, axis=-1, keepdims=True))            # (TN, 1)
    d = dots * pl.reciprocal(z_nrm + 1e-6, approx=True)
    d_ref[...] = d

    # softmax over the codebook axis -> encoding_indices_prob
    m = jnp.max(d, axis=-1, keepdims=True)
    e = jnp.exp(d - m)
    prob_ref[...] = e * pl.reciprocal(
        jnp.sum(e, axis=-1, keepdims=True), approx=True)

    # argmax over the codebook axis (first maximal index, like torch.argmax)
    k = d.shape[-1]
    ids = jax.lax.broadcasted_iota(jnp.int32, d.shape, 1)                # (TN, K)
    idx = jnp.min(jnp.where(d == m, ids, k), axis=-1, keepdims=True)     # (TN, 1)
    idx_ref[...] = idx

    # one-hot min_encodings and z_q = min_encodings @ cb_norm
    onehot = (ids == idx).astype(jnp.float32)                            # (TN, K)
    enc_ref[...] = onehot
    zq = jnp.dot(onehot, cbn, preferred_element_type=jnp.float32)        # (TN, D)
    zq_ref[...] = zq

    # per-position cosine similarity between z_q and z (torch eps = 1e-8)
    zq_nrm = jnp.sqrt(jnp.sum(zq * zq, axis=-1, keepdims=True))
    num = jnp.sum(zq * z, axis=-1, keepdims=True)
    den = jnp.maximum(zq_nrm, 1e-8) * jnp.maximum(z_nrm, 1e-8)
    cos_ref[...] = num * pl.reciprocal(den, approx=True)


@functools.partial(jax.jit, static_argnames=("beta", "tile_n"))
def vector_quantizer_forward(z, codebook, *, beta=0.25, tile_n=256):
    """Forward pass of VectorQuantizer (concat=False).

    z:        (B, H, W, C) float32, channels-last, C == e_dim
    codebook: (n_e, e_dim) float32 embedding weight
    Returns the same 9-tuple as the PyTorch module.
    """
    B, H, W, C = z.shape
    n_e, e_dim = codebook.shape
    assert C == e_dim
    N = B * H * W
    z_flat = z.reshape(N, C).astype(jnp.float32)

    # _normalize_cb hoisted out of the kernel (done ONCE, not once per grid
    # step): row-wise L2 normalization of the codebook (torch.norm p=2).
    cb = codebook.astype(jnp.float32)
    cb_norm = cb / jnp.sqrt(jnp.sum(cb * cb, axis=-1, keepdims=True))

    # ---- tile selection & explicit VMEM budget (v7x: 64 MiB physical) ------
    fixed_bytes = 2 * n_e * C * 4                    # codebook (double-buffered)
    per_row_bytes = 4 * (2 * C + 3 * n_e + 2)        # per-token in+out tiles
    budget = 48 * 1024 * 1024                        # headroom under v7x's 64 MiB
    tn = tile_n
    while tn > 8 and (N % tn != 0
                      or fixed_bytes + 2 * tn * per_row_bytes > budget):
        tn //= 2
    assert N % tn == 0, f"N={N} not divisible by any tile size <= {tile_n}"
    vmem_limit = int(min(max(fixed_bytes + 2 * tn * per_row_bytes + (8 << 20),
                             32 * 1024 * 1024),
                         64 * 1024 * 1024))

    grid = (N // tn,)
    out_shapes = (
        jax.ShapeDtypeStruct((N, n_e), jnp.float32),   # d
        jax.ShapeDtypeStruct((N, n_e), jnp.float32),   # encoding_indices_prob
        jax.ShapeDtypeStruct((N, n_e), jnp.float32),   # min_encodings (one-hot)
        jax.ShapeDtypeStruct((N, 1), jnp.int32),       # min_encoding_indices
        jax.ShapeDtypeStruct((N, C), jnp.float32),     # z_q (flattened)
        jax.ShapeDtypeStruct((N, 1), jnp.float32),     # per-position cos(z_q, z)
    )
    d, prob, min_encodings, min_idx, zq_flat, cos = pl.pallas_call(
        _vq_kernel,
        out_shape=out_shapes,
        grid=grid,
        in_specs=[
            pl.BlockSpec((tn, C), lambda i: (i, 0)),     # z_flat tile
            pl.BlockSpec((n_e, C), lambda i: (0, 0)),    # full normalized codebook
        ],
        out_specs=(
            pl.BlockSpec((tn, n_e), lambda i: (i, 0)),
            pl.BlockSpec((tn, n_e), lambda i: (i, 0)),
            pl.BlockSpec((tn, n_e), lambda i: (i, 0)),
            pl.BlockSpec((tn, 1), lambda i: (i, 0)),
            pl.BlockSpec((tn, C), lambda i: (i, 0)),
            pl.BlockSpec((tn, 1), lambda i: (i, 0)),
        ),
        compiler_params=pltpu.CompilerParams(
            dimension_semantics=("parallel",),
            vmem_limit_bytes=vmem_limit),
    )(z_flat, cb_norm)

    # ---- cheap scalar glue (reductions over N / n_e) ----
    # e_mean from the (N,) indices — avoids re-reading the dense N x n_e
    # one-hot slab from HBM.  Value identical to mean(min_encodings, axis=0).
    counts = jnp.zeros((n_e,), jnp.float32).at[min_idx[:, 0]].add(1.0)
    e_mean = counts / N
    loss_kl = -jnp.sum(e_mean * jnp.log(1.0 / n_e / (e_mean + 1e-6)))
    perplexity = jnp.exp(-jnp.sum(e_mean * jnp.log(e_mean + 1e-6)))

    mean_cos = jnp.mean(cos)
    # forward value of: 1 - mean(cos(z_q, sg[z])) + beta*(1 - mean(cos(sg[z_q], z)))
    loss = (1.0 - mean_cos) + beta * (1.0 - mean_cos)
    constrative_loss = jnp.float32(0.0)

    z_q = zq_flat.reshape(B, H, W, C)
    # z_q = z + (z_q - z).detach() -> forward value unchanged; gradient trick only.
    # TODO(synk): straight-through gradient estimator not reproduced (forward-only kernel).

    return (loss, constrative_loss, loss_kl, prob, d, z_q, perplexity,
            min_encodings, min_idx)


if __name__ == "__main__":
    # Small, deterministic example consistent with the module:
    # z: (batch, height, width, channel) with channel == e_dim.
    # N = 512 tokens -> grid = (2,) at tile_n=256 (even, so both v7x TCs work).
    B, H, W = 2, 16, 16
    n_e, e_dim, beta = 256, 128, 0.25

    key = jax.random.PRNGKey(0)
    kz, kcb = jax.random.split(key)
    z = jax.random.normal(kz, (B, H, W, e_dim), dtype=jnp.float32)
    # embedding.weight.data.uniform_(-1/n_e, 1/n_e)
    codebook = jax.random.uniform(
        kcb, (n_e, e_dim), minval=-1.0 / n_e, maxval=1.0 / n_e,
        dtype=jnp.float32)

    outs = vector_quantizer_forward(z, codebook, beta=beta, tile_n=256)
    outs = jax.block_until_ready(outs)

    (loss, contrastive_loss, loss_kl, prob, d, z_q, perplexity,
     min_encodings, min_idx) = outs

    # light sanity checks (shapes / finiteness / one-hot & softmax structure)
    N = B * H * W
    assert d.shape == (N, n_e)
    assert prob.shape == (N, n_e)
    assert min_encodings.shape == (N, n_e)
    assert min_idx.shape == (N, 1)
    assert z_q.shape == z.shape
    assert bool(jnp.isfinite(loss)) and bool(jnp.isfinite(perplexity))
    assert bool(jnp.all(jnp.sum(min_encodings, axis=1) == 1.0))
    assert bool(jnp.max(jnp.abs(jnp.sum(prob, axis=1) - 1.0)) < 1e-2)

    print("KERNEL_OK")
</pallas_src>

<mosaic_0001>
module attributes {stable_mosaic.version = 11 : i64} {
  func.func private @main(%arg0: i32) attributes {dimension_semantics = [#tpu.dimension_semantics<core_parallel>], iteration_bounds = array<i64: 2>, tpu.core_type = #tpu.core_type<sc_scalar_subcore>, window_params = []} {
    return
  }
}

module attributes {stable_mosaic.version = 11 : i64} {
  func.func private @main(%arg0: i32) attributes {dimension_semantics = [#tpu.dimension_semantics<core_parallel>], iteration_bounds = array<i64: 2>, tpu.core_type = #tpu.core_type<sc_scalar_subcore>, window_params = []} {
    return
  }
}

module attributes {stable_mosaic.version = 11 : i64} {
  func.func @_vq_kernel(%arg0: i32, %arg1: memref<256x128xf32, #tpu.memory_space<vmem>>, %arg2: memref<256x128xf32, #tpu.memory_space<vmem>>, %arg3: memref<256x256xf32, #tpu.memory_space<vmem>>, %arg4: memref<256x256xf32, #tpu.memory_space<vmem>>, %arg5: memref<256x256xf32, #tpu.memory_space<vmem>>, %arg6: memref<256x1xi32, #tpu.memory_space<vmem>>, %arg7: memref<256x128xf32, #tpu.memory_space<vmem>>, %arg8: memref<256x1xf32, #tpu.memory_space<vmem>>) attributes {dimension_semantics = [#tpu.dimension_semantics<parallel>], iteration_bounds = array<i64: 2>, scalar_prefetch = 0 : i64, scratch_operands = 0 : i64, tpu.core_type = #tpu.core_type<tc>, window_params = [{transform_indices = @transform_0, window_bounds = array<i64: 256, 128>}, {pipeline_mode = #tpu.pipeline_mode<synchronous>, transform_indices = @transform_1, window_bounds = array<i64: 256, 128>}, {transform_indices = @transform_2, window_bounds = array<i64: 256, 256>}, {transform_indices = @transform_3, window_bounds = array<i64: 256, 256>}, {transform_indices = @transform_4, window_bounds = array<i64: 256, 256>}, {transform_indices = @transform_5, window_bounds = array<i64: 256, 1>}, {transform_indices = @transform_6, window_bounds = array<i64: 256, 128>}, {transform_indices = @transform_7, window_bounds = array<i64: 256, 1>}]} {
    %c0 = arith.constant 0 : index
    %c0_0 = arith.constant 0 : index
    %0 = vector.load %arg1[%c0, %c0_0] : memref<256x128xf32, #tpu.memory_space<vmem>>, vector<256x128xf32>
    %c0_1 = arith.constant 0 : index
    %c0_2 = arith.constant 0 : index
    %1 = vector.load %arg2[%c0_1, %c0_2] : memref<256x128xf32, #tpu.memory_space<vmem>>, vector<256x128xf32>
    %2 = tpu.transpose %1, [1, 0] : vector<256x128xf32> -> vector<128x256xf32>
    %cst = arith.constant dense<0.000000e+00> : vector<256x256xf32>
    %3 = tpu.matmul %0, %2, %cst {dimension_numbers = #tpu.dot_dimension_numbers<[1], [0], [0], [1], [0, 0, 1, 1], [], []>} : vector<256x128xf32>, vector<128x256xf32>, vector<256x256xf32> -> vector<256x256xf32>
    %4 = arith.mulf %0, %0 : vector<256x128xf32>
    %cst_3 = arith.constant dense<0.000000e+00> : vector<256xf32>
    %5 = vector.multi_reduction <add>, %4, %cst_3 [1] : vector<256x128xf32> to vector<256xf32>
    %6 = vector.shape_cast %5 : vector<256xf32> to vector<256x1xf32>
    %7 = math.sqrt %6 : vector<256x1xf32>
    %cst_4 = arith.constant 9.99999997E-7 : f32
    %8 = vector.broadcast %cst_4 : f32 to vector<256x1xf32>
    %9 = arith.addf %7, %8 : vector<256x1xf32>
    %10 = tpu.reciprocal %9 {approx = true} : vector<256x1xf32> -> vector<256x1xf32>
    %11 = vector.broadcast %10 : vector<256x1xf32> to vector<256x256xf32>
    %12 = arith.mulf %3, %11 : vector<256x256xf32>
    %c0_5 = arith.constant 0 : index
    %c0_6 = arith.constant 0 : index
    %13 = vector.load %arg3[%c0_5, %c0_6] : memref<256x256xf32, #tpu.memory_space<vmem>>, vector<256x256xf32>
    tpu.vector_store %arg3[%c0_5, %c0_6], %12 {strides = array<i32>} : memref<256x256xf32, #tpu.memory_space<vmem>>, vector<256x256xf32>,
    %cst_7 = arith.constant dense<0xFF800000> : vector<256xf32>
    %14 = vector.multi_reduction <maximumf>, %12, %cst_7 [1] : vector<256x256xf32> to vector<256xf32>
    %15 = vector.shape_cast %14 : vector<256xf32> to vector<256x1xf32>
    %16 = vector.broadcast %15 : vector<256x1xf32> to vector<256x256xf32>
    %17 = arith.subf %12, %16 : vector<256x256xf32>
    %18 = math.exp %17 : vector<256x256xf32>
    %cst_8 = arith.constant dense<0.000000e+00> : vector<256xf32>
    %19 = vector.multi_reduction <add>, %18, %cst_8 [1] : vector<256x256xf32> to vector<256xf32>
    %20 = vector.shape_cast %19 : vector<256xf32> to vector<256x1xf32>
    %21 = tpu.reciprocal %20 {approx = true} : vector<256x1xf32> -> vector<256x1xf32>
    %22 = vector.broadcast %21 : vector<256x1xf32> to vector<256x256xf32>
    %23 = arith.mulf %18, %22 : vector<256x256xf32>
    %c0_9 = arith.constant 0 : index
    %c0_10 = arith.constant 0 : index
    %24 = vector.load %arg4[%c0_9, %c0_10] : memref<256x256xf32, #tpu.memory_space<vmem>>, vector<256x256xf32>
    tpu.vector_store %arg4[%c0_9, %c0_10], %23 {strides = array<i32>} : memref<256x256xf32, #tpu.memory_space<vmem>>, vector<256x256xf32>,
    %25 = tpu.iota {dimensions = array<i32: 1>} : vector<256x256xi32>
    %26 = vector.broadcast %15 : vector<256x1xf32> to vector<256x256xf32>
    %27 = arith.cmpf oeq, %12, %26 : vector<256x256xf32>
    %c256_i32 = arith.constant 256 : i32
    %28 = vector.broadcast %c256_i32 : i32 to vector<256x256xi32>
    %29 = arith.select %27, %25, %28 : vector<256x256xi1>, vector<256x256xi32>
    %cst_11 = arith.constant dense<2147483647> : vector<256xi32>
    %30 = vector.multi_reduction <minsi>, %29, %cst_11 [1] : vector<256x256xi32> to vector<256xi32>
    %31 = vector.shape_cast %30 : vector<256xi32> to vector<256x1xi32>
    %c0_12 = arith.constant 0 : index
    %c0_13 = arith.constant 0 : index
    %32 = vector.load %arg6[%c0_12, %c0_13] : memref<256x1xi32, #tpu.memory_space<vmem>>, vector<256x1xi32>
    tpu.vector_store %arg6[%c0_12, %c0_13], %31 {strides = array<i32>} : memref<256x1xi32, #tpu.memory_space<vmem>>, vector<256x1xi32>,
    %33 = vector.broadcast %31 : vector<256x1xi32> to vector<256x256xi32>
    %34 = arith.cmpi eq, %25, %33 : vector<256x256xi32>
    %35 = arith.extui %34 : vector<256x256xi1> to vector<256x256xi32>
    %36 = arith.sitofp %35 : vector<256x256xi32> to vector<256x256xf32>
    %c0_14 = arith.constant 0 : index
    %c0_15 = arith.constant 0 : index
    %37 = vector.load %arg5[%c0_14, %c0_15] : memref<256x256xf32, #tpu.memory_space<vmem>>, vector<256x256xf32>
    tpu.vector_store %arg5[%c0_14, %c0_15], %36 {strides = array<i32>} : memref<256x256xf32, #tpu.memory_space<vmem>>, vector<256x256xf32>,
    %cst_16 = arith.constant dense<0.000000e+00> : vector<256x128xf32>
    %38 = tpu.matmul %36, %1, %cst_16 {dimension_numbers = #tpu.dot_dimension_numbers<[1], [0], [0], [1], [0, 0, 1, 1], [], []>} : vector<256x256xf32>, vector<256x128xf32>, vector<256x128xf32> -> vector<256x128xf32>
    %c0_17 = arith.constant 0 : index
    %c0_18 = arith.constant 0 : index
    %39 = vector.load %arg7[%c0_17, %c0_18] : memref<256x128xf32, #tpu.memory_space<vmem>>, vector<256x128xf32>
    tpu.vector_store %arg7[%c0_17, %c0_18], %38 {strides = array<i32>} : memref<256x128xf32, #tpu.memory_space<vmem>>, vector<256x128xf32>,
    %40 = arith.mulf %38, %38 : vector<256x128xf32>
    %cst_19 = arith.constant dense<0.000000e+00> : vector<256xf32>
    %41 = vector.multi_reduction <add>, %40, %cst_19 [1] : vector<256x128xf32> to vector<256xf32>
    %42 = vector.shape_cast %41 : vector<256xf32> to vector<256x1xf32>
    %43 = math.sqrt %42 : vector<256x1xf32>
    %44 = arith.mulf %38, %0 : vector<256x128xf32>
    %cst_20 = arith.constant dense<0.000000e+00> : vector<256xf32>
    %45 = vector.multi_reduction <add>, %44, %cst_20 [1] : vector<256x128xf32> to vector<256xf32>
    %46 = vector.shape_cast %45 : vector<256xf32> to vector<256x1xf32>
    %cst_21 = arith.constant 9.99999993E-9 : f32
    %47 = vector.broadcast %cst_21 : f32 to vector<256x1xf32>
    %48 = arith.maximumf %43, %47 : vector<256x1xf32>
    %cst_22 = arith.constant 9.99999993E-9 : f32
    %49 = vector.broadcast %cst_22 : f32 to vector<256x1xf32>
    %50 = arith.maximumf %7, %49 : vector<256x1xf32>
    %51 = arith.mulf %48, %50 : vector<256x1xf32>
    %52 = tpu.reciprocal %51 {approx = true} : vector<256x1xf32> -> vector<256x1xf32>
    %53 = arith.mulf %46, %52 : vector<256x1xf32>
    %c0_23 = arith.constant 0 : index
    %c0_24 = arith.constant 0 : index
    %54 = vector.load %arg8[%c0_23, %c0_24] : memref<256x1xf32, #tpu.memory_space<vmem>>, vector<256x1xf32>
    tpu.vector_store %arg8[%c0_23, %c0_24], %53 {strides = array<i32>} : memref<256x1xf32, #tpu.memory_space<vmem>>, vector<256x1xf32>,
    return
  }
  func.func @transform_0(%arg0: i32) -> (i32, i32) {
    %c0_i32 = arith.constant 0 : i32
    %c0_i32_0 = arith.constant 0 : i32
    return %arg0, %c0_i32 : i32, i32
  }
  func.func @transform_1(%arg0: i32) -> (i32, i32) {
    %c0_i32 = arith.constant 0 : i32
    %c0_i32_0 = arith.constant 0 : i32
    %c0_i32_1 = arith.constant 0 : i32
    return %c0_i32, %c0_i32_0 : i32, i32
  }
  func.func @transform_2(%arg0: i32) -> (i32, i32) {
    %c0_i32 = arith.constant 0 : i32
    %c0_i32_0 = arith.constant 0 : i32
    return %arg0, %c0_i32 : i32, i32
  }
  func.func @transform_3(%arg0: i32) -> (i32, i32) {
    %c0_i32 = arith.constant 0 : i32
    %c0_i32_0 = arith.constant 0 : i32
    return %arg0, %c0_i32 : i32, i32
  }
  func.func @transform_4(%arg0: i32) -> (i32, i32) {
    %c0_i32 = arith.constant 0 : i32
    %c0_i32_0 = arith.constant 0 : i32
    return %arg0, %c0_i32 : i32, i32
  }
  func.func @transform_5(%arg0: i32) -> (i32, i32) {
    %c0_i32 = arith.constant 0 : i32
    %c0_i32_0 = arith.constant 0 : i32
    return %arg0, %c0_i32 : i32, i32
  }
  func.func @transform_6(%arg0: i32) -> (i32, i32) {
    %c0_i32 = arith.constant 0 : i32
    %c0_i32_0 = arith.constant 0 : i32
    return %arg0, %c0_i32 : i32, i32
  }
  func.func @transform_7(%arg0: i32) -> (i32, i32) {
    %c0_i32 = arith.constant 0 : i32
    %c0_i32_0 = arith.constant 0 : i32
    return %arg0, %c0_i32 : i32, i32
  }
}

</mosaic_0001>

<bundles_post_ra>
// kernel: vector_quantizer_forward.1
= control target key start
LH: loop header
LB: loop body
LE: loop exit
PB: predicated region body
PF: predicated region fallthrough
CT: control target
= control target key end

     0   :  { %s8130_s0 = inlined_call_operand.vmem [shape: f32[512,128], index: 0, kind: input, shape index: {}]   ;;  %s8131_s1 = inlined_call_operand.vmem [shape: f32[256,128], index: 1, kind: input, shape index: {}]   ;;  %s8132_s2 = inlined_call_operand.hbm [shape: f32[512,256], index: 2, kind: output, shape index: {0}]   ;;  %s8133_s3 = inlined_call_operand.hbm [shape: f32[512,256], index: 3, kind: output, shape index: {1}]   ;;  %s8134_s4 = inlined_call_operand.hbm [shape: f32[512,256], index: 4, kind: output, shape index: {2}]   ;;  %s8135_s5 = inlined_call_operand.vmem [shape: s32[512,1], index: 5, kind: output, shape index: {3}]   ;;  %s8136_s6 = inlined_call_operand.hbm [shape: f32[512,128], index: 6, kind: output, shape index: {4}]   ;;  %s8137_s7 = inlined_call_operand.vmem [shape: f32[512,1], index: 7, kind: output, shape index: {5}]  }
   0x1   :  { %8326 = sst [smem:[#allocation115_spill]] %s8130_s0 }
   0x2   :  { %8327 = sst [smem:[#allocation116_spill]] %s8131_s1 }
   0x3   :  { %8328 = sst [smem:[#allocation117_spill]] %s8135_s5 }
   0x4   :  { %8329 = sst [smem:[#allocation118_spill]] %s8137_s7 }
   0x5   :  { %13 = vsyncpa [#allocation3], 0 }
   0x6   :  { %15 = vsyncpa [#allocation3 + $0x1], 0 }
   0x7   :  { %16 = vsyncpa [#allocation5], 0 }
   0x8   :  { %18 = vsyncpa [#allocation5 + $0x1], 0 }
   0x9   :  { %19 = vsyncpa [#allocation8], 0 }
   0xa   :  { %21 = vsyncpa [#allocation8 + $0x1], 0  ;;  %s4968_s24 = smov 0   ;;  %s4970_s25 = smov 0  }
   0xb   :  { %s4972_s26 = smov 0   ;;  %s4974_s27 = smov 0  }
   0xc LB: > { %s4989_s28 = sadd.s32 4294967295, %s4915_s27   ;;  %s8325_s29 = sadd.s32 4294967294, %s4915_s27   ;;  %s4915_s27 = sphi %s4974_s27, %s8642_s27   ;;  %s4911_s26 = sphi %s4972_s26, %s8641_s26   ;;  %s4907_s25 = sphi %s4970_s25, %s8640_s25   ;;  %s4903_s24 = sphi %s4968_s24, %s8639_s24  }
   0xd   : > { %s4993_s30 = sadd.s32 1, %s4915_s27   ;;  %s81_s8 = sadd.s32 1, %s4911_s26 }
   0xe   : > { %s78_s9 = ssub.s32 %s4915_s27, %s4993_s30  ;;  %p91_p0 = scmp.ne.s32.totalorder %s4911_s26, %s4907_s25 }
   0xf   : > { %p79_p1 = scmp.eq.s32.totalorder %s78_s9, 0  ;;  %p92_p2 = scmp.eq.s32.totalorder %s4989_s28, 1 }
  0x10   : > { %p97_p3 = scmp.ne.s32.totalorder %s4907_s25, %s4903_s24  ;;  %p98_p4 = scmp.eq.s32.totalorder %s8325_s29, 1 }
  0x11   : > { %s5006_s10 = scalar_select %p79_p1, %s4911_s26, %s81_s8  }
  0x12   : > { %p5008_p5 = por %p92_p2, %p91_p0  ;;  %p5012_p6 = por %p98_p4, %p97_p3 }
  0x13   : > { %p3817_p7 = scmp.ge.s32.totalorder %s4915_s27, 1  ;;  %p258_p8 = scmp.lt.s32.totalorder %s4915_s27, 3 }
  0x15   : > { %p259_p9 = pnand %p3817_p7, %p258_p8 }
  0x17   : > { %262 = sbr.rel (%p259_p9) target bundleno = 1340 (0x53c), region = 28 }
  0x1e   : > { %s8332_s1 = sld [smem:[#allocation116_spill]]  ;;  %s3822_s19 = sshll.u32 %s4989_s28, 5 }
  0x1f   : > { %p316_p10 = scmp.lt.s32.totalorder %s3822_s19, 63  ;;  %s8336_s0 = sld [smem:[#allocation115_spill]] }
  0x20   : > { %s8553_s5 = sld [smem:[#allocation117_spill]]  ;;  %s8606_s7 = sld [smem:[#allocation118_spill]] }
  0x21   : > { %s8644_s19 = smov (!%p316_p10, %s3822_s19), 63  ;;  %s7715_s15 = sshll.u32 %s4989_s28, 13 }
  0x22   : > { %s5052_s17 = sshll.u32 %s8644_s19, 3  ;;  %s5397_s19 = sand.u32 1, %s4907_s25  }
  0x23   : > { %s5408_s13 = sshll.u32 %s5397_s19, 9  ;;  %s3821_s22 = sshll.u32 %s5397_s19, 8 }
  0x24   : > { %v385_v0 = vld [vmem:[%s8332_s1 + $0x80] sm:$0xff]  ;;  %v386_v1 = vld [vmem:[%s8332_s1 + $0x88] sm:$0xff]  ;;  %v387_v5 = vld [vmem:[%s8332_s1 + $0x90] sm:$0xff]  ;;  %s5425_s14 = scalar_lea.vmem [#allocation2], %s5408_s13  ;;  %s6928_s20 = scalar_lea.vmem [#allocation6], %s5408_s13 }
  0x25   : > { %v369_v2 = vld [vmem:[%s8332_s1] sm:$0xff]  ;;  %v5028_v3 = vpack.c.bf16 %v386_v1, %v385_v0  ;;  %v370_v4 = vld [vmem:[%s8332_s1 + $0x8] sm:$0xff]  ;;  %v388_v6 = vld [vmem:[%s8332_s1 + $0x98] sm:$0xff]  ;;  %s5064_s9 = scalar_lea.vmem %s8336_s0, %s5052_s17  ;;  %s7389_s21 = scalar_lea.vmem [#allocation4], %s5408_s13 }
  0x26   : > { %v5039_v7 = vpack.c.bf16 %v370_v4, %v369_v2  ;;  %v5041_v8 = vpack.c.bf16 %v388_v6, %v387_v5  ;;  %v371_v9 = vld [vmem:[%s8332_s1 + $0x10] sm:$0xff]  ;;  %v372_v10 = vld [vmem:[%s8332_s1 + $0x18] sm:$0xff]  ;;  %v389_v11 = vld [vmem:[%s8332_s1 + $0xa0] sm:$0xff]  ;;  %s6896_s18 = scalar_lea.vmem %s8553_s5, %s5052_s17  ;;  %s7518_s23 = scalar_lea.vmem [#allocation7], %s3821_s22 }
  0x27   : > { %8333 = vst [vmem:[#allocation12_spill] sm:$0xff] %v5028_v3  ;;  %4077 = vmatprep.subr.bf16.mxu0 %v5028_v3  ;;  %v390_v12 = vld [vmem:[%s8332_s1 + $0xa8] sm:$0xff]  ;;  %v5066_v13 = vpack.c.bf16 %v372_v10, %v371_v9  ;;  %v5071_v15 = vld [vmem:[%s5064_s9] sm:$0xff]  ;;  %v5075_v16 = vld [vmem:[%s5064_s9 + $0x10] sm:$0xff]  ;;  %s7696_s13 = scalar_lea.vmem %s8606_s7, %s5052_s17  ;;  %s3516_s17 = sand.u32 1, %s4989_s28  }
  0x28   : > { %8334 = vst [vmem:[#allocation13_spill] sm:$0xff] %v5039_v7  ;;  %8335 = vst [vmem:[#allocation14_spill] sm:$0xff] %v5041_v8  ;;  %4079 = vmatpush3.bf16.xpose.msra.mxu0 %v5039_v7  ;;  %v5068_v14 = vpack.c.bf16 %v390_v12, %v389_v11  ;;  %4012 = vmatprep.mubr.f32.mxu0 %v5071_v15  ;;  %v658_v17 = vmul.f32 %v5071_v15, %v5071_v15  ;;  %v5081_v18 = vld [vmem:[%s5064_s9 + $0x8] sm:$0xff]  ;;  %v373_v20 = vld [vmem:[%s8332_s1 + $0x20] sm:$0xff]  ;;  %s7722_s22 = scalar_lea.hbm %s8133_s3, %s7715_s15  ;;  %s7735_s0 = scalar_lea.hbm %s8134_s4, %s7715_s15 }
  0x29   : > { %4081 = vmatprep.subr.bf16.mxu0 %v5041_v8  ;;  %8337 = vst [vmem:[#allocation15_spill] sm:$0xff] %v5066_v13  ;;  %v660_v19 = vmul.f32 %v5075_v16, %v5075_v16  ;;  %v374_v21 = vld [vmem:[%s8332_s1 + $0x28] sm:$0xff]  ;;  %v5093_v22 = vld [vmem:[%s5064_s9 + $0x18] sm:$0xff]  ;;  %v659_v23 = vmul.f32 %v5081_v18, %v5081_v18  ;;  %v391_v24 = vld [vmem:[%s8332_s1 + $0xb0] sm:$0xff]  ;;  %s7746_s29 = scalar_lea.sflag [#allocation5], %s3516_s17  ;;  %s4920_s16 = smov [#allocation4]  }
  0x2a   : > { %8338 = vst [vmem:[#allocation16_spill] sm:$0xff] %v5068_v14  ;;  %690 = vadd.xlane.f32.xlu0 %v658_v17  ;;  %v392_v25 = vld [vmem:[%s8332_s1 + $0xb8] sm:$0xff]  ;;  %v661_v26 = vmul.f32 %v5093_v22, %v5093_v22  ;;  %v5105_v27 = vpack.c.bf16 %v374_v21, %v373_v20  ;;  %v5108_v28 = vld [vmem:[%s5064_s9 + $0x20] sm:$0xff]  ;;  %v5113_v30 = vld [vmem:[%s5064_s9 + $0x28] sm:$0xff] }
  0x2b   : > { %694 = vadd.xlane.f32.xlu1 %v660_v19  ;;  %v5110_v29 = vpack.c.bf16 %v392_v25, %v391_v24  ;;  %v662_v31 = vmul.f32 %v5108_v28, %v5108_v28  ;;  %v663_v32 = vmul.f32 %v5113_v30, %v5113_v30  ;;  %v5121_v33 = vld [vmem:[%s5064_s9 + $0x30] sm:$0xff]  ;;  %v376_v35 = vld [vmem:[%s8332_s1 + $0x38] sm:$0xff]  ;;  %v393_v38 = vld [vmem:[%s8332_s1 + $0xc0] sm:$0xff] }
  0x2c   : > { %8339 = vst [vmem:[#allocation17_spill] sm:$0xff] %v5105_v27  ;;  %v375_v34 = vld [vmem:[%s8332_s1 + $0x30] sm:$0xff]  ;;  %v5131_v36 = vld [vmem:[%s5064_s9 + $0x38] sm:$0xff]  ;;  %v664_v37 = vmul.f32 %v5121_v33, %v5121_v33  ;;  %v394_v39 = vld [vmem:[%s8332_s1 + $0xc8] sm:$0xff] }
  0x2d   : > { %8340 = vst [vmem:[#allocation18_spill] sm:$0xff] %v5110_v29  ;;  %v665_v40 = vmul.f32 %v5131_v36, %v5131_v36  ;;  %v5143_v41 = vpack.c.bf16 %v376_v35, %v375_v34  ;;  %v5146_v42 = vld [vmem:[%s5064_s9 + $0x40] sm:$0xff]  ;;  %v5148_v43 = vpack.c.bf16 %v394_v39, %v393_v38  ;;  %v5151_v44 = vld [vmem:[%s5064_s9 + $0x48] sm:$0xff]  ;;  %v5159_v47 = vld [vmem:[%s5064_s9 + $0x50] sm:$0xff] }
  0x2e   : > { %692 = vadd.xlane.f32.xlu0 %v659_v23  ;;  %v666_v45 = vmul.f32 %v5146_v42, %v5146_v42  ;;  %v667_v46 = vmul.f32 %v5151_v44, %v5151_v44  ;;  %v377_v48 = vld [vmem:[%s8332_s1 + $0x40] sm:$0xff]  ;;  %v378_v49 = vld [vmem:[%s8332_s1 + $0x48] sm:$0xff]  ;;  %v5169_v50 = vld [vmem:[%s5064_s9 + $0x58] sm:$0xff]  ;;  %v668_v51 = vmul.f32 %v5159_v47, %v5159_v47 }
  0x2f   : > { %696 = vadd.xlane.f32.xlu1 %v661_v26  ;;  %8341 = vst [vmem:[#allocation19_spill] sm:$0xff] %v5143_v41  ;;  %8342 = vst [vmem:[#allocation20_spill] sm:$0xff] %v5148_v43  ;;  %v395_v52 = vld [vmem:[%s8332_s1 + $0xd0] sm:$0xff]  ;;  %v396_v53 = vld [vmem:[%s8332_s1 + $0xd8] sm:$0xff]  ;;  %v669_v54 = vmul.f32 %v5169_v50, %v5169_v50  ;;  %v5181_v55 = vpack.c.bf16 %v378_v49, %v377_v48 }
  0x30   : > { %4083 = vmatpush3.bf16.xpose.msra.mxu0 %v5066_v13  ;;  %v5184_v56 = vld [vmem:[%s5064_s9 + $0x60] sm:$0xff]  ;;  %v5186_v57 = vpack.c.bf16 %v396_v53, %v395_v52  ;;  %v5189_v58 = vld [vmem:[%s5064_s9 + $0x68] sm:$0xff]  ;;  %v5197_v61 = vld [vmem:[%s5064_s9 + $0x70] sm:$0xff] }
  0x31   : > { %4085 = vmatprep.subr.bf16.mxu0 %v5068_v14  ;;  %8343 = vst [vmem:[#allocation21_spill] sm:$0xff] %v5181_v55  ;;  %v670_v59 = vmul.f32 %v5184_v56, %v5184_v56  ;;  %v671_v60 = vmul.f32 %v5189_v58, %v5189_v58  ;;  %v379_v62 = vld [vmem:[%s8332_s1 + $0x50] sm:$0xff]  ;;  %v380_v63 = vld [vmem:[%s8332_s1 + $0x58] sm:$0xff]  ;;  %v672_v1 = vmul.f32 %v5197_v61, %v5197_v61  ;;  %v397_v2 = vld [vmem:[%s8332_s1 + $0xe0] sm:$0xff] }
  0x32   : > { %698 = vadd.xlane.f32.xlu0 %v662_v31  ;;  %8344 = vst [vmem:[#allocation22_spill] sm:$0xff] %v5186_v57  ;;  %v5207_v0 = vld [vmem:[%s5064_s9 + $0x78] sm:$0xff]  ;;  %v398_v4 = vld [vmem:[%s8332_s1 + $0xe8] sm:$0xff]  ;;  %v5219_v6 = vpack.c.bf16 %v380_v63, %v379_v62  ;;  %v5222_v9 = vld [vmem:[%s5064_s9 + $0x80] sm:$0xff] }
  0x33   : > { %700 = vadd.xlane.f32.xlu1 %v663_v32  ;;  %v673_v5 = vmul.f32 %v5207_v0, %v5207_v0  ;;  %v5224_v10 = vpack.c.bf16 %v398_v4, %v397_v2  ;;  %v5227_v11 = vld [vmem:[%s5064_s9 + $0x88] sm:$0xff]  ;;  %v674_v12 = vmul.f32 %v5222_v9, %v5222_v9  ;;  %v5235_v19 = vld [vmem:[%s5064_s9 + $0x90] sm:$0xff]  ;;  %v381_v20 = vld [vmem:[%s8332_s1 + $0x60] sm:$0xff] }
  0x34   : > { %8345 = vst [vmem:[#allocation23_spill] sm:$0xff] %v5219_v6  ;;  %v675_v17 = vmul.f32 %v5227_v11, %v5227_v11  ;;  %v382_v21 = vld [vmem:[%s8332_s1 + $0x68] sm:$0xff]  ;;  %v5245_v23 = vld [vmem:[%s5064_s9 + $0x98] sm:$0xff]  ;;  %v676_v24 = vmul.f32 %v5235_v19, %v5235_v19  ;;  %v399_v25 = vld [vmem:[%s8332_s1 + $0xf0] sm:$0xff] }
  0x35   : > { %8346 = vst [vmem:[#allocation24_spill] sm:$0xff] %v5224_v10  ;;  %v400_v26 = vld [vmem:[%s8332_s1 + $0xf8] sm:$0xff]  ;;  %v677_v31 = vmul.f32 %v5245_v23, %v5245_v23  ;;  %v5257_v32 = vpack.c.bf16 %v382_v21, %v381_v20  ;;  %v5260_v34 = vld [vmem:[%s5064_s9 + $0xa0] sm:$0xff]  ;;  %v5267_v38 = vld [vmem:[%s5064_s9 + $0xa8] sm:$0xff] }
  0x36   : > { %702 = vadd.xlane.f32.xlu0 %v664_v37  ;;  %v5262_v35 = vpack.c.bf16 %v400_v26, %v399_v25  ;;  %v678_v37 = vmul.f32 %v5260_v34, %v5260_v34  ;;  %v679_v39 = vmul.f32 %v5267_v38, %v5267_v38  ;;  %v5293_v53 = vld [vmem:[%s5064_s9 + $0xc0] sm:$0xff]  ;;  %v5303_v62 = vld [vmem:[%s5064_s9 + $0xd0] sm:$0xff]  ;;  %v368_v20 = vld [vmem:[%s5064_s9 + $0xf8] sm:$0xff] }
  0x37   : > { %704 = vadd.xlane.f32.xlu1 %v665_v40  ;;  %8347 = vst [vmem:[#allocation25_spill] sm:$0xff] %v5257_v32  ;;  %v383_v40 = vld [vmem:[%s8332_s1 + $0x70] sm:$0xff]  ;;  %v684_v63 = vmul.f32 %v5303_v62, %v5303_v62  ;;  %v5317_v4 = vld [vmem:[%s5064_s9 + $0xe0] sm:$0xff]  ;;  %v689_v21 = vmul.f32 %v368_v20, %v368_v20 }
  0x38   : > { %4087 = vmatpush3.bf16.xpose.msra.mxu0 %v5105_v27  ;;  %8348 = vst [vmem:[#allocation26_spill] sm:$0xff] %v5262_v35 }
  0x39   : > { %4089 = vmatprep.subr.bf16.mxu0 %v5110_v29 }
  0x3a   : > { %706 = vadd.xlane.f32.xlu0 %v666_v45  ;;  %v384_v45 = vld [vmem:[%s8332_s1 + $0x78] sm:$0xff] }
  0x3b   : > { %708 = vadd.xlane.f32.xlu1 %v667_v46  ;;  %v5280_v46 = vld [vmem:[%s5064_s9 + $0xb0] sm:$0xff]  ;;  %v5284_v49 = vpack.c.bf16 %v384_v45, %v383_v40 }
  0x3c   : > { %v680_v48 = vmul.f32 %v5280_v46, %v5280_v46 }
  0x3d   : > { %8349 = vst [vmem:[#allocation27_spill] sm:$0xff] %v5284_v49 }
  0x3e   : > { %710 = vadd.xlane.f32.xlu0 %v668_v51  ;;  %v5287_v51 = vld [vmem:[%s5064_s9 + $0xb8] sm:$0xff] }
  0x3f   : > { %712 = vadd.xlane.f32.xlu1 %v669_v54  ;;  %v681_v52 = vmul.f32 %v5287_v51, %v5287_v51  ;;  %v5296_v54 = vld [vmem:[%s5064_s9 + $0xc8] sm:$0xff] }
  0x40   : > { %4091 = vmatpush3.bf16.xpose.msra.mxu0 %v5143_v41 }
  0x41   : > { %4093 = vmatprep.subr.bf16.mxu0 %v5148_v43 }
  0x42   : > { %714 = vadd.xlane.f32.xlu0 %v670_v59  ;;  %v682_v59 = vmul.f32 %v5293_v53, %v5293_v53 }
  0x43   : > { %716 = vadd.xlane.f32.xlu1 %v671_v60  ;;  %v683_v60 = vmul.f32 %v5296_v54, %v5296_v54 }
  0x46   : > { %718 = vadd.xlane.f32.xlu0 %v672_v1  ;;  %v5310_v1 = vld [vmem:[%s5064_s9 + $0xd8] sm:$0xff] }
  0x47   : > { %720 = vadd.xlane.f32.xlu1 %v673_v5  ;;  %v685_v2 = vmul.f32 %v5310_v1, %v5310_v1  ;;  %v366_v5 = vld [vmem:[%s5064_s9 + $0xe8] sm:$0xff] }
  0x48   : > { %4095 = vmatpush3.bf16.xpose.msra.mxu0 %v5181_v55 }
  0x49   : > { %4097 = vmatprep.subr.bf16.mxu0 %v5186_v57 }
  0x4a   : > { %722 = vadd.xlane.f32.xlu0 %v674_v12  ;;  %v687_v12 = vmul.f32 %v366_v5, %v366_v5 }
  0x4b   : > { %724 = vadd.xlane.f32.xlu1 %v675_v17 }
  0x4e   : > { %726 = vadd.xlane.f32.xlu0 %v676_v24 }
  0x4f   : > { %728 = vadd.xlane.f32.xlu1 %v677_v31 }
  0x50   : > { %4099 = vmatpush3.bf16.xpose.msra.mxu0 %v5219_v6 }
  0x51   : > { %4101 = vmatprep.subr.bf16.mxu0 %v5224_v10 }
  0x52   : > { %730 = vadd.xlane.f32.xlu0 %v678_v37 }
  0x53   : > { %732 = vadd.xlane.f32.xlu1 %v679_v39 }
  0x56   : > { %734 = vadd.xlane.f32.xlu0 %v680_v48 }
  0x57   : > { %736 = vadd.xlane.f32.xlu1 %v681_v52 }
  0x58   : > { %4103 = vmatpush3.bf16.xpose.msra.mxu0 %v5257_v32 }
  0x59   : > { %4105 = vmatprep.subr.bf16.mxu0 %v5262_v35 }
  0x5a   : > { %738 = vadd.xlane.f32.xlu0 %v682_v59 }
  0x5b   : > { %740 = vadd.xlane.f32.xlu1 %v683_v60 }
  0x5e   : > { %742 = vadd.xlane.f32.xlu0 %v684_v63 }
  0x60   : > { %4107 = vmatpush3.bf16.xpose.msra.mxu0 %v5284_v49 }
  0x62   : > { %744 = vadd.xlane.f32.xlu0 %v685_v2 }
  0x67   : > { %4013 = vmatmul.mubr.f32.vlgmr.msra.gmra.mrb[0].mxu0 %v5071_v15  ;;  %v686_v15 = vmul.f32 %v5317_v4, %v5317_v4 }
  0x68   : > { %4014 = vmatprep.mubr.f32.mxu0 %v5081_v18 }
  0x69   : > { %746 = vadd.xlane.f32.xlu0 %v686_v15 }
  0x6b   : > { %4015 = vmatmul.mubr.f32.gmra.mrb[2].mxu0 %v5081_v18  ;;  %v367_v18 = vld [vmem:[%s5064_s9 + $0xf0] sm:$0xff] }
  0x6c   : > { %4016 = vmatprep.mubr.f32.mxu0 %v5075_v16  ;;  %v688_v17 = vmul.f32 %v367_v18, %v367_v18 }
  0x6d   : > { %748 = vadd.xlane.f32.xlu0 %v687_v12 }
  0x6f   : > { %4017 = vmatmul.mubr.f32.gmra.mrb[4].mxu0 %v5075_v16 }
  0x70   : > { %4018 = vmatprep.mubr.f32.mxu0 %v5093_v22 }
  0x71   : > { %750 = vadd.xlane.f32.xlu0 %v688_v17 }
  0x73   : > { %4019 = vmatmul.mubr.f32.gmra.mrb[6].mxu0 %v5093_v22 }
  0x74   : > { %4020 = vmatprep.mubr.f32.mxu0 %v5108_v28 }
  0x75   : > { %752 = vadd.xlane.f32.xlu0 %v689_v21 }
  0x77   : > { %4021 = vmatmul.mubr.f32.gmra.mrb[8].mxu0 %v5108_v28 }
  0x78   : > { %4022 = vmatprep.mubr.f32.mxu0 %v5113_v30 }
  0x7b   : > { %4023 = vmatmul.mubr.f32.gmra.mrb[10].mxu0 %v5113_v30 }
  0x7c   : > { %4024 = vmatprep.mubr.f32.mxu0 %v5121_v33 }
  0x7f   : > { %4025 = vmatmul.mubr.f32.gmra.mrb[12].mxu0 %v5121_v33 }
  0x80   : > { %4026 = vmatprep.mubr.f32.mxu0 %v5131_v36 }
  0x83   : > { %4027 = vmatmul.mubr.f32.gmra.mrb[14].mxu0 %v5131_v36 }
  0x84   : > { %4028 = vmatprep.mubr.f32.mxu0 %v5146_v42 }
  0x87   : > { %4029 = vmatmul.mubr.f32.gmra.mrb[16].mxu0 %v5146_v42 }
  0x88   : > { %4030 = vmatprep.mubr.f32.mxu0 %v5151_v44 }
  0x8b   : > { %4031 = vmatmul.mubr.f32.gmra.mrb[18].mxu0 %v5151_v44 }
  0x8c   : > { %4032 = vmatprep.mubr.f32.mxu0 %v5159_v47 }
  0x8f   : > { %4033 = vmatmul.mubr.f32.gmra.mrb[20].mxu0 %v5159_v47 }
  0x90   : > { %4034 = vmatprep.mubr.f32.mxu0 %v5169_v50 }
  0x93   : > { %4035 = vmatmul.mubr.f32.gmra.mrb[22].mxu0 %v5169_v50 }
  0x94   : > { %4036 = vmatprep.mubr.f32.mxu0 %v5184_v56 }
  0x97   : > { %4037 = vmatmul.mubr.f32.gmra.mrb[24].mxu0 %v5184_v56 }
  0x98   : > { %4038 = vmatprep.mubr.f32.mxu0 %v5189_v58 }
  0x9b   : > { %4039 = vmatmul.mubr.f32.gmra.mrb[26].mxu0 %v5189_v58 }
  0x9c   : > { %4040 = vmatprep.mubr.f32.mxu0 %v5197_v61 }
  0x9f   : > { %4041 = vmatmul.mubr.f32.gmra.mrb[28].mxu0 %v5197_v61 }
  0xa0   : > { %4042 = vmatprep.mubr.f32.mxu0 %v5207_v0 }
  0xa3   : > { %4043 = vmatmul.mubr.f32.gmra.mrb[30].mxu0 %v5207_v0 }
  0xa4   : > { %4044 = vmatprep.mubr.f32.mxu0 %v5222_v9 }
  0xa7   : > { %4045 = vmatmul.mubr.f32.gmra.mrb[32].mxu0 %v5222_v9 }
  0xa8   : > { %4046 = vmatprep.mubr.f32.mxu0 %v5227_v11 }
  0xab   : > { %4047 = vmatmul.mubr.f32.gmra.mrb[34].mxu0 %v5227_v11 }
  0xac   : > { %4048 = vmatprep.mubr.f32.mxu0 %v5235_v19 }
  0xaf   : > { %4049 = vmatmul.mubr.f32.gmra.mrb[36].mxu0 %v5235_v19 }
  0xb0   : > { %4050 = vmatprep.mubr.f32.mxu0 %v5245_v23 }
  0xb3   : > { %4051 = vmatmul.mubr.f32.gmra.mrb[38].mxu0 %v5245_v23 }
  0xb4   : > { %4052 = vmatprep.mubr.f32.mxu0 %v5260_v34 }
  0xb7   : > { %4053 = vmatmul.mubr.f32.gmra.mrb[40].mxu0 %v5260_v34  ;;  %v691_v16 = vpop.xlane.xlu0 %690 }
  0xb8   : > { %4054 = vmatprep.mubr.f32.mxu0 %v5267_v38  ;;  %4217 = vrsqrt.f32 %v691_v16  ;;  %v695_v28 = vpop.xlane.xlu1 %694  ;;  %vm756_vm0 = vcmp.eq.f32.partialorder %v691_v16, inf  ;;  %v759_v47 = vand.u32 2147483648, %v691_v16  ;;  %vm758_vm1 = vcmp.eq.f32.partialorder %v691_v16, 0.0 }
  0xb9   : > { %vm770_vm4 = vcmp.eq.f32.partialorder %v695_v28, inf  ;;  %v773_v26 = vand.u32 2147483648, %v695_v28  ;;  %vm772_vm5 = vcmp.eq.f32.partialorder %v695_v28, 0.0 }
  0xbb   : > { %4055 = vmatmul.mubr.f32.gmra.mrb[42].mxu0 %v5267_v38  ;;  %v693_v22 = vpop.xlane.xlu0 %692 }
  0xbc   : > { %4056 = vmatprep.mubr.f32.mxu0 %v5280_v46  ;;  %4219 = vrsqrt.f32 %v693_v22  ;;  %v697_v30 = vpop.xlane.xlu1 %696  ;;  %vm763_vm2 = vcmp.eq.f32.partialorder %v693_v22, inf  ;;  %v766_v0 = vand.u32 2147483648, %v693_v22  ;;  %vm765_vm3 = vcmp.eq.f32.partialorder %v693_v22, 0.0 }
  0xbd   : > { %4221 = vrsqrt.f32 %v695_v28  ;;  %vm777_vm6 = vcmp.eq.f32.partialorder %v697_v30, inf  ;;  %v780_v45 = vand.u32 2147483648, %v697_v30  ;;  %vm779_vm7 = vcmp.eq.f32.partialorder %v697_v30, 0.0 }
  0xbe   : > { %4223 = vrsqrt.f32 %v697_v30 }
  0xbf   : > { %4057 = vmatmul.mubr.f32.gmra.mrb[44].mxu0 %v5280_v46  ;;  %v699_v42 = vpop.xlane.xlu0 %698 }
  0xc0   : > { %4058 = vmatprep.mubr.f32.mxu0 %v5287_v51  ;;  %4225 = vrsqrt.f32 %v699_v42  ;;  %v5377_v56 = vpop.xlane.xlu1 %700  ;;  %vm784_vm8 = vcmp.eq.f32.partialorder %v699_v42, inf  ;;  %v787_v59 = vand.u32 2147483648, %v699_v42  ;;  %vm786_vm9 = vcmp.eq.f32.partialorder %v699_v42, 0.0 }
  0xc1   : > { %4227 = vrsqrt.f32 %v5377_v56  ;;  %vm791_vm10 = vcmp.eq.f32.partialorder %v5377_v56, inf  ;;  %v794_v15 = vand.u32 2147483648, %v5377_v56  ;;  %vm793_vm11 = vcmp.eq.f32.partialorder %v5377_v56, 0.0 }
  0xc2   : > { %v4218_v33 = vpop.eup %4217 }
  0xc3   : > { %4059 = vmatmul.mubr.f32.gmra.mrb[46].mxu0 %v5287_v51  ;;  %v755_v36 = vmul.f32 %v4218_v33, %v691_v16  ;;  %v5382_v19 = vpop.xlane.xlu0 %702 }
  0xc4   : > { %4060 = vmatprep.mubr.f32.mxu0 %v5293_v53  ;;  %4229 = vrsqrt.f32 %v5382_v19  ;;  %v5388_v37 = vpop.xlane.xlu1 %704  ;;  %vm798_vm12 = vcmp.eq.f32.partialorder %v5382_v19, inf  ;;  %vm800_vm13 = vcmp.eq.f32.partialorder %v5382_v19, 0.0 }
  0xc5   : > { %v757_v58 = vsel %vm756_vm0, %v691_v16, %v755_v36  ;;  %v801_v36 = vand.u32 2147483648, %v5382_v19  ;;  %vm805_vm14 = vcmp.eq.f32.partialorder %v5388_v37, inf  ;;  %vm807_vm15 = vcmp.eq.f32.partialorder %v5388_v37, 0.0 }
  0xc6   : > { %v4220_v44 = vpop.eup %4219  ;;  %v5380_v9 = vsel %vm758_vm1, %v759_v47, %v757_v58 }
  0xc7   : > { %4061 = vmatmul.mubr.f32.gmra.mrb[48].mxu0 %v5293_v53  ;;  %v762_v50 = vmul.f32 %v4220_v44, %v693_v22  ;;  %v4222_v61 = vpop.eup %4221  ;;  %8350 = vst [vmem:[#allocation28_spill] sm:$0xff] %v5380_v9  ;;  %v978_v25 = vadd.f32 1e-06, %v5380_v9  ;;  %v5394_v51 = vpop.xlane.xlu0 %706 }
  0xc8   : > { %4062 = vmatprep.mubr.f32.mxu0 %v5296_v54  ;;  %v769_v11 = vmul.f32 %v4222_v61, %v695_v28  ;;  %v4224_v24 = vpop.eup %4223  ;;  %v5404_v63 = vpop.xlane.xlu1 %708  ;;  %vm812_vm0 = vcmp.eq.f32.partialorder %v5394_v51, inf  ;;  %vm814_vm1 = vcmp.eq.f32.partialorder %v5394_v51, 0.0 }
  0xc9   : > { %v764_v23 = vsel %vm763_vm2, %v693_v22, %v762_v50  ;;  %v776_v34 = vmul.f32 %v4224_v24, %v697_v30  ;;  %4231 = vrcp.f32 %v978_v25  ;;  %vm819_vm2 = vcmp.eq.f32.partialorder %v5404_v63, inf }
  0xca   : > { %v5386_v31 = vsel %vm765_vm3, %v766_v0, %v764_v23  ;;  %v771_v38 = vsel %vm770_vm4, %v695_v28, %v769_v11  ;;  %v4226_v39 = vpop.eup %4225  ;;  %4233 = vrsqrt.f32 %v5388_v37  ;;  %vm821_vm3 = vcmp.eq.f32.partialorder %v5404_v63, 0.0 }
  0xcb   : > { %4063 = vmatmul.mubr.f32.gmra.mrb[50].mxu0 %v5296_v54  ;;  %8351 = vst [vmem:[#allocation29_spill] sm:$0xff] %v5386_v31  ;;  %v979_v40 = vadd.f32 1e-06, %v5386_v31  ;;  %v5392_v46 = vsel %vm772_vm5, %v773_v26, %v771_v38  ;;  %v783_v48 = vmul.f32 %v4226_v39, %v699_v42  ;;  %v778_v52 = vsel %vm777_vm6, %v697_v30, %v776_v34  ;;  %v4228_v53 = vpop.eup %4227  ;;  %v5416_v17 = vpop.xlane.xlu0 %710 }
  0xcc   : > { %4064 = vmatprep.mubr.f32.mxu0 %v5303_v62  ;;  %8352 = vst [vmem:[#allocation30_spill] sm:$0xff] %v5392_v46  ;;  %v980_v54 = vadd.f32 1e-06, %v5392_v46  ;;  %v5401_v60 = vsel %vm779_vm7, %v780_v45, %v778_v52  ;;  %v5432_v50 = vpop.xlane.xlu1 %712  ;;  %v808_v26 = vand.u32 2147483648, %v5388_v37  ;;  %vm826_vm4 = vcmp.eq.f32.partialorder %v5416_v17, inf }
  0xcd   : > { %4235 = vrcp.f32 %v979_v40  ;;  %8353 = vst [vmem:[#allocation31_spill] sm:$0xff] %v5401_v60  ;;  %vm828_vm5 = vcmp.eq.f32.partialorder %v5416_v17, 0.0  ;;  %vm833_vm6 = vcmp.eq.f32.partialorder %v5432_v50, inf  ;;  %vm835_vm7 = vcmp.eq.f32.partialorder %v5432_v50, 0.0 }
  0xce   : > { %4237 = vrsqrt.f32 %v5394_v51  ;;  %v4230_v2 = vpop.eup %4229 }
  0xcf   : > { %4065 = vmatmul.mubr.f32.gmra.mrb[52].mxu0 %v5303_v62  ;;  %v790_v62 = vmul.f32 %v4228_v53, %v5377_v56  ;;  %4239 = vrcp.f32 %v980_v54  ;;  %v5447_v39 = vpop.xlane.xlu0 %714 }
  0xd0   : > { %4066 = vmatprep.mubr.f32.mxu0 %v5310_v1  ;;  %4241 = vrsqrt.f32 %v5404_v63 }
  0xd1   : > { %v792_v21 = vsel %vm791_vm10, %v5377_v56, %v790_v62 }
  0xd3   : > { %4067 = vmatmul.mubr.f32.gmra.mrb[54].mxu0 %v5310_v1  ;;  %v785_v1 = vsel %vm784_vm8, %v699_v42, %v783_v48  ;;  %v4232_v12 = vpop.eup %4231  ;;  %v5428_v42 = vsel %vm793_vm11, %v794_v15, %v792_v21  ;;  %v5462_v15 = vpop.xlane.xlu1 %716  ;;  %vm840_vm8 = vcmp.eq.f32.partialorder %v5447_v39, inf }
  0xd4   : > { %4068 = vmatprep.mubr.f32.mxu0 %v5317_v4  ;;  %v4234_v16 = vpop.eup %4233  ;;  %8355 = vst [vmem:[#allocation33_spill] sm:$0xff] %v5428_v42  ;;  %v983_v25 = vadd.f32 1e-06, %v5428_v42  ;;  %vm847_vm10 = vcmp.eq.f32.partialorder %v5462_v15, inf  ;;  %vm849_vm11 = vcmp.eq.f32.partialorder %v5462_v15, 0.0 }
  0xd5   : > { %v804_v47 = vmul.f32 %v4234_v16, %v5388_v37 }
  0xd7   : > { %4069 = vmatmul.mubr.f32.gmra.mrb[56].mxu0 %v5317_v4  ;;  %v981_v4 = vadd.f32 1e-06, %v5401_v60  ;;  %v4236_v44 = vpop.eup %4235  ;;  %v806_v48 = vsel %vm805_vm14, %v5388_v37, %v804_v47  ;;  %v5477_v47 = vpop.xlane.xlu0 %718 }
  0xd8   : > { %4070 = vmatprep.mubr.f32.mxu0 %v366_v5  ;;  %v4238_v0 = vpop.eup %4237 }
  0xd9   : > { %4243 = vrcp.f32 %v981_v4  ;;  %v4240_v38 = vpop.eup %4239 }
  0xda   : > { %4245 = vrsqrt.f32 %v5416_v17  ;;  %v4242_v52 = vpop.eup %4241 }
  0xdb   : > { %4071 = vmatmul.mubr.f32.gmra.mrb[58].mxu0 %v366_v5  ;;  %v5413_v5 = vsel %vm786_vm9, %v787_v59, %v785_v1  ;;  %v815_v1 = vand.u32 2147483648, %v5394_v51  ;;  %v818_v37 = vmul.f32 %v4242_v52, %v5404_v63  ;;  %vm842_vm9 = vcmp.eq.f32.partialorder %v5447_v39, 0.0 }
  0xdc   : > { %4072 = vmatprep.mubr.f32.mxu0 %v367_v18  ;;  %8354 = vst [vmem:[#allocation32_spill] sm:$0xff] %v5413_v5  ;;  %v982_v33 = vadd.f32 1e-06, %v5413_v5 }
  0xde   : > { %4247 = vrcp.f32 %v982_v33  ;;  %v822_v33 = vand.u32 2147483648, %v5404_v63 }
  0xdf   : > { %4073 = vmatmul.mubr.f32.gmra.mrb[60].mxu0 %v367_v18  ;;  %v797_v18 = vmul.f32 %v4230_v2, %v5382_v19  ;;  %4249 = vrsqrt.f32 %v5432_v50  ;;  %v5458_v2 = vsel %vm807_vm15, %v808_v26, %v806_v48  ;;  %v829_v26 = vand.u32 2147483648, %v5416_v17 }
  0xe0   : > { %4074 = vmatprep.mubr.f32.mxu0 %v368_v20  ;;  %4251 = vrcp.f32 %v983_v25  ;;  %8357 = vst [vmem:[#allocation35_spill] sm:$0xff] %v5458_v2 }
  0xe1   : > { %v799_v61 = vsel %vm798_vm12, %v5382_v19, %v797_v18  ;;  %v811_v19 = vmul.f32 %v4238_v0, %v5394_v51  ;;  %4253 = vrsqrt.f32 %v5447_v39  ;;  %vm854_vm12 = vcmp.eq.f32.partialorder %v5477_v47, inf }
  0xe2   : > { %v5443_v34 = vsel %vm800_vm13, %v801_v36, %v799_v61  ;;  %v820_v61 = vsel %vm819_vm2, %v5404_v63, %v818_v37  ;;  %vm856_vm13 = vcmp.eq.f32.partialorder %v5477_v47, 0.0 }
  0xe3   : > { %4075 = vmatmul.mubr.f32.gmra.mrb[62].mxu0 %v368_v20  ;;  %8356 = vst [vmem:[#allocation34_spill] sm:$0xff] %v5443_v34  ;;  %v984_v62 = vadd.f32 1e-06, %v5443_v34  ;;  %v4244_v4 = vpop.eup %4243 }
  0xe4   : > { %v4246_v21 = vpop.eup %4245 }
  0xe5   : > { %4255 = vrcp.f32 %v984_v62 }
  0xe6   : > { %4257 = vrsqrt.f32 %v5462_v15 }
 0x13a   : > { %v467_v20 = vpop.f32.mrb[0].mxu0 }
 0x13b   : > { %v1042_v22 = vmul.f32 %v4232_v12, %v467_v20  ;;  %v469_v28 = vpop.f32.mrb[1].mxu0  ;;  %v813_v20 = vsel %vm812_vm0, %v5394_v51, %v811_v19  ;;  %v825_v51 = vmul.f32 %v4246_v21, %v5416_v17 }
 0x13c   : > { %v1043_v30 = vmul.f32 %v4232_v12, %v469_v28  ;;  %v5473_v36 = vsel %vm814_vm1, %v815_v1, %v813_v20 }
 0x13d   : > { %1106 = vst [vmem:[%s5425_s14] sm:$0xff] %v1042_v22  ;;  %8358 = vst [vmem:[#allocation36_spill] sm:$0xff] %v5473_v36  ;;  %v986_v25 = vadd.f32 1e-06, %v5473_v36  ;;  %v827_v52 = vsel %vm826_vm4, %v5416_v17, %v825_v51  ;;  %v843_v51 = vand.u32 2147483648, %v5447_v39 }
 0x13e   : > { %1107 = vst [vmem:[%s5425_s14 + $0x8] sm:$0xff] %v1043_v30  ;;  %v473_v56 = vpop.f32.mrb[2].mxu0  ;;  %v1170_v58 = vmax.f32 %v1042_v22, %v1043_v30  ;;  %v985_v30 = vadd.f32 1e-06, %v5458_v2  ;;  %v5508_v37 = vsel %vm828_vm5, %v829_v26, %v827_v52 }
 0x13f   : > { %v1044_v11 = vmul.f32 %v4236_v44, %v473_v56  ;;  %v475_v23 = vpop.f32.mrb[3].mxu0  ;;  %8360 = vst [vmem:[#allocation38_spill] sm:$0xff] %v5508_v37 }
 0x140   : > { %v1045_v24 = vmul.f32 %v4236_v44, %v475_v23  ;;  %1171 = vmax.xlane.f32.xlu1 %v1170_v58  ;;  %v4248_v44 = vpop.eup %4247  ;;  %4259 = vrcp.f32 %v985_v30 }
 0x141   : > { %1108 = vst [vmem:[%s5425_s14 + $0x10] sm:$0xff] %v1044_v11  ;;  %v4250_v0 = vpop.eup %4249  ;;  %4261 = vrsqrt.f32 %v5477_v47 }
 0x142   : > { %1109 = vst [vmem:[%s5425_s14 + $0x18] sm:$0xff] %v1045_v24  ;;  %v479_v40 = vpop.f32.mrb[4].mxu0  ;;  %v1173_v45 = vmax.f32 %v1044_v11, %v1045_v24  ;;  %v4252_v19 = vpop.eup %4251  ;;  %v832_v63 = vmul.f32 %v4250_v0, %v5432_v50  ;;  %4263 = vrcp.f32 %v986_v25 }
 0x143   : > { %v1046_v53 = vmul.f32 %v4240_v38, %v479_v40  ;;  %v481_v54 = vpop.f32.mrb[5].mxu0  ;;  %v5492_v40 = vpop.xlane.xlu1 %720 }
 0x144   : > { %v1047_v59 = vmul.f32 %v4240_v38, %v481_v54  ;;  %1174 = vmax.xlane.f32.xlu1 %v1173_v45  ;;  %v5488_v38 = vsel %vm821_vm3, %v822_v33, %v820_v61  ;;  %4265 = vrsqrt.f32 %v5492_v40  ;;  %vm861_vm14 = vcmp.eq.f32.partialorder %v5492_v40, inf }
 0x145   : > { %1110 = vst [vmem:[%s5425_s14 + $0x20] sm:$0xff] %v1046_v53  ;;  %8359 = vst [vmem:[#allocation37_spill] sm:$0xff] %v5488_v38  ;;  %v987_v1 = vadd.f32 1e-06, %v5488_v38  ;;  %vm863_vm15 = vcmp.eq.f32.partialorder %v5492_v40, 0.0 }
 0x146   : > { %1111 = vst [vmem:[%s5425_s14 + $0x28] sm:$0xff] %v1047_v59  ;;  %v485_v12 = vpop.f32.mrb[6].mxu0  ;;  %v1176_v18 = vmax.f32 %v1046_v53, %v1047_v59  ;;  %v4254_v53 = vpop.eup %4253 }
 0x147   : > { %v1048_v16 = vmul.f32 %v4244_v4, %v485_v12  ;;  %v487_v22 = vpop.f32.mrb[7].mxu0  ;;  %v4256_v17 = vpop.eup %4255  ;;  %v839_v12 = vmul.f32 %v4254_v53, %v5447_v39  ;;  %4267 = vrcp.f32 %v987_v1 }
 0x148   : > { %v1049_v28 = vmul.f32 %v4244_v4, %v487_v22  ;;  %1177 = vmax.xlane.f32.xlu1 %v1176_v18  ;;  %v836_v4 = vand.u32 2147483648, %v5432_v50  ;;  %v5513_v18 = vpop.xlane.xlu0 %722  ;;  %v4258_v22 = vpop.eup %4257  ;;  %v6047_v13 = vld [vmem:[%s5425_s14 + $0x10] sm:$0xff] }
 0x149   : > { %1112 = vst [vmem:[%s5425_s14 + $0x30] sm:$0xff] %v1048_v16  ;;  %4269 = vrsqrt.f32 %v5513_v18  ;;  %v5536_v61 = vpop.xlane.xlu1 %724  ;;  %vm868_vm0 = vcmp.eq.f32.partialorder %v5513_v18, inf  ;;  %vm870_vm1 = vcmp.eq.f32.partialorder %v5513_v18, 0.0  ;;  %8394 = vst [vmem:[#allocation72_spill] sm:$0xff] %v6047_v13 }
 0x14a   : > { %1113 = vst [vmem:[%s5425_s14 + $0x38] sm:$0xff] %v1049_v28  ;;  %v491_v56 = vpop.f32.mrb[8].mxu0  ;;  %v1179_v58 = vmax.f32 %v1048_v16, %v1049_v28  ;;  %v834_v16 = vsel %vm833_vm6, %v5432_v50, %v832_v63  ;;  %v4260_v50 = vpop.eup %4259  ;;  %vm875_vm2 = vcmp.eq.f32.partialorder %v5536_v61, inf  ;;  %vm877_vm3 = vcmp.eq.f32.partialorder %v5536_v61, 0.0 }
 0x14b   : > { %v1050_v11 = vmul.f32 %v4248_v44, %v491_v56  ;;  %v493_v23 = vpop.f32.mrb[9].mxu0  ;;  %v5531_v56 = vsel %vm835_vm7, %v836_v4, %v834_v16 }
 0x14c   : > { %v1051_v24 = vmul.f32 %v4248_v44, %v493_v23  ;;  %1180 = vmax.xlane.f32.xlu1 %v1179_v58  ;;  %v988_v44 = vadd.f32 1e-06, %v5508_v37  ;;  %8361 = vst [vmem:[#allocation39_spill] sm:$0xff] %v5531_v56  ;;  %v846_v58 = vmul.f32 %v4258_v22, %v5462_v15  ;;  %v841_v23 = vsel %vm840_vm8, %v5447_v39, %v839_v12  ;;  %v5559_v53 = vpop.xlane.xlu0 %726 }
 0x14d   : > { %1114 = vst [vmem:[%s5425_s14 + $0x40] sm:$0xff] %v1050_v11  ;;  %v989_v63 = vadd.f32 1e-06, %v5531_v56  ;;  %v857_v22 = vand.u32 2147483648, %v5477_v47  ;;  %vm882_vm4 = vcmp.eq.f32.partialorder %v5559_v53, inf  ;;  %vm884_vm5 = vcmp.eq.f32.partialorder %v5559_v53, 0.0 }
 0x14e   : > { %1115 = vst [vmem:[%s5425_s14 + $0x48] sm:$0xff] %v1051_v24  ;;  %v497_v45 = vpop.f32.mrb[10].mxu0  ;;  %v1182_v48 = vmax.f32 %v1050_v11, %v1051_v24  ;;  %v4262_v24 = vpop.eup %4261  ;;  %4271 = vrcp.f32 %v988_v44  ;;  %v848_v4 = vsel %vm847_vm10, %v5462_v15, %v846_v58 }
 0x14f   : > { %v5499_v54 = vmul.f32 %v4252_v19, %v497_v45  ;;  %v499_v59 = vpop.f32.mrb[11].mxu0  ;;  %v850_v45 = vand.u32 2147483648, %v5462_v15  ;;  %4273 = vrsqrt.f32 %v5536_v61  ;;  %v4264_v39 = vpop.eup %4263  ;;  %v853_v52 = vmul.f32 %v4262_v24, %v5477_v47 }
 0x150   : > { %v5501_v62 = vmul.f32 %v4252_v19, %v499_v59  ;;  %1183 = vmax.xlane.f32.xlu1 %v1182_v48  ;;  %v5554_v48 = vsel %vm842_vm9, %v843_v51, %v841_v23  ;;  %4275 = vrcp.f32 %v989_v63  ;;  %v5582_v51 = vpop.xlane.xlu1 %728 }
 0x151   : > { %1116 = vst [vmem:[%s5425_s14 + $0x50] sm:$0xff] %v5499_v54  ;;  %8362 = vst [vmem:[#allocation40_spill] sm:$0xff] %v5554_v48  ;;  %v990_v16 = vadd.f32 1e-06, %v5554_v48  ;;  %4277 = vrsqrt.f32 %v5559_v53  ;;  %v885_v48 = vand.u32 2147483648, %v5559_v53  ;;  %vm889_vm6 = vcmp.eq.f32.partialorder %v5582_v51, inf }
 0x152   : > { %1117 = vst [vmem:[%s5425_s14 + $0x58] sm:$0xff] %v5501_v62  ;;  %v503_v20 = vpop.f32.mrb[12].mxu0  ;;  %v1185_v21 = vmax.f32 %v5499_v54, %v5501_v62  ;;  %v892_v38 = vand.u32 2147483648, %v5582_v51  ;;  %vm891_vm7 = vcmp.eq.f32.partialorder %v5582_v51, 0.0 }
 0x153   : > { %v5522_v28 = vmul.f32 %v4256_v17, %v503_v20  ;;  %v505_v30 = vpop.f32.mrb[13].mxu0  ;;  %4279 = vrcp.f32 %v990_v16 }
 0x154   : > { %v5524_v33 = vmul.f32 %v4256_v17, %v505_v30  ;;  %1186 = vmax.xlane.f32.xlu1 %v1185_v21  ;;  %v4266_v17 = vpop.eup %4265  ;;  %v5577_v30 = vsel %vm849_vm11, %v850_v45, %v848_v4  ;;  %v864_v45 = vand.u32 2147483648, %v5492_v40  ;;  %4281 = vrsqrt.f32 %v5582_v51 }
 0x155   : > { %1118 = vst [vmem:[%s5425_s14 + $0x60] sm:$0xff] %v5522_v28  ;;  %8363 = vst [vmem:[#allocation41_spill] sm:$0xff] %v5577_v30  ;;  %v4268_v15 = vpop.eup %4267  ;;  %v860_v44 = vmul.f32 %v4266_v17, %v5492_v40  ;;  %v991_v63 = vadd.f32 1e-06, %v5577_v30 }
 0x156   : > { %1119 = vst [vmem:[%s5425_s14 + $0x68] sm:$0xff] %v5524_v33  ;;  %v509_v0 = vpop.f32.mrb[14].mxu0  ;;  %v1188_v11 = vmax.f32 %v5522_v28, %v5524_v33 }
 0x157   : > { %v5545_v25 = vmul.f32 %v4260_v50, %v509_v0  ;;  %v511_v26 = vpop.f32.mrb[15].mxu0  ;;  %v855_v0 = vsel %vm854_vm12, %v5477_v47, %v853_v52  ;;  %v862_v17 = vsel %vm861_vm14, %v5492_v40, %v860_v44  ;;  %4283 = vrcp.f32 %v991_v63 }
 0x158   : > { %v5547_v19 = vmul.f32 %v4260_v50, %v511_v26  ;;  %1189 = vmax.xlane.f32.xlu0 %v1188_v11  ;;  %v4270_v11 = vpop.eup %4269  ;;  %v5623_v44 = vsel %vm863_vm15, %v864_v45, %v862_v17 }
 0x159   : > { %1120 = vst [vmem:[%s5425_s14 + $0x70] sm:$0xff] %v5545_v25  ;;  %v4272_v47 = vpop.eup %4271  ;;  %v867_v52 = vmul.f32 %v4270_v11, %v5513_v18  ;;  %8365 = vst [vmem:[#allocation43_spill] sm:$0xff] %v5623_v44  ;;  %v5628_v11 = vpop.xlane.xlu1 %732 }
 0x15a   : > { %1121 = vst [vmem:[%s5425_s14 + $0x78] sm:$0xff] %v5547_v19  ;;  %v515_v59 = vpop.f32.mrb[16].mxu0  ;;  %v1191_v1 = vmax.f32 %v5545_v25, %v5547_v19  ;;  %vm903_vm10 = vcmp.eq.f32.partialorder %v5628_v11, inf  ;;  %v906_v42 = vand.u32 2147483648, %v5628_v11  ;;  %vm905_vm11 = vcmp.eq.f32.partialorder %v5628_v11, 0.0 }
 0x15b   : > { %v5568_v12 = vmul.f32 %v4264_v39, %v515_v59  ;;  %v517_v20 = vpop.f32.mrb[17].mxu0  ;;  %v5605_v59 = vpop.xlane.xlu0 %730 }
 0x15c   : > { %v5570_v21 = vmul.f32 %v4264_v39, %v517_v20  ;;  %1192 = vmax.xlane.f32.xlu1 %v1191_v1  ;;  %v5600_v39 = vsel %vm856_vm13, %v857_v22, %v855_v0  ;;  %v4274_v20 = vpop.eup %4273  ;;  %4285 = vrsqrt.f32 %v5605_v59  ;;  %vm896_vm8 = vcmp.eq.f32.partialorder %v5605_v59, inf }
 0x15d   : > { %1122 = vst [vmem:[%s5425_s14 + $0x80] sm:$0xff] %v5568_v12  ;;  %8364 = vst [vmem:[#allocation42_spill] sm:$0xff] %v5600_v39  ;;  %v4276_v40 = vpop.eup %4275  ;;  %v874_v0 = vmul.f32 %v4274_v20, %v5536_v61  ;;  %v899_v36 = vand.u32 2147483648, %v5605_v59  ;;  %vm898_vm9 = vcmp.eq.f32.partialorder %v5605_v59, 0.0 }
 0x15e   : > { %1123 = vst [vmem:[%s5425_s14 + $0x88] sm:$0xff] %v5570_v21  ;;  %v521_v50 = vpop.f32.mrb[18].mxu0  ;;  %v1194_v58 = vmax.f32 %v5568_v12, %v5570_v21  ;;  %v4278_v45 = vpop.eup %4277 }
 0x15f   : > { %v5591_v23 = vmul.f32 %v4268_v15, %v521_v50  ;;  %v523_v24 = vpop.f32.mrb[19].mxu0  ;;  %v992_v50 = vadd.f32 1e-06, %v5600_v39  ;;  %v5641_v20 = vpop.xlane.xlu0 %734  ;;  %v878_v39 = vand.u32 2147483648, %v5536_v61 }
 0x160   : > { %v5593_v26 = vmul.f32 %v4268_v15, %v523_v24  ;;  %1195 = vmax.xlane.f32.xlu0 %v1194_v58  ;;  %v871_v58 = vand.u32 2147483648, %v5513_v18  ;;  %vm910_vm12 = vcmp.eq.f32.partialorder %v5641_v20, inf  ;;  %v913_v60 = vand.u32 2147483648, %v5641_v20 }
 0x161   : > { %1124 = vst [vmem:[%s5425_s14 + $0x90] sm:$0xff] %v5591_v23  ;;  %4287 = vrcp.f32 %v992_v50  ;;  %vm912_vm13 = vcmp.eq.f32.partialorder %v5641_v20, 0.0 }
 0x162   : > { %1125 = vst [vmem:[%s5425_s14 + $0x98] sm:$0xff] %v5593_v26  ;;  %v527_v1 = vpop.f32.mrb[20].mxu0  ;;  %v1197_v4 = vmax.f32 %v5591_v23, %v5593_v26  ;;  %4289 = vrsqrt.f32 %v5628_v11 }
 0x163   : > { %v5614_v16 = vmul.f32 %v4272_v47, %v527_v1  ;;  %v529_v22 = vpop.f32.mrb[21].mxu0 }
 0x164   : > { %v5616_v15 = vmul.f32 %v4272_v47, %v529_v22  ;;  %1198 = vmax.xlane.f32.xlu1 %v1197_v4  ;;  %v869_v47 = vsel %vm868_vm0, %v5513_v18, %v867_v52  ;;  %v993_v22 = vadd.f32 1e-06, %v5623_v44  ;;  %v4280_v52 = vpop.eup %4279  ;;  %v5664_v44 = vpop.xlane.xlu0 %738 }
 0x165   : > { %1126 = vst [vmem:[%s5425_s14 + $0xa0] sm:$0xff] %v5614_v16  ;;  %v5648_v18 = vsel %vm870_vm1, %v871_v58, %v869_v47  ;;  %vm924_vm0 = vcmp.eq.f32.partialorder %v5664_v44, inf  ;;  %v927_v9 = vand.u32 2147483648, %v5664_v44  ;;  %vm926_vm1 = vcmp.eq.f32.partialorder %v5664_v44, 0.0 }
 0x166   : > { %1127 = vst [vmem:[%s5425_s14 + $0xa8] sm:$0xff] %v5616_v15  ;;  %v533_v24 = vpop.f32.mrb[22].mxu0  ;;  %v1200_v63 = vmax.f32 %v5614_v16, %v5616_v15  ;;  %8366 = vst [vmem:[#allocation44_spill] sm:$0xff] %v5648_v18  ;;  %4291 = vrcp.f32 %v993_v22  ;;  %v994_v30 = vadd.f32 1e-06, %v5648_v18 }
 0x167   : > { %v5637_v1 = vmul.f32 %v4276_v40, %v533_v24  ;;  %v535_v4 = vpop.f32.mrb[23].mxu0  ;;  %v881_v24 = vmul.f32 %v4278_v45, %v5559_v53  ;;  %4293 = vrsqrt.f32 %v5641_v20 }
 0x168   : > { %v5639_v17 = vmul.f32 %v4276_v40, %v535_v4  ;;  %1201 = vmax.xlane.f32.xlu0 %v1200_v63  ;;  %v876_v63 = vsel %vm875_vm2, %v5536_v61, %v874_v0  ;;  %v4282_v4 = vpop.eup %4281  ;;  %v5689_v56 = vpop.xlane.xlu0 %742  ;;  %4295 = vrcp.f32 %v994_v30 }
 0x169   : > { %1128 = vst [vmem:[%s5425_s14 + $0xb0] sm:$0xff] %v5637_v1  ;;  %v5671_v61 = vsel %vm877_vm3, %v878_v39, %v876_v63  ;;  %v4284_v0 = vpop.eup %4283  ;;  %v941_v57 = vand.u32 2147483648, %v5689_v56 }
 0x16a   : > { %1129 = vst [vmem:[%s5425_s14 + $0xb8] sm:$0xff] %v5639_v17  ;;  %v539_v40 = vpop.f32.mrb[24].mxu0  ;;  %v1203_v50 = vmax.f32 %v5637_v1, %v5639_v17  ;;  %8367 = vst [vmem:[#allocation45_spill] sm:$0xff] %v5671_v61  ;;  %v4286_v39 = vpop.eup %4285  ;;  %v995_v37 = vadd.f32 1e-06, %v5671_v61 }
 0x16b   : > { %v5660_v58 = vmul.f32 %v4280_v52, %v539_v40  ;;  %v541_v47 = vpop.f32.mrb[25].mxu0  ;;  %v888_v40 = vmul.f32 %v4282_v4, %v5582_v51 }
 0x16c   : > { %v5662_v45 = vmul.f32 %v4280_v52, %v541_v47  ;;  %1204 = vmax.xlane.f32.xlu1 %v1203_v50  ;;  %v5676_v52 = vpop.xlane.xlu1 %736  ;;  %v883_v47 = vsel %vm882_vm4, %v5559_v53, %v881_v24  ;;  %v4288_v24 = vpop.eup %4287  ;;  %vm938_vm4 = vcmp.eq.f32.partialorder %v5689_v56, inf }
 0x16d   : > { %1130 = vst [vmem:[%s5425_s14 + $0xc0] sm:$0xff] %v5660_v58  ;;  %4297 = vrsqrt.f32 %v5676_v52  ;;  %v5696_v53 = vsel %vm884_vm5, %v885_v48, %v883_v47  ;;  %vm917_vm14 = vcmp.eq.f32.partialorder %v5676_v52, inf  ;;  %v920_v46 = vand.u32 2147483648, %v5676_v52 }
 0x16e   : > { %1131 = vst [vmem:[%s5425_s14 + $0xc8] sm:$0xff] %v5662_v45  ;;  %v545_v50 = vpop.f32.mrb[26].mxu0  ;;  %v1206_v22 = vmax.f32 %v5660_v58, %v5662_v45  ;;  %8368 = vst [vmem:[#allocation46_spill] sm:$0xff] %v5696_v53  ;;  %4299 = vrcp.f32 %v995_v37  ;;  %v996_v61 = vadd.f32 1e-06, %v5696_v53  ;;  %vm919_vm15 = vcmp.eq.f32.partialorder %v5676_v52, 0.0 }
 0x16f   : > { %v5685_v63 = vmul.f32 %v4284_v0, %v545_v50  ;;  %v547_v4 = vpop.f32.mrb[27].mxu0  ;;  %v895_v50 = vmul.f32 %v4286_v39, %v5605_v59  ;;  %4301 = vrsqrt.f32 %v5664_v44  ;;  %vm940_vm5 = vcmp.eq.f32.partialorder %v5689_v56, 0.0 }
 0x170   : > { %v5687_v18 = vmul.f32 %v4284_v0, %v547_v4  ;;  %1207 = vmax.xlane.f32.xlu0 %v1206_v22  ;;  %v890_v22 = vsel %vm889_vm6, %v5582_v51, %v888_v40  ;;  %v4290_v4 = vpop.eup %4289  ;;  %v5717_v51 = vpop.xlane.xlu1 %740  ;;  %4303 = vrcp.f32 %v996_v61 }
 0x171   : > { %1132 = vst [vmem:[%s5425_s14 + $0xd0] sm:$0xff] %v5685_v63  ;;  %v5719_v40 = vsel %vm891_vm7, %v892_v38, %v890_v22  ;;  %v4292_v2 = vpop.eup %4291  ;;  %4305 = vrsqrt.f32 %v5717_v51  ;;  %vm931_vm2 = vcmp.eq.f32.partialorder %v5717_v51, inf  ;;  %v934_v10 = vand.u32 2147483648, %v5717_v51 }
 0x172   : > { %1133 = vst [vmem:[%s5425_s14 + $0xd8] sm:$0xff] %v5687_v18  ;;  %v551_v0 = vpop.f32.mrb[28].mxu0  ;;  %v1209_v30 = vmax.f32 %v5685_v63, %v5687_v18  ;;  %8369 = vst [vmem:[#allocation47_spill] sm:$0xff] %v5719_v40  ;;  %v4294_v38 = vpop.eup %4293  ;;  %v997_v34 = vadd.f32 1e-06, %v5719_v40  ;;  %vm933_vm3 = vcmp.eq.f32.partialorder %v5717_v51, 0.0 }
 0x173   : > { %v5708_v48 = vmul.f32 %v4288_v24, %v551_v0  ;;  %v553_v47 = vpop.f32.mrb[29].mxu0  ;;  %v902_v0 = vmul.f32 %v4290_v4, %v5628_v11  ;;  %v909_v5 = vmul.f32 %v4294_v38, %v5641_v20 }
 0x174   : > { %v5710_v39 = vmul.f32 %v4288_v24, %v553_v47  ;;  %1210 = vmax.xlane.f32.xlu1 %v1209_v30  ;;  %v5726_v30 = vpop.xlane.xlu0 %744  ;;  %v897_v47 = vsel %vm896_vm8, %v5605_v59, %v895_v50  ;;  %v4296_v59 = vpop.eup %4295  ;;  %4307 = vrcp.f32 %v997_v34 }
 0x175   : > { %1134 = vst [vmem:[%s5425_s14 + $0xe0] sm:$0xff] %v5708_v48  ;;  %v5742_v50 = vsel %vm898_vm9, %v899_v36, %v897_v47  ;;  %4309 = vrsqrt.f32 %v5689_v56  ;;  %vm945_vm6 = vcmp.eq.f32.partialorder %v5726_v30, inf  ;;  %v948_v29 = vand.u32 2147483648, %v5726_v30 }
 0x176   : > { %1135 = vst [vmem:[%s5425_s14 + $0xe8] sm:$0xff] %v5710_v39  ;;  %v557_v24 = vpop.f32.mrb[30].mxu0  ;;  %v1212_v37 = vmax.f32 %v5708_v48, %v5710_v39  ;;  %8370 = vst [vmem:[#allocation48_spill] sm:$0xff] %v5742_v50  ;;  %v998_v40 = vadd.f32 1e-06, %v5742_v50  ;;  %vm947_vm7 = vcmp.eq.f32.partialorder %v5726_v30, 0.0 }
 0x177   : > { %v5733_v22 = vmul.f32 %v4292_v2, %v557_v24  ;;  %v559_v4 = vpop.f32.mrb[31].mxu0  ;;  %v904_v24 = vsel %vm903_vm10, %v5628_v11, %v902_v0 }
 0x178   : > { %v5735_v53 = vmul.f32 %v4292_v2, %v559_v4  ;;  %1213 = vmax.xlane.f32.xlu0 %v1212_v37  ;;  %v4298_v37 = vpop.eup %4297  ;;  %v5758_v4 = vpop.xlane.xlu0 %746  ;;  %v5765_v11 = vsel %vm905_vm11, %v906_v42, %v904_v24  ;;  %4311 = vrcp.f32 %v998_v40 }
 0x179   : > { %1136 = vst [vmem:[%s5425_s14 + $0xf0] sm:$0xff] %v5733_v22  ;;  %8371 = vst [vmem:[#allocation49_spill] sm:$0xff] %v5765_v11  ;;  %v4300_v0 = vpop.eup %4299  ;;  %v999_v50 = vadd.f32 1e-06, %v5765_v11  ;;  %4313 = vrsqrt.f32 %v5726_v30  ;;  %vm952_vm8 = vcmp.eq.f32.partialorder %v5758_v4, inf  ;;  %v955_v14 = vand.u32 2147483648, %v5758_v4 }
 0x17a   : > { %1137 = vst [vmem:[%s5425_s14 + $0xf8] sm:$0xff] %v5735_v53  ;;  %v563_v2 = vpop.f32.mrb[32].mxu0  ;;  %v1215_v61 = vmax.f32 %v5733_v22, %v5735_v53  ;;  %vm954_vm9 = vcmp.eq.f32.partialorder %v5758_v4, 0.0 }
 0x17b   : > { %v5754_v36 = vmul.f32 %v4296_v59, %v563_v2  ;;  %v565_v47 = vpop.f32.mrb[33].mxu0  ;;  %v916_v2 = vmul.f32 %v4298_v37, %v5676_v52  ;;  %4315 = vrcp.f32 %v999_v50 }
 0x17c   : > { %v5756_v38 = vmul.f32 %v4296_v59, %v565_v47  ;;  %1216 = vmax.xlane.f32.xlu1 %v1215_v61  ;;  %v911_v61 = vsel %vm910_vm12, %v5641_v20, %v909_v5  ;;  %v4302_v47 = vpop.eup %4301  ;;  %4317 = vrsqrt.f32 %v5758_v4 }
 0x17d   : > { %1138 = vst [vmem:[%s5425_s14 + $0x100] sm:$0xff] %v5754_v36  ;;  %v5786_v5 = vsel %vm912_vm13, %v913_v60, %v911_v61  ;;  %v4304_v20 = vpop.eup %4303  ;;  %v923_v31 = vmul.f32 %v4302_v47, %v5664_v44 }
 0x17e   : > { %1139 = vst [vmem:[%s5425_s14 + $0x108] sm:$0xff] %v5756_v38  ;;  %v569_v59 = vpop.f32.mrb[34].mxu0  ;;  %v1218_v34 = vmax.f32 %v5754_v36, %v5756_v38  ;;  %8372 = vst [vmem:[#allocation50_spill] sm:$0xff] %v5786_v5  ;;  %v4306_v60 = vpop.eup %4305  ;;  %v1000_v11 = vadd.f32 1e-06, %v5786_v5 }
 0x17f   : > { %v5777_v42 = vmul.f32 %v4300_v0, %v569_v59  ;;  %v571_v24 = vpop.f32.mrb[35].mxu0  ;;  %v5793_v59 = vpop.xlane.xlu0 %748  ;;  %v930_v35 = vmul.f32 %v4306_v60, %v5717_v51 }
 0x180   : > { %v5779_v37 = vmul.f32 %v4300_v0, %v571_v24  ;;  %1219 = vmax.xlane.f32.xlu0 %v1218_v34  ;;  %v918_v34 = vsel %vm917_vm14, %v5676_v52, %v916_v2  ;;  %v4308_v52 = vpop.eup %4307  ;;  %4319 = vrcp.f32 %v1000_v11  ;;  %vm959_vm10 = vcmp.eq.f32.partialorder %v5793_v59, inf }
 0x181   : > { %1140 = vst [vmem:[%s5425_s14 + $0x110] sm:$0xff] %v5777_v42  ;;  %v5809_v2 = vsel %vm919_vm15, %v920_v46, %v918_v34  ;;  %4321 = vrsqrt.f32 %v5793_v59  ;;  %vm961_vm11 = vcmp.eq.f32.partialorder %v5793_v59, 0.0 }
 0x182   : > { %1141 = vst [vmem:[%s5425_s14 + $0x118] sm:$0xff] %v5779_v37  ;;  %v575_v0 = vpop.f32.mrb[36].mxu0  ;;  %v1221_v40 = vmax.f32 %v5777_v42, %v5779_v37  ;;  %8373 = vst [vmem:[#allocation51_spill] sm:$0xff] %v5809_v2  ;;  %v1001_v5 = vadd.f32 1e-06, %v5809_v2 }
 0x183   : > { %v5800_v61 = vmul.f32 %v4304_v20, %v575_v0  ;;  %v577_v47 = vpop.f32.mrb[37].mxu0  ;;  %v925_v0 = vsel %vm924_vm0, %v5664_v44, %v923_v31 }
 0x184   : > { %v5802_v24 = vmul.f32 %v4304_v20, %v577_v47  ;;  %1222 = vmax.xlane.f32.xlu1 %v1221_v40  ;;  %v4310_v40 = vpop.eup %4309  ;;  %v5825_v47 = vpop.xlane.xlu0 %750  ;;  %v5832_v31 = vsel %vm926_vm1, %v927_v9, %v925_v0  ;;  %4323 = vrcp.f32 %v1001_v5 }
 0x185   : > { %1142 = vst [vmem:[%s5425_s14 + $0x120] sm:$0xff] %v5800_v61  ;;  %8374 = vst [vmem:[#allocation52_spill] sm:$0xff] %v5832_v31  ;;  %v4312_v44 = vpop.eup %4311  ;;  %v1002_v2 = vadd.f32 1e-06, %v5832_v31  ;;  %4325 = vrsqrt.f32 %v5825_v47  ;;  %vm966_vm12 = vcmp.eq.f32.partialorder %v5825_v47, inf  ;;  %vm968_vm13 = vcmp.eq.f32.partialorder %v5825_v47, 0.0 }
 0x186   : > { %1143 = vst [vmem:[%s5425_s14 + $0x128] sm:$0xff] %v5802_v24  ;;  %v581_v20 = vpop.f32.mrb[38].mxu0  ;;  %v1224_v50 = vmax.f32 %v5800_v61, %v5802_v24 }
 0x187   : > { %v5821_v46 = vmul.f32 %v4308_v52, %v581_v20  ;;  %v583_v34 = vpop.f32.mrb[39].mxu0  ;;  %v937_v20 = vmul.f32 %v4310_v40, %v5689_v56  ;;  %4327 = vrcp.f32 %v1002_v2 }
 0x188   : > { %v5823_v60 = vmul.f32 %v4308_v52, %v583_v34  ;;  %1225 = vmax.xlane.f32.xlu0 %v1224_v50  ;;  %v932_v50 = vsel %vm931_vm2, %v5717_v51, %v930_v35  ;;  %v4314_v34 = vpop.eup %4313 }
 0x189   : > { %1144 = vst [vmem:[%s5425_s14 + $0x130] sm:$0xff] %v5821_v46  ;;  %v5853_v35 = vsel %vm933_vm3, %v934_v10, %v932_v50  ;;  %v4316_v51 = vpop.eup %4315  ;;  %v944_v43 = vmul.f32 %v4314_v34, %v5726_v30 }
 0x18a   : > { %1145 = vst [vmem:[%s5425_s14 + $0x138] sm:$0xff] %v5823_v60  ;;  %v587_v52 = vpop.f32.mrb[40].mxu0  ;;  %v1227_v11 = vmax.f32 %v5821_v46, %v5823_v60  ;;  %8375 = vst [vmem:[#allocation53_spill] sm:$0xff] %v5853_v35  ;;  %v4318_v10 = vpop.eup %4317  ;;  %v1003_v31 = vadd.f32 1e-06, %v5853_v35 }
 0x18b   : > { %v5844_v9 = vmul.f32 %v4312_v44, %v587_v52  ;;  %v589_v0 = vpop.f32.mrb[41].mxu0 }
 0x18c   : > { %v5846_v40 = vmul.f32 %v4312_v44, %v589_v0  ;;  %1228 = vmax.xlane.f32.xlu1 %v1227_v11  ;;  %v5858_v44 = vpop.xlane.xlu0 %752  ;;  %v939_v11 = vsel %vm938_vm4, %v5689_v56, %v937_v20  ;;  %v4320_v56 = vpop.eup %4319 }
 0x18d   : > { %1146 = vst [vmem:[%s5425_s14 + $0x140] sm:$0xff] %v5844_v9  ;;  %4329 = vrsqrt.f32 %v5858_v44  ;;  %v5876_v20 = vsel %vm940_vm5, %v941_v57, %v939_v11  ;;  %vm973_vm14 = vcmp.eq.f32.partialorder %v5858_v44, inf  ;;  %vm975_vm15 = vcmp.eq.f32.partialorder %v5858_v44, 0.0 }
 0x18e   : > { %1147 = vst [vmem:[%s5425_s14 + $0x148] sm:$0xff] %v5846_v40  ;;  %v593_v52 = vpop.f32.mrb[42].mxu0  ;;  %v1230_v5 = vmax.f32 %v5844_v9, %v5846_v40  ;;  %8376 = vst [vmem:[#allocation54_spill] sm:$0xff] %v5876_v20  ;;  %4331 = vrcp.f32 %v1003_v31  ;;  %v1004_v35 = vadd.f32 1e-06, %v5876_v20  ;;  %v962_v20 = vand.u32 2147483648, %v5793_v59 }
 0x18f   : > { %v5867_v50 = vmul.f32 %v4316_v51, %v593_v52  ;;  %v595_v34 = vpop.f32.mrb[43].mxu0  ;;  %v951_v52 = vmul.f32 %v4318_v10, %v5758_v4 }
 0x190   : > { %v5869_v0 = vmul.f32 %v4316_v51, %v595_v34  ;;  %1231 = vmax.xlane.f32.xlu0 %v1230_v5  ;;  %v946_v5 = vsel %vm945_vm6, %v5726_v30, %v944_v43  ;;  %v4322_v34 = vpop.eup %4321  ;;  %4333 = vrcp.f32 %v1004_v35 }
 0x191   : > { %1148 = vst [vmem:[%s5425_s14 + $0x150] sm:$0xff] %v5867_v50  ;;  %v5896_v8 = vsel %vm947_vm7, %v948_v29, %v946_v5  ;;  %v4324_v43 = vpop.eup %4323  ;;  %v958_v30 = vmul.f32 %v4322_v34, %v5793_v59  ;;  %v953_v31 = vsel %vm952_vm8, %v5758_v4, %v951_v52 }
 0x192   : > { %1149 = vst [vmem:[%s5425_s14 + $0x158] sm:$0xff] %v5869_v0  ;;  %v599_v51 = vpop.f32.mrb[44].mxu0  ;;  %v1233_v2 = vmax.f32 %v5867_v50, %v5869_v0  ;;  %8377 = vst [vmem:[#allocation55_spill] sm:$0xff] %v5896_v8  ;;  %v1005_v34 = vadd.f32 1e-06, %v5896_v8  ;;  %v5914_v3 = vsel %vm954_vm9, %v955_v14, %v953_v31  ;;  %v969_v8 = vand.u32 2147483648, %v5825_v47 }
 0x193   : > { %v5888_v57 = vmul.f32 %v4320_v56, %v599_v51  ;;  %v601_v11 = vpop.f32.mrb[45].mxu0  ;;  %8378 = vst [vmem:[#allocation56_spill] sm:$0xff] %v5914_v3  ;;  %v960_v35 = vsel %vm959_vm10, %v5793_v59, %v958_v30 }
 0x194   : > { %v5890_v10 = vmul.f32 %v4320_v56, %v601_v11  ;;  %1234 = vmax.xlane.f32.xlu0 %v1233_v2  ;;  %v4326_v2 = vpop.eup %4325  ;;  %4335 = vrcp.f32 %v1005_v34  ;;  %v5932_v49 = vsel %vm961_vm11, %v962_v20, %v960_v35 }
 0x195   : > { %1150 = vst [vmem:[%s5425_s14 + $0x160] sm:$0xff] %v5888_v57  ;;  %v4328_v52 = vpop.eup %4327  ;;  %v965_v4 = vmul.f32 %v4326_v2, %v5825_v47  ;;  %v1006_v2 = vadd.f32 1e-06, %v5914_v3  ;;  %8379 = vst [vmem:[#allocation57_spill] sm:$0xff] %v5932_v49 }
 0x196   : > { %1151 = vst [vmem:[%s5425_s14 + $0x168] sm:$0xff] %v5890_v10  ;;  %v605_v51 = vpop.f32.mrb[46].mxu0  ;;  %v1236_v56 = vmax.f32 %v5888_v57, %v5890_v10 }
 0x197   : > { %v5906_v29 = vmul.f32 %v4324_v43, %v605_v51  ;;  %v607_v5 = vpop.f32.mrb[47].mxu0  ;;  %v967_v34 = vsel %vm966_vm12, %v5825_v47, %v965_v4  ;;  %4337 = vrcp.f32 %v1006_v2 }
 0x198   : > { %v5908_v11 = vmul.f32 %v4324_v43, %v607_v5  ;;  %1237 = vmax.xlane.f32.xlu0 %v1236_v56  ;;  %v4330_v56 = vpop.eup %4329  ;;  %v5950_v3 = vsel %vm968_vm13, %v969_v8, %v967_v34 }
 0x199   : > { %1152 = vst [vmem:[%s5425_s14 + $0x170] sm:$0xff] %v5906_v29  ;;  %v4332_v59 = vpop.eup %4331  ;;  %v972_v30 = vmul.f32 %v4330_v56, %v5858_v44  ;;  %v1007_v56 = vadd.f32 1e-06, %v5932_v49  ;;  %8380 = vst [vmem:[#allocation58_spill] sm:$0xff] %v5950_v3  ;;  %v1008_v8 = vadd.f32 1e-06, %v5950_v3 }
 0x19a   : > { %1153 = vst [vmem:[%s5425_s14 + $0x178] sm:$0xff] %v5908_v11  ;;  %v611_v51 = vpop.f32.mrb[48].mxu0  ;;  %v1239_v43 = vmax.f32 %v5906_v29, %v5908_v11  ;;  %v4334_v47 = vpop.eup %4333 }
 0x19b   : > { %v5924_v14 = vmul.f32 %v4328_v52, %v611_v51  ;;  %v613_v31 = vpop.f32.mrb[49].mxu0  ;;  %4339 = vrcp.f32 %v1007_v56 }
 0x19c   : > { %v5926_v5 = vmul.f32 %v4328_v52, %v613_v31  ;;  %1240 = vmax.xlane.f32.xlu0 %v1239_v43  ;;  %v976_v31 = vand.u32 2147483648, %v5858_v44  ;;  %4341 = vrcp.f32 %v1008_v8 }
 0x19d   : > { %1154 = vst [vmem:[%s5425_s14 + $0x180] sm:$0xff] %v5924_v14 }
 0x19e   : > { %1155 = vst [vmem:[%s5425_s14 + $0x188] sm:$0xff] %v5926_v5  ;;  %v617_v51 = vpop.f32.mrb[50].mxu0  ;;  %v1242_v52 = vmax.f32 %v5924_v14, %v5926_v5  ;;  %v4336_v49 = vpop.eup %4335 }
 0x19f   : > { %v5942_v43 = vmul.f32 %v4332_v59, %v617_v51  ;;  %v619_v20 = vpop.f32.mrb[51].mxu0  ;;  %v974_v51 = vsel %vm973_vm14, %v5858_v44, %v972_v30 }
 0x1a0   : > { %v5944_v35 = vmul.f32 %v4332_v59, %v619_v20  ;;  %1243 = vmax.xlane.f32.xlu0 %v1242_v52  ;;  %v5965_v34 = vsel %vm975_vm15, %v976_v31, %v974_v51 }
 0x1a1   : > { %1156 = vst [vmem:[%s5425_s14 + $0x190] sm:$0xff] %v5942_v43  ;;  %8381 = vst [vmem:[#allocation59_spill] sm:$0xff] %v5965_v34  ;;  %v1009_v56 = vadd.f32 1e-06, %v5965_v34  ;;  %v4338_v31 = vpop.eup %4337 }
 0x1a2   : > { %1157 = vst [vmem:[%s5425_s14 + $0x198] sm:$0xff] %v5944_v35  ;;  %v623_v4 = vpop.f32.mrb[52].mxu0  ;;  %v1245_v59 = vmax.f32 %v5942_v43, %v5944_v35 }
 0x1a3   : > { %v5958_v2 = vmul.f32 %v4334_v47, %v623_v4  ;;  %v625_v52 = vpop.f32.mrb[53].mxu0  ;;  %4343 = vrcp.f32 %v1009_v56 }
 0x1a4   : > { %v5960_v20 = vmul.f32 %v4334_v47, %v625_v52  ;;  %1246 = vmax.xlane.f32.xlu0 %v1245_v59 }
 0x1a5   : > { %1158 = vst [vmem:[%s5425_s14 + $0x1a0] sm:$0xff] %v5958_v2  ;;  %v4340_v8 = vpop.eup %4339 }
 0x1a6   : > { %1159 = vst [vmem:[%s5425_s14 + $0x1a8] sm:$0xff] %v5960_v20  ;;  %v629_v30 = vpop.f32.mrb[54].mxu0  ;;  %v1248_v44 = vmax.f32 %v5958_v2, %v5960_v20  ;;  %v4342_v56 = vpop.eup %4341 }
 0x1a7   : > { %v5971_v4 = vmul.f32 %v4336_v49, %v629_v30  ;;  %v631_v47 = vpop.f32.mrb[55].mxu0 }
 0x1a8   : > { %v5973_v59 = vmul.f32 %v4336_v49, %v631_v47  ;;  %1249 = vmax.xlane.f32.xlu0 %v1248_v44 }
 0x1a9   : > { %1160 = vst [vmem:[%s5425_s14 + $0x1b0] sm:$0xff] %v5971_v4 }
 0x1aa   : > { %1161 = vst [vmem:[%s5425_s14 + $0x1b8] sm:$0xff] %v5973_v59  ;;  %v635_v51 = vpop.f32.mrb[56].mxu0  ;;  %v1251_v52 = vmax.f32 %v5971_v4, %v5973_v59 }
 0x1ab   : > { %v5982_v30 = vmul.f32 %v4338_v31, %v635_v51  ;;  %v637_v49 = vpop.f32.mrb[57].mxu0 }
 0x1ac   : > { %v5984_v47 = vmul.f32 %v4338_v31, %v637_v49  ;;  %1252 = vmax.xlane.f32.xlu0 %v1251_v52 }
 0x1ad   : > { %1162 = vst [vmem:[%s5425_s14 + $0x1c0] sm:$0xff] %v5982_v30 }
 0x1ae   : > { %1163 = vst [vmem:[%s5425_s14 + $0x1c8] sm:$0xff] %v5984_v47  ;;  %v641_v44 = vpop.f32.mrb[58].mxu0  ;;  %v1254_v34 = vmax.f32 %v5982_v30, %v5984_v47 }
 0x1af   : > { %v5992_v3 = vmul.f32 %v4340_v8, %v641_v44  ;;  %v643_v51 = vpop.f32.mrb[59].mxu0 }
 0x1b0   : > { %v5994_v32 = vmul.f32 %v4340_v8, %v643_v51  ;;  %1255 = vmax.xlane.f32.xlu0 %v1254_v34  ;;  %v4344_v34 = vpop.eup %4343 }
 0x1b1   : > { %1164 = vst [vmem:[%s5425_s14 + $0x1d0] sm:$0xff] %v5992_v3 }
 0x1b2   : > { %8382 = vst [vmem:[#allocation60_spill] sm:$0xff] %v5994_v32  ;;  %1165 = vst [vmem:[%s5425_s14 + $0x1d8] sm:$0xff] %v5994_v32  ;;  %v647_v31 = vpop.f32.mrb[60].mxu0  ;;  %v1257_v52 = vmax.f32 %v5992_v3, %v5994_v32  ;;  %v6105_v32 = vld [vmem:[%s5425_s14 + $0x40] sm:$0xff] }
 0x1b3   : > { %v6002_v49 = vmul.f32 %v4342_v56, %v647_v31  ;;  %v649_v6 = vpop.f32.mrb[61].mxu0  ;;  %8407 = vst [vmem:[#allocation85_spill] sm:$0xff] %v6105_v32 }
 0x1b4   : > { %v6004_v44 = vmul.f32 %v4342_v56, %v649_v6  ;;  %1258 = vmax.xlane.f32.xlu0 %v1257_v52  ;;  %v1714_v56 = vlaneseq }
 0x1b5   : > { %8383 = vst [vmem:[#allocation61_spill] sm:$0xff] %v6002_v49  ;;  %1166 = vst [vmem:[%s5425_s14 + $0x1e0] sm:$0xff] %v6002_v49 }
 0x1b6   : > { %8384 = vst [vmem:[#allocation62_spill] sm:$0xff] %v6004_v44  ;;  %1167 = vst [vmem:[%s5425_s14 + $0x1e8] sm:$0xff] %v6004_v44  ;;  %v653_v8 = vpop.f32.mrb[62].mxu0  ;;  %v1260_v51 = vmax.f32 %v6002_v49, %v6004_v44  ;;  %v6022_v52 = vand.u32 127, %v1714_v56 }
 0x1b7   : > { %v6012_v55 = vmul.f32 %v4344_v34, %v653_v8  ;;  %v655_v41 = vpop.f32.mrb[63].mxu0 }
 0x1b8   : > { %v6014_v31 = vmul.f32 %v4344_v34, %v655_v41  ;;  %1261 = vmax.xlane.f32.xlu0 %v1260_v51  ;;  %8387 = vst [vmem:[#allocation65_spill] sm:$0xff] %v6022_v52  ;;  %v6025_v8 = vadd.s32 128, %v6022_v52  ;;  %v6030_v41 = vld [vmem:[%s5425_s14] sm:$0xff]  ;;  %v6035_v34 = vld [vmem:[%s5425_s14 + $0x8] sm:$0xff] }
 0x1b9   : > { %8385 = vst [vmem:[#allocation63_spill] sm:$0xff] %v6012_v55  ;;  %1168 = vst [vmem:[%s5425_s14 + $0x1f0] sm:$0xff] %v6012_v55 }
 0x1ba   : > { %8386 = vst [vmem:[#allocation64_spill] sm:$0xff] %v6014_v31  ;;  %1169 = vst [vmem:[%s5425_s14 + $0x1f8] sm:$0xff] %v6014_v31  ;;  %v1263_v6 = vmax.f32 %v6012_v55, %v6014_v31 }
 0x1bb   : > { %8388 = vst [vmem:[#allocation66_spill] sm:$0xff] %v6025_v8  ;;  %8390 = vst [vmem:[#allocation68_spill] sm:$0xff] %v6030_v41 }
 0x1bc   : > { %1264 = vmax.xlane.f32.xlu0 %v1263_v6  ;;  %8391 = vst [vmem:[#allocation69_spill] sm:$0xff] %v6035_v34 }
 0x1cd   : > { %v6027_v27 = vpop.xlane.xlu1 %1171 }
 0x1ce   : > { %8389 = vst [vmem:[#allocation67_spill] sm:$0xff] %v6027_v27  ;;  %vm1717_vm0 = vcmp.eq.f32.partialorder %v6030_v41, %v6027_v27  ;;  %vm1718_vm1 = vcmp.eq.f32.partialorder %v6035_v34, %v6027_v27  ;;  %v6052_v41 = vld [vmem:[%s5425_s14 + $0x18] sm:$0xff] }
 0x1cf   : > { %v1781_v51 = vsel %vm1717_vm0, %v6022_v52, 256  ;;  %v1782_v6 = vsel %vm1718_vm1, %v6025_v8, 256  ;;  %8395 = vst [vmem:[#allocation73_spill] sm:$0xff] %v6052_v41 }
 0x1d0   : > { %vm1845_vm2 = vcmp.lt.s32.totalorder %v1781_v51, %v1782_v6 }
 0x1d1   : > { %v6041_v56 = vpop.xlane.xlu1 %1174  ;;  %v6043_v31 = vsel %vm1845_vm2, %v1781_v51, %v1782_v6 }
 0x1d2   : > { %8392 = vst [vmem:[#allocation70_spill] sm:$0xff] %v6041_v56  ;;  %8393 = vst [vmem:[#allocation71_spill] sm:$0xff] %v6043_v31  ;;  %v1848_v55 = vshra.s32 %v6043_v31, 16  ;;  %vm1719_vm3 = vcmp.eq.f32.partialorder %v6047_v13, %v6041_v56  ;;  %vm1720_vm4 = vcmp.eq.f32.partialorder %v6052_v41, %v6041_v56  ;;  %v6066_v13 = vld [vmem:[%s5425_s14 + $0x20] sm:$0xff] }
 0x1d3   : > { %v1783_v27 = vsel %vm1719_vm3, %v6022_v52, 256  ;;  %v1784_v51 = vsel %vm1720_vm4, %v6025_v8, 256  ;;  %8399 = vst [vmem:[#allocation77_spill] sm:$0xff] %v6066_v13 }
 0x1d4   : > { %v6056_v34 = vcvt.s32.f32 %v1848_v55  ;;  %vm1861_vm5 = vcmp.lt.s32.totalorder %v1783_v27, %v1784_v51  ;;  %v6071_v55 = vld [vmem:[%s5425_s14 + $0x28] sm:$0xff] }
 0x1d5   : > { %v6059_v44 = vpop.xlane.xlu1 %1177  ;;  %v6063_v6 = vsel %vm1861_vm5, %v1783_v27, %v1784_v51  ;;  %8400 = vst [vmem:[#allocation78_spill] sm:$0xff] %v6071_v55  ;;  %v6083_v51 = vld [vmem:[%s5425_s14 + $0x30] sm:$0xff] }
 0x1d6   : > { %8396 = vst [vmem:[#allocation74_spill] sm:$0xff] %v6056_v34  ;;  %8397 = vst [vmem:[#allocation75_spill] sm:$0xff] %v6059_v44  ;;  %1851 = vmin.xlane.f32.xlu1 %v6056_v34  ;;  %vm1721_vm6 = vcmp.eq.f32.partialorder %v6066_v13, %v6059_v44  ;;  %vm1722_vm7 = vcmp.eq.f32.partialorder %v6071_v55, %v6059_v44  ;;  %v1864_v41 = vshra.s32 %v6063_v6, 16  ;;  %v6088_v13 = vld [vmem:[%s5425_s14 + $0x38] sm:$0xff] }
 0x1d7   : > { %8398 = vst [vmem:[#allocation76_spill] sm:$0xff] %v6063_v6  ;;  %v1785_v56 = vsel %vm1721_vm6, %v6022_v52, 256  ;;  %v1786_v34 = vsel %vm1722_vm7, %v6025_v8, 256  ;;  %8402 = vst [vmem:[#allocation80_spill] sm:$0xff] %v6083_v51 }
 0x1d8   : > { %v6080_v27 = vcvt.s32.f32 %v1864_v41  ;;  %vm1877_vm8 = vcmp.lt.s32.totalorder %v1785_v56, %v1786_v34  ;;  %8403 = vst [vmem:[#allocation81_spill] sm:$0xff] %v6088_v13 }
 0x1d9   : > { %v6077_v31 = vpop.xlane.xlu1 %1180  ;;  %v6093_v55 = vsel %vm1877_vm8, %v1785_v56, %v1786_v34  ;;  %v6111_v56 = vld [vmem:[%s5425_s14 + $0x48] sm:$0xff] }
 0x1da   : > { %8401 = vst [vmem:[#allocation79_spill] sm:$0xff] %v6077_v31  ;;  %vm1723_vm9 = vcmp.eq.f32.partialorder %v6083_v51, %v6077_v31  ;;  %vm1724_vm10 = vcmp.eq.f32.partialorder %v6088_v13, %v6077_v31  ;;  %1867 = vmin.xlane.f32.xlu1 %v6080_v27  ;;  %v1880_v6 = vshra.s32 %v6093_v55, 16  ;;  %8408 = vst [vmem:[#allocation86_spill] sm:$0xff] %v6111_v56 }
 0x1db   : > { %v1787_v44 = vsel %vm1723_vm9, %v6022_v52, 256  ;;  %v1788_v49 = vsel %vm1724_vm10, %v6025_v8, 256 }
 0x1dc   : > { %vm1893_vm11 = vcmp.lt.s32.totalorder %v1787_v44, %v1788_v49  ;;  %v6100_v7 = vcvt.s32.f32 %v1880_v6 }
 0x1dd   : > { %v6096_v41 = vpop.xlane.xlu1 %1183  ;;  %v6102_v51 = vsel %vm1893_vm11, %v1787_v44, %v1788_v49 }
 0x1de   : > { %8404 = vst [vmem:[#allocation82_spill] sm:$0xff] %v6096_v41  ;;  %8405 = vst [vmem:[#allocation83_spill] sm:$0xff] %v6100_v7  ;;  %vm1725_vm12 = vcmp.eq.f32.partialorder %v6105_v32, %v6096_v41  ;;  %v1896_v34 = vshra.s32 %v6102_v51, 16  ;;  %vm1726_vm13 = vcmp.eq.f32.partialorder %v6111_v56, %v6096_v41  ;;  %1883 = vmin.xlane.f32.xlu1 %v6100_v7 }
 0x1df   : > { %8406 = vst [vmem:[#allocation84_spill] sm:$0xff] %v6102_v51  ;;  %v1789_v6 = vsel %vm1725_vm12, %v6022_v52, 256  ;;  %v1790_v49 = vsel %vm1726_vm13, %v6025_v8, 256 }
 0x1e0   : > { %v6120_v44 = vcvt.s32.f32 %v1896_v34  ;;  %vm1909_vm14 = vcmp.lt.s32.totalorder %v1789_v6, %v1790_v49 }
 0x1e1   : > { %v6116_v13 = vpop.xlane.xlu1 %1186  ;;  %v6126_v32 = vsel %vm1909_vm14, %v1789_v6, %v1790_v49 }
 0x1e2   : > { %8409 = vst [vmem:[#allocation87_spill] sm:$0xff] %v6116_v13  ;;  %vm1727_vm15 = vcmp.eq.f32.partialorder %v5499_v54, %v6116_v13  ;;  %vm1728_vm0 = vcmp.eq.f32.partialorder %v5501_v62, %v6116_v13  ;;  %1899 = vmin.xlane.f32.xlu1 %v6120_v44  ;;  %v1912_v31 = vshra.s32 %v6126_v32, 16 }
 0x1e3   : > { %v1791_v56 = vsel %vm1727_vm15, %v6022_v52, 256  ;;  %v1792_v34 = vsel %vm1728_vm0, %v6025_v8, 256 }
 0x1e4   : > { %vm1925_vm1 = vcmp.lt.s32.totalorder %v1791_v56, %v1792_v34  ;;  %v6134_v7 = vcvt.s32.f32 %v1912_v31 }
 0x1e5   : > { %v6130_v41 = vpop.xlane.xlu0 %1189  ;;  %v6136_v51 = vsel %vm1925_vm1, %v1791_v56, %v1792_v34 }
 0x1e6   : > { %8410 = vst [vmem:[#allocation88_spill] sm:$0xff] %v6130_v41  ;;  %vm1729_vm2 = vcmp.eq.f32.partialorder %v5522_v28, %v6130_v41  ;;  %v1928_v54 = vshra.s32 %v6136_v51, 16  ;;  %vm1730_vm3 = vcmp.eq.f32.partialorder %v5524_v33, %v6130_v41  ;;  %1915 = vmin.xlane.f32.xlu1 %v6134_v7 }
 0x1e7   : > { %v1793_v6 = vsel %vm1729_vm2, %v6022_v52, 256  ;;  %v1794_v49 = vsel %vm1730_vm3, %v6025_v8, 256 }
 0x1e8   : > { %v6148_v31 = vcvt.s32.f32 %v1928_v54  ;;  %vm1941_vm4 = vcmp.lt.s32.totalorder %v1793_v6, %v1794_v49 }
 0x1e9   : > { %v6144_v62 = vpop.xlane.xlu1 %1192  ;;  %v6154_v28 = vsel %vm1941_vm4, %v1793_v6, %v1794_v49 }
 0x1ea   : > { %8411 = vst [vmem:[#allocation89_spill] sm:$0xff] %v6144_v62  ;;  %vm1731_vm5 = vcmp.eq.f32.partialorder %v5545_v25, %v6144_v62  ;;  %vm1732_vm6 = vcmp.eq.f32.partialorder %v5547_v19, %v6144_v62  ;;  %1931 = vmin.xlane.f32.xlu1 %v6148_v31  ;;  %v1944_v34 = vshra.s32 %v6154_v28, 16 }
 0x1eb   : > { %v1795_v33 = vsel %vm1731_vm5, %v6022_v52, 256  ;;  %v1796_v54 = vsel %vm1732_vm6, %v6025_v8, 256 }
 0x1ec   : > { %vm1957_vm7 = vcmp.lt.s32.totalorder %v1795_v33, %v1796_v54  ;;  %v6162_v41 = vcvt.s32.f32 %v1944_v34 }
 0x1ed   : > { %v6158_v56 = vpop.xlane.xlu0 %1195  ;;  %v6164_v13 = vsel %vm1957_vm7, %v1795_v33, %v1796_v54 }
 0x1ee   : > { %8412 = vst [vmem:[#allocation90_spill] sm:$0xff] %v6158_v56  ;;  %vm1733_vm8 = vcmp.eq.f32.partialorder %v5568_v12, %v6158_v56  ;;  %v1960_v25 = vshra.s32 %v6164_v13, 16  ;;  %vm1734_vm9 = vcmp.eq.f32.partialorder %v5570_v21, %v6158_v56  ;;  %1947 = vmin.xlane.f32.xlu1 %v6162_v41 }
 0x1ef   : > { %v1797_v6 = vsel %vm1733_vm8, %v6022_v52, 256  ;;  %v1798_v49 = vsel %vm1734_vm9, %v6025_v8, 256 }
 0x1f0   : > { %v6176_v34 = vcvt.s32.f32 %v1960_v25  ;;  %vm1973_vm10 = vcmp.lt.s32.totalorder %v1797_v6, %v1798_v49 }
 0x1f1   : > { %v6172_v19 = vpop.xlane.xlu1 %1198  ;;  %v6182_v12 = vsel %vm1973_vm10, %v1797_v6, %v1798_v49 }
 0x1f2   : > { %8413 = vst [vmem:[#allocation91_spill] sm:$0xff] %v6172_v19  ;;  %vm1735_vm11 = vcmp.eq.f32.partialorder %v5591_v23, %v6172_v19  ;;  %vm1736_vm12 = vcmp.eq.f32.partialorder %v5593_v26, %v6172_v19  ;;  %1963 = vmin.xlane.f32.xlu1 %v6176_v34  ;;  %v1976_v54 = vshra.s32 %v6182_v12, 16 }
 0x1f3   : > { %v1799_v21 = vsel %vm1735_vm11, %v6022_v52, 256  ;;  %v1800_v25 = vsel %vm1736_vm12, %v6025_v8, 256 }
 0x1f4   : > { %vm1989_vm13 = vcmp.lt.s32.totalorder %v1799_v21, %v1800_v25  ;;  %v6190_v56 = vcvt.s32.f32 %v1976_v54 }
 0x1f5   : > { %v6186_v33 = vpop.xlane.xlu0 %1201  ;;  %v6192_v62 = vsel %vm1989_vm13, %v1799_v21, %v1800_v25 }
 0x1f6   : > { %8414 = vst [vmem:[#allocation92_spill] sm:$0xff] %v6186_v33  ;;  %vm1737_vm14 = vcmp.eq.f32.partialorder %v5614_v16, %v6186_v33  ;;  %v1992_v23 = vshra.s32 %v6192_v62, 16  ;;  %1979 = vmin.xlane.f32.xlu1 %v6190_v56  ;;  %vm1738_vm15 = vcmp.eq.f32.partialorder %v5616_v15, %v6186_v33 }
 0x1f7   : > { %v1801_v6 = vsel %vm1737_vm14, %v6022_v52, 256  ;;  %v1802_v54 = vsel %vm1738_vm15, %v6025_v8, 256 }
 0x1f8   : > { %v6203_v49 = vcvt.s32.f32 %v1992_v23  ;;  %vm2005_vm2 = vcmp.lt.s32.totalorder %v1801_v6, %v1802_v54 }
 0x1f9   : > { %v6198_v26 = vpop.xlane.xlu1 %1204  ;;  %v6214_v15 = vsel %vm2005_vm2, %v1801_v6, %v1802_v54 }
 0x1fa   : > { %8415 = vst [vmem:[#allocation93_spill] sm:$0xff] %v6198_v26  ;;  %vm1739_vm0 = vcmp.eq.f32.partialorder %v5637_v1, %v6198_v26  ;;  %vm1740_vm1 = vcmp.eq.f32.partialorder %v5639_v17, %v6198_v26  ;;  %1995 = vmin.xlane.f32.xlu1 %v6203_v49  ;;  %v2008_v23 = vshra.s32 %v6214_v15, 16 }
 0x1fb   : > { %v1803_v16 = vsel %vm1739_vm0, %v6022_v52, 256  ;;  %v1804_v25 = vsel %vm1740_vm1, %v6025_v8, 256 }
 0x1fc   : > { %vm2021_vm3 = vcmp.lt.s32.totalorder %v1803_v16, %v1804_v25  ;;  %v6224_v17 = vcvt.s32.f32 %v2008_v23 }
 0x1fd   : > { %v6212_v21 = vpop.xlane.xlu0 %1207  ;;  %v6220_v1 = vsel %vm2021_vm3, %v1803_v16, %v1804_v25 }
 0x1fe   : > { %8416 = vst [vmem:[#allocation94_spill] sm:$0xff] %v6212_v21  ;;  %vm1741_vm4 = vcmp.eq.f32.partialorder %v5660_v58, %v6212_v21  ;;  %vm1742_vm5 = vcmp.eq.f32.partialorder %v5662_v45, %v6212_v21  ;;  %v2024_v6 = vshra.s32 %v6220_v1, 16  ;;  %2011 = vmin.xlane.f32.xlu1 %v6224_v17 }
 0x1ff   : > { %v1805_v54 = vsel %vm1741_vm4, %v6022_v52, 256  ;;  %v1806_v33 = vsel %vm1742_vm5, %v6025_v8, 256 }
 0x200   : > { %v6232_v19 = vcvt.s32.f32 %v2024_v6  ;;  %vm2037_vm6 = vcmp.lt.s32.totalorder %v1805_v54, %v1806_v33 }
 0x201   : > { %v6226_v26 = vpop.xlane.xlu1 %1210  ;;  %v6236_v58 = vsel %vm2037_vm6, %v1805_v54, %v1806_v33 }
 0x202   : > { %8417 = vst [vmem:[#allocation95_spill] sm:$0xff] %v6226_v26  ;;  %vm1743_vm7 = vcmp.eq.f32.partialorder %v5685_v63, %v6226_v26  ;;  %vm1744_vm8 = vcmp.eq.f32.partialorder %v5687_v18, %v6226_v26  ;;  %v2040_v16 = vshra.s32 %v6236_v58, 16  ;;  %2027 = vmin.xlane.f32.xlu1 %v6232_v19 }
 0x203   : > { %v1807_v25 = vsel %vm1743_vm7, %v6022_v52, 256  ;;  %v1808_v23 = vsel %vm1744_vm8, %v6025_v8, 256 }
 0x204   : > { %vm2053_vm9 = vcmp.lt.s32.totalorder %v1807_v25, %v1808_v23  ;;  %v6246_v6 = vcvt.s32.f32 %v2040_v16 }
 0x205   : > { %v6240_v45 = vpop.xlane.xlu0 %1213  ;;  %v6248_v21 = vsel %vm2053_vm9, %v1807_v25, %v1808_v23 }
 0x206   : > { %8418 = vst [vmem:[#allocation96_spill] sm:$0xff] %v6240_v45  ;;  %vm1745_vm10 = vcmp.eq.f32.partialorder %v5708_v48, %v6240_v45  ;;  %v2056_v18 = vshra.s32 %v6248_v21, 16  ;;  %2043 = vmin.xlane.f32.xlu0 %v6246_v6  ;;  %vm1746_vm11 = vcmp.eq.f32.partialorder %v5710_v39, %v6240_v45 }
 0x207   : > { %v1809_v33 = vsel %vm1745_vm10, %v6022_v52, 256  ;;  %v1810_v16 = vsel %vm1746_vm11, %v6025_v8, 256 }
 0x208   : > { %v6259_v54 = vcvt.s32.f32 %v2056_v18  ;;  %vm2069_vm14 = vcmp.lt.s32.totalorder %v1809_v33, %v1810_v16 }
 0x209   : > { %v6254_v63 = vpop.xlane.xlu1 %1216  ;;  %v6270_v39 = vsel %vm2069_vm14, %v1809_v33, %v1810_v16 }
 0x20a   : > { %8419 = vst [vmem:[#allocation97_spill] sm:$0xff] %v6254_v63  ;;  %vm1747_vm12 = vcmp.eq.f32.partialorder %v5733_v22, %v6254_v63  ;;  %vm1748_vm13 = vcmp.eq.f32.partialorder %v5735_v53, %v6254_v63  ;;  %2059 = vmin.xlane.f32.xlu1 %v6259_v54  ;;  %v2072_v18 = vshra.s32 %v6270_v39, 16 }
 0x20b   : > { %v1811_v48 = vsel %vm1747_vm12, %v6022_v52, 256  ;;  %v1812_v23 = vsel %vm1748_vm13, %v6025_v8, 256 }
 0x20c   : > { %vm2085_vm15 = vcmp.lt.s32.totalorder %v1811_v48, %v1812_v23  ;;  %v6280_v53 = vcvt.s32.f32 %v2072_v18 }
 0x20d   : > { %v6268_v25 = vpop.xlane.xlu0 %1219  ;;  %v6276_v22 = vsel %vm2085_vm15, %v1811_v48, %v1812_v23 }
 0x20e   : > { %8420 = vst [vmem:[#allocation98_spill] sm:$0xff] %v6268_v25  ;;  %vm1749_vm0 = vcmp.eq.f32.partialorder %v5754_v36, %v6268_v25  ;;  %vm1750_vm1 = vcmp.eq.f32.partialorder %v5756_v38, %v6268_v25  ;;  %v2088_v33 = vshra.s32 %v6276_v22, 16  ;;  %2075 = vmin.xlane.f32.xlu0 %v6280_v53 }
 0x20f   : > { %v1813_v16 = vsel %vm1749_vm0, %v6022_v52, 256  ;;  %v1814_v45 = vsel %vm1750_vm1, %v6025_v8, 256 }
 0x210   : > { %v6288_v26 = vcvt.s32.f32 %v2088_v33  ;;  %vm2101_vm2 = vcmp.lt.s32.totalorder %v1813_v16, %v1814_v45 }
 0x211   : > { %v6282_v63 = vpop.xlane.xlu1 %1222  ;;  %v6292_v36 = vsel %vm2101_vm2, %v1813_v16, %v1814_v45 }
 0x212   : > { %8421 = vst [vmem:[#allocation99_spill] sm:$0xff] %v6282_v63  ;;  %vm1751_vm3 = vcmp.eq.f32.partialorder %v5777_v42, %v6282_v63  ;;  %vm1752_vm4 = vcmp.eq.f32.partialorder %v5779_v37, %v6282_v63  ;;  %2091 = vmin.xlane.f32.xlu1 %v6288_v26  ;;  %v2104_v48 = vshra.s32 %v6292_v36, 16 }
 0x213   : > { %v1815_v23 = vsel %vm1751_vm3, %v6022_v52, 256  ;;  %v1816_v18 = vsel %vm1752_vm4, %v6025_v8, 256 }
 0x214   : > { %vm2117_vm5 = vcmp.lt.s32.totalorder %v1815_v23, %v1816_v18  ;;  %v6302_v33 = vcvt.s32.f32 %v2104_v48 }
 0x215   : > { %v6297_v38 = vpop.xlane.xlu0 %1225  ;;  %v6304_v25 = vsel %vm2117_vm5, %v1815_v23, %v1816_v18 }
 0x216   : > { %8422 = vst [vmem:[#allocation100_spill] sm:$0xff] %v6297_v38  ;;  %vm1753_vm6 = vcmp.eq.f32.partialorder %v5800_v61, %v6297_v38  ;;  %v2120_v42 = vshra.s32 %v6304_v25, 16  ;;  %2107 = vmin.xlane.f32.xlu0 %v6302_v33  ;;  %vm1754_vm7 = vcmp.eq.f32.partialorder %v5802_v24, %v6297_v38 }
 0x217   : > { %v1817_v45 = vsel %vm1753_vm6, %v6022_v52, 256  ;;  %v1818_v48 = vsel %vm1754_vm7, %v6025_v8, 256 }
 0x218   : > { %v6315_v16 = vcvt.s32.f32 %v2120_v42  ;;  %vm2133_vm10 = vcmp.lt.s32.totalorder %v1817_v45, %v1818_v48 }
 0x219   : > { %v6310_v37 = vpop.xlane.xlu1 %1228  ;;  %v6326_v24 = vsel %vm2133_vm10, %v1817_v45, %v1818_v48 }
 0x21a   : > { %8423 = vst [vmem:[#allocation101_spill] sm:$0xff] %v6310_v37  ;;  %vm1755_vm8 = vcmp.eq.f32.partialorder %v5821_v46, %v6310_v37  ;;  %vm1756_vm9 = vcmp.eq.f32.partialorder %v5823_v60, %v6310_v37  ;;  %2123 = vmin.xlane.f32.xlu1 %v6315_v16  ;;  %v2136_v42 = vshra.s32 %v6326_v24, 16 }
 0x21b   : > { %v1819_v61 = vsel %vm1755_vm8, %v6022_v52, 256  ;;  %v1820_v18 = vsel %vm1756_vm9, %v6025_v8, 256 }
 0x21c   : > { %vm2149_vm11 = vcmp.lt.s32.totalorder %v1819_v61, %v1820_v18  ;;  %v6336_v60 = vcvt.s32.f32 %v2136_v42 }
 0x21d   : > { %v6324_v23 = vpop.xlane.xlu0 %1231  ;;  %v6332_v46 = vsel %vm2149_vm11, %v1819_v61, %v1820_v18 }
 0x21e   : > { %8424 = vst [vmem:[#allocation102_spill] sm:$0xff] %v6324_v23  ;;  %vm1757_vm12 = vcmp.eq.f32.partialorder %v5844_v9, %v6324_v23  ;;  %vm1758_vm13 = vcmp.eq.f32.partialorder %v5846_v40, %v6324_v23  ;;  %v2152_v45 = vshra.s32 %v6332_v46, 16  ;;  %2139 = vmin.xlane.f32.xlu0 %v6336_v60 }
 0x21f   : > { %v1821_v48 = vsel %vm1757_vm12, %v6022_v52, 256  ;;  %v1822_v38 = vsel %vm1758_vm13, %v6025_v8, 256 }
 0x220   : > { %v6344_v63 = vcvt.s32.f32 %v2152_v45  ;;  %vm2165_vm14 = vcmp.lt.s32.totalorder %v1821_v48, %v1822_v38 }
 0x221   : > { %v6338_v37 = vpop.xlane.xlu0 %1234  ;;  %v6348_v9 = vsel %vm2165_vm14, %v1821_v48, %v1822_v38 }
 0x222   : > { %8425 = vst [vmem:[#allocation103_spill] sm:$0xff] %v6338_v37  ;;  %vm1759_vm15 = vcmp.eq.f32.partialorder %v5867_v50, %v6338_v37  ;;  %vm1760_vm0 = vcmp.eq.f32.partialorder %v5869_v0, %v6338_v37  ;;  %v2168_v61 = vshra.s32 %v6348_v9, 16  ;;  %2155 = vmin.xlane.f32.xlu0 %v6344_v63 }
 0x223   : > { %v1823_v18 = vsel %vm1759_vm15, %v6022_v52, 256  ;;  %v1824_v42 = vsel %vm1760_vm0, %v6025_v8, 256 }
 0x224   : > { %vm2181_vm1 = vcmp.lt.s32.totalorder %v1823_v18, %v1824_v42  ;;  %v6358_v45 = vcvt.s32.f32 %v2168_v61 }
 0x225   : > { %v6352_v40 = vpop.xlane.xlu0 %1237  ;;  %v6360_v23 = vsel %vm2181_vm1, %v1823_v18, %v1824_v42 }
 0x226   : > { %8426 = vst [vmem:[#allocation104_spill] sm:$0xff] %v6352_v40  ;;  %vm1761_vm2 = vcmp.eq.f32.partialorder %v5888_v57, %v6352_v40  ;;  %v2184_v50 = vshra.s32 %v6360_v23, 16  ;;  %vm1762_vm3 = vcmp.eq.f32.partialorder %v5890_v10, %v6352_v40  ;;  %2171 = vmin.xlane.f32.xlu0 %v6358_v45 }
 0x227   : > { %v1825_v38 = vsel %vm1761_vm2, %v6022_v52, 256  ;;  %v1826_v61 = vsel %vm1762_vm3, %v6025_v8, 256 }
 0x228   : > { %v6371_v48 = vcvt.s32.f32 %v2184_v50  ;;  %vm2197_vm6 = vcmp.lt.s32.totalorder %v1825_v38, %v1826_v61 }
 0x229   : > { %v6365_v0 = vpop.xlane.xlu0 %1240  ;;  %v6381_v10 = vsel %vm2197_vm6, %v1825_v38, %v1826_v61 }
 0x22a   : > { %8427 = vst [vmem:[#allocation105_spill] sm:$0xff] %v6365_v0  ;;  %vm1763_vm4 = vcmp.eq.f32.partialorder %v5906_v29, %v6365_v0  ;;  %vm1764_vm5 = vcmp.eq.f32.partialorder %v5908_v11, %v6365_v0  ;;  %2187 = vmin.xlane.f32.xlu0 %v6371_v48  ;;  %v2200_v50 = vshra.s32 %v6381_v10, 16 }
 0x22b   : > { %v1827_v57 = vsel %vm1763_vm4, %v6022_v52, 256  ;;  %v1828_v42 = vsel %vm1764_vm5, %v6025_v8, 256 }
 0x22c   : > { %vm2213_vm7 = vcmp.lt.s32.totalorder %v1827_v57, %v1828_v42  ;;  %v6392_v11 = vcvt.s32.f32 %v2200_v50 }
 0x22d   : > { %v6379_v18 = vpop.xlane.xlu0 %1243  ;;  %v6388_v29 = vsel %vm2213_vm7, %v1827_v57, %v1828_v42 }
 0x22e   : > { %8428 = vst [vmem:[#allocation106_spill] sm:$0xff] %v6379_v18  ;;  %vm1765_vm8 = vcmp.eq.f32.partialorder %v5924_v14, %v6379_v18  ;;  %vm1766_vm9 = vcmp.eq.f32.partialorder %v5926_v5, %v6379_v18  ;;  %v2216_v38 = vshra.s32 %v6388_v29, 16  ;;  %2203 = vmin.xlane.f32.xlu0 %v6392_v11 }
 0x22f   : > { %v1829_v61 = vsel %vm1765_vm8, %v6022_v52, 256  ;;  %v1830_v40 = vsel %vm1766_vm9, %v6025_v8, 256 }
 0x230   : > { %v6400_v37 = vcvt.s32.f32 %v2216_v38  ;;  %vm2229_vm10 = vcmp.lt.s32.totalorder %v1829_v61, %v1830_v40 }
 0x231   : > { %v6394_v0 = vpop.xlane.xlu0 %1246  ;;  %v6404_v14 = vsel %vm2229_vm10, %v1829_v61, %v1830_v40 }
 0x232   : > { %8429 = vst [vmem:[#allocation107_spill] sm:$0xff] %v6394_v0  ;;  %vm1767_vm11 = vcmp.eq.f32.partialorder %v5942_v43, %v6394_v0  ;;  %vm1768_vm12 = vcmp.eq.f32.partialorder %v5944_v35, %v6394_v0  ;;  %v2232_v57 = vshra.s32 %v6404_v14, 16  ;;  %2219 = vmin.xlane.f32.xlu0 %v6400_v37 }
 0x233   : > { %v1831_v42 = vsel %vm1767_vm11, %v6022_v52, 256  ;;  %v1832_v50 = vsel %vm1768_vm12, %v6025_v8, 256 }
 0x234   : > { %v6418_v43 = vcvt.s32.f32 %v2232_v57  ;;  %vm2245_vm15 = vcmp.lt.s32.totalorder %v1831_v42, %v1832_v50 }
 0x235   : > { %v6408_v5 = vpop.xlane.xlu0 %1249  ;;  %v6420_v35 = vsel %vm2245_vm15, %v1831_v42, %v1832_v50 }
 0x236   : > { %8430 = vst [vmem:[#allocation108_spill] sm:$0xff] %v6408_v5  ;;  %vm1769_vm13 = vcmp.eq.f32.partialorder %v5958_v2, %v6408_v5  ;;  %vm1770_vm14 = vcmp.eq.f32.partialorder %v5960_v20, %v6408_v5  ;;  %v2248_v61 = vshra.s32 %v6420_v35, 16  ;;  %2235 = vmin.xlane.f32.xlu0 %v6418_v43 }
 0x237   : > { %v1833_v40 = vsel %vm1769_vm13, %v6022_v52, 256  ;;  %v1834_v0 = vsel %vm1770_vm14, %v6025_v8, 256 }
 0x238   : > { %v6432_v2 = vcvt.s32.f32 %v2248_v61  ;;  %vm2261_vm2 = vcmp.lt.s32.totalorder %v1833_v40, %v1834_v0 }
 0x239   : > { %v6423_v38 = vpop.xlane.xlu0 %1252  ;;  %v6434_v20 = vsel %vm2261_vm2, %v1833_v40, %v1834_v0 }
 0x23a   : > { %8431 = vst [vmem:[#allocation109_spill] sm:$0xff] %v6423_v38  ;;  %vm1771_vm0 = vcmp.eq.f32.partialorder %v5971_v4, %v6423_v38  ;;  %vm1772_vm1 = vcmp.eq.f32.partialorder %v5973_v59, %v6423_v38  ;;  %v2264_v50 = vshra.s32 %v6434_v20, 16  ;;  %2251 = vmin.xlane.f32.xlu0 %v6432_v2 }
 0x23b   : > { %v1835_v57 = vsel %vm1771_vm0, %v6022_v52, 256  ;;  %v1836_v5 = vsel %vm1772_vm1, %v6025_v8, 256 }
 0x23c   : > { %v6446_v4 = vcvt.s32.f32 %v2264_v50  ;;  %vm2277_vm5 = vcmp.lt.s32.totalorder %v1835_v57, %v1836_v5 }
 0x23d   : > { %v6437_v42 = vpop.xlane.xlu0 %1255  ;;  %v6448_v59 = vsel %vm2277_vm5, %v1835_v57, %v1836_v5  ;;  %v8438_v57 = vld [vmem:[#allocation13_spill] sm:$0xff] }
 0x23e   : > { %8432 = vst [vmem:[#allocation110_spill] sm:$0xff] %v6437_v42  ;;  %vm1773_vm3 = vcmp.eq.f32.partialorder %v5982_v30, %v6437_v42  ;;  %vm1774_vm4 = vcmp.eq.f32.partialorder %v5984_v47, %v6437_v42  ;;  %8433 = vst [vmem:[#allocation111_spill] sm:$0xff] %v6446_v4  ;;  %v2280_v61 = vshra.s32 %v6448_v59, 16  ;;  %v4917_v30 = vmov 0.0|0.0   ;;  %2267 = vmin.xlane.f32.xlu0 %v6446_v4  ;;  %v8436_v47 = vld [vmem:[#allocation60_spill] sm:$0xff] }
 0x23f   : > { %8434 = vst [vmem:[#allocation112_spill] sm:$0xff] %v6448_v59  ;;  %v1837_v0 = vsel %vm1773_vm3, %v6022_v52, 256  ;;  %v1838_v38 = vsel %vm1774_vm4, %v6025_v8, 256  ;;  %4108 = vmatprep.subr.bf16.mxu1 %v4917_v30  ;;  %v8441_v59 = vld [vmem:[#allocation61_spill] sm:$0xff] }
 0x240   : > { %v6461_v5 = vcvt.s32.f32 %v2280_v61  ;;  %vm2293_vm8 = vcmp.lt.s32.totalorder %v1837_v0, %v1838_v38  ;;  %4110 = vmatpush1.bf16.msra.mxu1 %v8438_v57  ;;  %v8442_v61 = vld [vmem:[#allocation62_spill] sm:$0xff] }
 0x241   : > { %v6451_v40 = vpop.xlane.xlu0 %1258  ;;  %v6464_v50 = vsel %vm2293_vm8, %v1837_v0, %v1838_v38  ;;  %4111 = vmatprep.subr.bf16.mxu1 %v4917_v30  ;;  %v8444_v0 = vld [vmem:[#allocation15_spill] sm:$0xff] }
 0x242   : > { %8435 = vst [vmem:[#allocation113_spill] sm:$0xff] %v6451_v40  ;;  %vm1775_vm6 = vcmp.eq.f32.partialorder %v5992_v3, %v6451_v40  ;;  %vm1776_vm7 = vcmp.eq.f32.partialorder %v8436_v47, %v6451_v40  ;;  %8437 = vst [vmem:[#allocation60_spill] sm:$0xff] %v6461_v5  ;;  %v2296_v18 = vshra.s32 %v6464_v50, 16  ;;  %2283 = vmin.xlane.f32.xlu0 %v6461_v5 }
 0x243   : > { %8439 = vst [vmem:[#allocation13_spill] sm:$0xff] %v6464_v50  ;;  %v1839_v42 = vsel %vm1775_vm6, %v6022_v52, 256  ;;  %v1840_v4 = vsel %vm1776_vm7, %v6025_v8, 256  ;;  %v8446_v50 = vld [vmem:[#allocation63_spill] sm:$0xff] }
 0x244   : > { %v6477_v38 = vcvt.s32.f32 %v2296_v18  ;;  %vm2309_vm11 = vcmp.lt.s32.totalorder %v1839_v42, %v1840_v4  ;;  %4113 = vmatpush1.bf16.msra.mxu1 %v8444_v0  ;;  %v8447_v18 = vld [vmem:[#allocation64_spill] sm:$0xff] }
 0x245   : > { %v6468_v3 = vpop.xlane.xlu0 %1261  ;;  %v6480_v47 = vsel %vm2309_vm11, %v1839_v42, %v1840_v4  ;;  %4114 = vmatprep.subr.bf16.mxu1 %v4917_v30  ;;  %v8448_v4 = vld [vmem:[#allocation17_spill] sm:$0xff] }
 0x246   : > { %8440 = vst [vmem:[#allocation114_spill] sm:$0xff] %v6468_v3  ;;  %vm1777_vm9 = vcmp.eq.f32.partialorder %v8441_v59, %v6468_v3  ;;  %vm1778_vm10 = vcmp.eq.f32.partialorder %v8442_v61, %v6468_v3  ;;  %8443 = vst [vmem:[#allocation61_spill] sm:$0xff] %v6477_v38  ;;  %v2312_v59 = vshra.s32 %v6480_v47, 16  ;;  %2299 = vmin.xlane.f32.xlu0 %v6477_v38 }
 0x247   : > { %v1841_v57 = vsel %vm1777_vm9, %v6022_v52, 256  ;;  %v1842_v5 = vsel %vm1778_vm10, %v6025_v8, 256 }
 0x248   : > { %v6493_v42 = vcvt.s32.f32 %v2312_v59  ;;  %vm2325_vm14 = vcmp.lt.s32.totalorder %v1841_v57, %v1842_v5  ;;  %4116 = vmatpush1.bf16.msra.mxu1 %v8448_v4  ;;  %v8453_v4 = vld [vmem:[#allocation21_spill] sm:$0xff] }
 0x249   : > { %v6484_v40 = vpop.xlane.xlu0 %1264  ;;  %v6496_v61 = vsel %vm2325_vm14, %v1841_v57, %v1842_v5  ;;  %4117 = vmatprep.subr.bf16.mxu1 %v4917_v30 }
 0x24a   : > { %8445 = vst [vmem:[#allocation62_spill] sm:$0xff] %v6484_v40  ;;  %vm1779_vm12 = vcmp.eq.f32.partialorder %v8446_v50, %v6484_v40  ;;  %vm1780_vm13 = vcmp.eq.f32.partialorder %v8447_v18, %v6484_v40  ;;  %v2328_v3 = vshra.s32 %v6496_v61, 16  ;;  %2315 = vmin.xlane.f32.xlu0 %v6493_v42  ;;  %v8451_v18 = vld [vmem:[#allocation19_spill] sm:$0xff] }
 0x24b   : > { %v1843_v0 = vsel %vm1779_vm12, %v6022_v52, 256  ;;  %v1844_v50 = vsel %vm1780_vm13, %v6025_v8, 256  ;;  %v8457_v40 = vld [vmem:[#allocation27_spill] sm:$0xff]  ;;  %v8459_v52 = vld [vmem:[#allocation12_spill] sm:$0xff]  ;;  %v8460_v8 = vld [vmem:[#allocation74_spill] sm:$0xff] }
 0x24c   : > { %vm2341_vm15 = vcmp.lt.s32.totalorder %v1843_v0, %v1844_v50  ;;  %v6503_v38 = vcvt.s32.f32 %v2328_v3  ;;  %4119 = vmatpush1.bf16.msra.mxu1 %v8451_v18  ;;  %v8454_v3 = vld [vmem:[#allocation23_spill] sm:$0xff] }
 0x24d   : > { %v6505_v59 = vsel %vm2341_vm15, %v1843_v0, %v1844_v50  ;;  %4120 = vmatprep.subr.bf16.mxu1 %v4917_v30  ;;  %v8455_v0 = vld [vmem:[#allocation25_spill] sm:$0xff]  ;;  %v8456_v50 = vld [vmem:[#allocation71_spill] sm:$0xff] }
 0x24e   : > { %8449 = vst [vmem:[#allocation15_spill] sm:$0xff] %v6503_v38  ;;  %8450 = vst [vmem:[#allocation63_spill] sm:$0xff] %v6505_v59  ;;  %v2344_v5 = vshra.s32 %v6505_v59, 16  ;;  %2331 = vmin.xlane.f32.xlu0 %v6503_v38  ;;  %v1847_v18 = vand.u32 65535, %v8456_v50  ;;  %v8462_v38 = vld [vmem:[#allocation14_spill] sm:$0xff] }
 0x250   : > { %v6511_v57 = vcvt.s32.f32 %v2344_v5  ;;  %4122 = vmatpush1.bf16.msra.mxu1 %v8453_v4  ;;  %v1849_v4 = vcvt.s32.f32 %v1847_v18 }
 0x251   : > { %4123 = vmatprep.subr.bf16.mxu1 %v4917_v30 }
 0x252   : > { %8452 = vst [vmem:[#allocation64_spill] sm:$0xff] %v6511_v57  ;;  %2347 = vmin.xlane.f32.xlu0 %v6511_v57 }
 0x254   : > { %4125 = vmatpush1.bf16.msra.mxu1 %v8454_v3 }
 0x255   : > { %4126 = vmatprep.subr.bf16.mxu1 %v4917_v30 }
 0x258   : > { %4128 = vmatpush1.bf16.msra.mxu1 %v8455_v0  ;;  %v8461_v0 = vld [vmem:[#allocation76_spill] sm:$0xff] }
 0x259   : > { %4129 = vmatprep.subr.bf16.mxu1 %v4917_v30  ;;  %v1863_v57 = vand.u32 65535, %v8461_v0 }
 0x25b   : > { %v1865_v50 = vcvt.s32.f32 %v1863_v57  ;;  %v8466_v57 = vld [vmem:[#allocation18_spill] sm:$0xff] }
 0x25c   : > { %4131 = vmatpush1.bf16.msra.mxu1 %v8457_v40 }
 0x25d   : > { %4132 = vmatprep.subr.bf16.mxu1 %v4917_v30 }
 0x260   : > { %4134 = vmatpush1.bf16.msra.mxu1 %v8459_v52  ;;  %v1879_v52 = vand.u32 65535, %v6093_v55 }
 0x261   : > { %4135 = vmatprep.subr.bf16.mxu1 %v4917_v30 }
 0x263   : > { %v6523_v5 = vpop.xlane.xlu1 %1851 }
 0x264   : > { %8458 = vst [vmem:[#allocation17_spill] sm:$0xff] %v6523_v5  ;;  %vm1853_vm0 = vcmp.eq.f32.partialorder %v8460_v8, %v6523_v5  ;;  %4137 = vmatpush1.bf16.msra.mxu1 %v8462_v38  ;;  %v8463_v8 = vld [vmem:[#allocation16_spill] sm:$0xff]  ;;  %v8465_v5 = vld [vmem:[#allocation83_spill] sm:$0xff] }
 0x265   : > { %v1854_v3 = vsel %vm1853_vm0, %v1849_v4, inf  ;;  %4138 = vmatprep.subr.bf16.mxu1 %v4917_v30  ;;  %v8464_v38 = vld [vmem:[#allocation84_spill] sm:$0xff] }
 0x266   : > { %1855 = vmin.xlane.f32.xlu1 %v1854_v3  ;;  %v1881_v3 = vcvt.s32.f32 %v1879_v52  ;;  %v1895_v0 = vand.u32 65535, %v8464_v38  ;;  %v8467_v52 = vld [vmem:[#allocation20_spill] sm:$0xff] }
 0x267   : > { %v6532_v40 = vpop.xlane.xlu1 %1867 }
 0x268   : > { %vm1869_vm1 = vcmp.eq.f32.partialorder %v6080_v27, %v6532_v40  ;;  %4140 = vmatpush1.bf16.msra.mxu1 %v8463_v8  ;;  %v1897_v27 = vcvt.s32.f32 %v1895_v0  ;;  %v1943_v0 = vand.u32 65535, %v6154_v28 }
 0x269   : > { %v1870_v18 = vsel %vm1869_vm1, %v1865_v50, inf  ;;  %4141 = vmatprep.subr.bf16.mxu1 %v4917_v30  ;;  %v1911_v50 = vand.u32 65535, %v6126_v32 }
 0x26a   : > { %1871 = vmin.xlane.f32.xlu1 %v1870_v18 }
 0x26b   : > { %v6539_v4 = vpop.xlane.xlu1 %1883  ;;  %v1913_v8 = vcvt.s32.f32 %v1911_v50  ;;  %v1959_v50 = vand.u32 65535, %v6164_v13 }
 0x26c   : > { %vm1885_vm2 = vcmp.eq.f32.partialorder %v8465_v5, %v6539_v4  ;;  %4143 = vmatpush1.bf16.msra.mxu1 %v8466_v57  ;;  %v8469_v57 = vld [vmem:[#allocation24_spill] sm:$0xff] }
 0x26d   : > { %v1886_v59 = vsel %vm1885_vm2, %v1881_v3, inf  ;;  %4144 = vmatprep.subr.bf16.mxu1 %v4917_v30  ;;  %v1927_v3 = vand.u32 65535, %v6136_v51 }
 0x26e   : > { %1887 = vmin.xlane.f32.xlu1 %v1886_v59  ;;  %v8468_v59 = vld [vmem:[#allocation22_spill] sm:$0xff] }
 0x26f   : > { %v6546_v55 = vpop.xlane.xlu1 %1899  ;;  %v1929_v38 = vcvt.s32.f32 %v1927_v3  ;;  %v1991_v3 = vand.u32 65535, %v6192_v62  ;;  %v2023_v62 = vand.u32 65535, %v6220_v1 }
 0x270   : > { %vm1901_vm3 = vcmp.eq.f32.partialorder %v6120_v44, %v6546_v55  ;;  %4146 = vmatpush1.bf16.msra.mxu1 %v8467_v52  ;;  %v8470_v52 = vld [vmem:[#allocation26_spill] sm:$0xff] }
 0x271   : > { %v1902_v18 = vsel %vm1901_vm3, %v1897_v27, inf  ;;  %4147 = vmatprep.subr.bf16.mxu1 %v4917_v30  ;;  %v1945_v27 = vcvt.s32.f32 %v1943_v0 }
 0x272   : > { %1903 = vmin.xlane.f32.xlu1 %v1902_v18 }
 0x273   : > { %v6553_v5 = vpop.xlane.xlu1 %1915 }
 0x274   : > { %vm1917_vm4 = vcmp.eq.f32.partialorder %v6134_v7, %v6553_v5  ;;  %4149 = vmatpush1.bf16.msra.mxu1 %v8468_v59 }
 0x275   : > { %v1918_v32 = vsel %vm1917_vm4, %v1913_v8, inf  ;;  %4150 = vmatprep.subr.bf16.mxu1 %v4917_v30  ;;  %v1961_v8 = vcvt.s32.f32 %v1959_v50  ;;  %v2025_v50 = vcvt.s32.f32 %v2023_v62 }
 0x276   : > { %1919 = vmin.xlane.f32.xlu1 %v1918_v32 }
 0x277   : > { %v6560_v44 = vpop.xlane.xlu1 %1931 }
 0x278   : > { %vm1933_vm5 = vcmp.eq.f32.partialorder %v6148_v31, %v6560_v44  ;;  %4152 = vmatpush1.bf16.msra.mxu1 %v8469_v57  ;;  %v1975_v31 = vand.u32 65535, %v6182_v12  ;;  %v1993_v12 = vcvt.s32.f32 %v1991_v3 }
 0x279   : > { %v1934_v51 = vsel %vm1933_vm5, %v1929_v38, inf  ;;  %4153 = vmatprep.subr.bf16.mxu1 %v4917_v30 }
 0x27a   : > { %1935 = vmin.xlane.f32.xlu1 %v1934_v51  ;;  %v1977_v59 = vcvt.s32.f32 %v1975_v31 }
 0x27b   : > { %v6567_v7 = vpop.xlane.xlu1 %1947 }
 0x27c   : > { %vm1949_vm6 = vcmp.eq.f32.partialorder %v6162_v41, %v6567_v7  ;;  %4155 = vmatpush1.bf16.msra.mxu1 %v8470_v52 }
 0x27d   : > { %v1950_v28 = vsel %vm1949_vm6, %v1945_v27, inf }
 0x27e   : > { %1951 = vmin.xlane.f32.xlu1 %v1950_v28 }
 0x27f   : > { %v6574_v18 = vpop.xlane.xlu1 %1963 }
 0x280   : > { %vm1965_vm7 = vcmp.eq.f32.partialorder %v6176_v34, %v6574_v18  ;;  %v2007_v34 = vand.u32 65535, %v6214_v15 }
 0x281   : > { %v1966_v30 = vsel %vm1965_vm7, %v1961_v8, inf }
 0x282   : > { %1967 = vmin.xlane.f32.xlu1 %v1966_v30  ;;  %v2009_v57 = vcvt.s32.f32 %v2007_v34 }
 0x283   : > { %v6579_v13 = vpop.xlane.xlu1 %1979 }
 0x284   : > { %vm1981_vm8 = vcmp.eq.f32.partialorder %v6190_v56, %v6579_v13  ;;  %v2039_v56 = vand.u32 65535, %v6236_v58 }
 0x285   : > { %v1982_v41 = vsel %vm1981_vm8, %v1977_v59, inf }
 0x286   : > { %1983 = vmin.xlane.f32.xlu1 %v1982_v41  ;;  %v2041_v52 = vcvt.s32.f32 %v2039_v56  ;;  %v2167_v56 = vand.u32 65535, %v6348_v9  ;;  %v8472_v9 = vld [vmem:[#allocation68_spill] sm:$0xff] }
 0x287   : > { %v6583_v32 = vpop.xlane.xlu1 %1995 }
 0x288   : > { %vm1997_vm9 = vcmp.eq.f32.partialorder %v6203_v49, %v6583_v32  ;;  %v2055_v49 = vand.u32 65535, %v6248_v21  ;;  %v2087_v21 = vand.u32 65535, %v6276_v22 }
 0x289   : > { %v1998_v38 = vsel %vm1997_vm9, %v1993_v12, inf }
 0x28a   : > { %1999 = vmin.xlane.f32.xlu1 %v1998_v38  ;;  %v2057_v28 = vcvt.s32.f32 %v2055_v49  ;;  %v2089_v41 = vcvt.s32.f32 %v2087_v21  ;;  %v2169_v49 = vcvt.s32.f32 %v2167_v56  ;;  %v8475_v21 = vld [vmem:[#allocation72_spill] sm:$0xff]  ;;  %v8481_v56 = vld [vmem:[#allocation79_spill] sm:$0xff] }
 0x28b   : > { %v6589_v0 = vpop.xlane.xlu1 %2011 }
 0x28c   : > { %vm2013_vm10 = vcmp.eq.f32.partialorder %v6224_v17, %v6589_v0 }
 0x28d   : > { %v2014_v51 = vsel %vm2013_vm10, %v2009_v57, inf }
 0x28e   : > { %2015 = vmin.xlane.f32.xlu1 %v2014_v51 }
 0x28f   : > { %v6594_v27 = vpop.xlane.xlu1 %2027 }
 0x290   : > { %vm2029_vm11 = vcmp.eq.f32.partialorder %v6232_v19, %v6594_v27  ;;  %v2071_v19 = vand.u32 65535, %v6270_v39  ;;  %v2119_v39 = vand.u32 65535, %v6304_v25  ;;  %v2151_v25 = vand.u32 65535, %v6332_v46 }
 0x291   : > { %v2030_v15 = vsel %vm2029_vm11, %v2025_v50, inf }
 0x292   : > { %2031 = vmin.xlane.f32.xlu1 %v2030_v15  ;;  %v2073_v30 = vcvt.s32.f32 %v2071_v19  ;;  %v2121_v34 = vcvt.s32.f32 %v2119_v39  ;;  %v2153_v50 = vcvt.s32.f32 %v2151_v25  ;;  %v8471_v15 = vld [vmem:[#allocation67_spill] sm:$0xff]  ;;  %v8473_v19 = vld [vmem:[#allocation69_spill] sm:$0xff] }
 0x293   : > { %v6599_v1 = vpop.xlane.xlu0 %2043 }
 0x294   : > { %vm2045_vm12 = vcmp.eq.f32.partialorder %v6246_v6, %v6599_v1  ;;  %v2103_v6 = vand.u32 65535, %v6292_v36 }
 0x295   : > { %v2046_v17 = vsel %vm2045_vm12, %v2041_v52, inf  ;;  %v1266_v52 = vsub.f32 %v8472_v9, %v8471_v15  ;;  %v8485_v9 = vld [vmem:[#allocation82_spill] sm:$0xff] }
 0x296   : > { %2047 = vmin.xlane.f32.xlu1 %v2046_v17  ;;  %v2105_v12 = vcvt.s32.f32 %v2103_v6  ;;  %v2199_v17 = vand.u32 65535, %v6381_v10  ;;  %v8476_v6 = vld [vmem:[#allocation73_spill] sm:$0xff]  ;;  %v2215_v10 = vand.u32 65535, %v6388_v29 }
 0x297   : > { %v6603_v58 = vpop.xlane.xlu1 %2059  ;;  %v8483_v29 = vld [vmem:[#allocation81_spill] sm:$0xff] }
 0x298   : > { %vm2061_vm13 = vcmp.eq.f32.partialorder %v6259_v54, %v6603_v58  ;;  %v2201_v39 = vcvt.s32.f32 %v2199_v17 }
 0x299   : > { %v2062_v31 = vsel %vm2061_vm13, %v2057_v28, inf }
 0x29a   : > { %2063 = vmin.xlane.f32.xlu1 %v2062_v31  ;;  %v1267_v31 = vsub.f32 %v8473_v19, %v8471_v15  ;;  %v8487_v19 = vld [vmem:[#allocation86_spill] sm:$0xff] }
 0x29b   : > { %v6609_v8 = vpop.xlane.xlu0 %2075 }
 0x29c   : > { %vm2077_vm14 = vcmp.eq.f32.partialorder %v6280_v53, %v6609_v8 }
 0x29d   : > { %v2078_v3 = vsel %vm2077_vm14, %v2073_v30, inf }
 0x29e   : > { %2079 = vmin.xlane.f32.xlu0 %v2078_v3 }
 0x29f   : > { %v6614_v59 = vpop.xlane.xlu1 %2091 }
 0x2a0   : > { %vm2093_vm15 = vcmp.eq.f32.partialorder %v6288_v26, %v6614_v59  ;;  %v2135_v26 = vand.u32 65535, %v6326_v24  ;;  %v2183_v24 = vand.u32 65535, %v6360_v23  ;;  %v8474_v23 = vld [vmem:[#allocation70_spill] sm:$0xff] }
 0x2a1   : > { %v2094_v54 = vsel %vm2093_vm15, %v2089_v41, inf  ;;  %v1268_v30 = vsub.f32 %v8475_v21, %v8474_v23  ;;  %v1269_v3 = vsub.f32 %v8476_v6, %v8474_v23  ;;  %v1330_v41 = vmul.f32 1.442695, %v1266_v52  ;;  %v8486_v52 = vld [vmem:[#allocation85_spill] sm:$0xff]  ;;  %v4675_v21 = vld [vmem:[%s5425_s14 + $0x50] sm:$0xff] }
 0x2a2   : > { %2095 = vmin.xlane.f32.xlu1 %v2094_v54  ;;  %v2137_v57 = vcvt.s32.f32 %v2135_v26  ;;  %v8480_v26 = vld [vmem:[#allocation78_spill] sm:$0xff]  ;;  %v1274_v17 = vsub.f32 %v8486_v52, %v8485_v9 }
 0x2a3   : > { %v6619_v22 = vpop.xlane.xlu0 %2107  ;;  %4345 = vpow2.f32 %v1330_v41 }
 0x2a4   : > { %vm2109_vm0 = vcmp.eq.f32.partialorder %v6302_v33, %v6619_v22 }
 0x2a5   : > { %v2110_v53 = vsel %vm2109_vm0, %v2105_v12, inf  ;;  %v1332_v12 = vmul.f32 1.442695, %v1267_v31  ;;  %v1275_v31 = vsub.f32 %v8487_v19, %v8485_v9  ;;  %vm2357_vm0 = vcmask 7168  }
 0x2a6   : > { %2111 = vmin.xlane.f32.xlu0 %v2110_v53  ;;  %v8478_v53 = vld [vmem:[#allocation75_spill] sm:$0xff] }
 0x2a7   : > { %v6623_v36 = vpop.xlane.xlu1 %2123  ;;  %v1271_v25 = vsub.f32 %v8480_v26, %v8478_v53  ;;  %4347 = vpow2.f32 %v1332_v12  ;;  %v1346_v12 = vmul.f32 1.442695, %v1274_v17  ;;  %v4678_v26 = vld [vmem:[%s5425_s14 + $0x68] sm:$0xff]  ;;  %v4681_v17 = vld [vmem:[%s5425_s14 + $0x80] sm:$0xff] }
 0x2a8   : > { %vm2125_vm1 = vcmp.eq.f32.partialorder %v6315_v16, %v6623_v36 }
 0x2a9   : > { %v2126_v38 = vsel %vm2125_vm1, %v2121_v34, inf  ;;  %v8479_v34 = vld [vmem:[#allocation77_spill] sm:$0xff] }
 0x2aa   : > { %2127 = vmin.xlane.f32.xlu1 %v2126_v38  ;;  %v1270_v38 = vsub.f32 %v8479_v34, %v8478_v53  ;;  %v4677_v53 = vld [vmem:[%s5425_s14 + $0x60] sm:$0xff] }
 0x2ab   : > { %v6629_v62 = vpop.xlane.xlu0 %2139  ;;  %v8490_v34 = vld [vmem:[#allocation88_spill] sm:$0xff] }
 0x2ac   : > { %vm2141_vm2 = vcmp.eq.f32.partialorder %v6336_v60, %v6629_v62  ;;  %v1338_v15 = vmul.f32 1.442695, %v1270_v38  ;;  %v1278_v38 = vsub.f32 %v4677_v53, %v8490_v34 }
 0x2ad   : > { %v2142_v33 = vsel %vm2141_vm2, %v2137_v57, inf  ;;  %v6700_v9 = vpop.eup %4345 }
 0x2ae   : > { %2143 = vmin.xlane.f32.xlu0 %v2142_v33  ;;  %v1336_v33 = vmul.f32 1.442695, %v1269_v3  ;;  %v4676_v3 = vld [vmem:[%s5425_s14 + $0x58] sm:$0xff]  ;;  %8493 = vst [vmem:[#allocation71_spill] sm:$0xff] %v6700_v9 }
 0x2af   : > { %v6634_v51 = vpop.xlane.xlu0 %2155 }
 0x2b0   : > { %vm2157_vm3 = vcmp.eq.f32.partialorder %v6344_v63, %v6634_v51  ;;  %v2185_v63 = vcvt.s32.f32 %v2183_v24  ;;  %v1273_v24 = vsub.f32 %v8483_v29, %v8481_v56 }
 0x2b1   : > { %v2158_v16 = vsel %vm2157_vm3, %v2153_v50, inf  ;;  %v8482_v50 = vld [vmem:[#allocation80_spill] sm:$0xff] }
 0x2b2   : > { %2159 = vmin.xlane.f32.xlu1 %v2158_v16  ;;  %v1272_v16 = vsub.f32 %v8482_v50, %v8481_v56  ;;  %v1344_v6 = vmul.f32 1.442695, %v1273_v24  ;;  %v8491_v56 = vld [vmem:[#allocation89_spill] sm:$0xff] }
 0x2b3   : > { %v6639_v46 = vpop.xlane.xlu0 %2171 }
 0x2b4   : > { %vm2173_vm4 = vcmp.eq.f32.partialorder %v6358_v45, %v6639_v46 }
 0x2b5   : > { %v2174_v60 = vsel %vm2173_vm4, %v2169_v49, inf  ;;  %v2231_v49 = vand.u32 65535, %v6404_v14  ;;  %v1342_v14 = vmul.f32 1.442695, %v1272_v16 }
 0x2b6   : > { %2175 = vmin.xlane.f32.xlu0 %v2174_v60 }
 0x2b7   : > { %v6646_v28 = vpop.xlane.xlu0 %2187 }
 0x2b8   : > { %vm2189_vm5 = vcmp.eq.f32.partialorder %v6371_v48, %v6646_v28  ;;  %v1334_v48 = vmul.f32 1.442695, %v1268_v30  ;;  %v8488_v30 = vld [vmem:[#allocation87_spill] sm:$0xff] }
 0x2b9   : > { %v2190_v45 = vsel %vm2189_vm5, %v2185_v63, inf  ;;  %v1340_v63 = vmul.f32 1.442695, %v1271_v25  ;;  %v1277_v41 = vsub.f32 %v4676_v3, %v8488_v30  ;;  %v1279_v25 = vsub.f32 %v4678_v26, %v8490_v34  ;;  %v4684_v34 = vld [vmem:[%s5425_s14 + $0x98] sm:$0xff] }
 0x2ba   : > { %2191 = vmin.xlane.f32.xlu1 %v2190_v45  ;;  %4349 = vpow2.f32 %v1334_v48  ;;  %v1276_v45 = vsub.f32 %v4675_v21, %v8488_v30  ;;  %v1348_v48 = vmul.f32 1.442695, %v1275_v31 }
 0x2bb   : > { %v6657_v54 = vpop.xlane.xlu0 %2203  ;;  %4351 = vpow2.f32 %v1336_v33  ;;  %v4679_v33 = vld [vmem:[%s5425_s14 + $0x70] sm:$0xff]  ;;  %v1352_v16 = vmul.f32 1.442695, %v1277_v41  ;;  %v1356_v52 = vmul.f32 1.442695, %v1279_v25  ;;  %v4685_v25 = vld [vmem:[%s5425_s14 + $0xa0] sm:$0xff] }
 0x2bc   : > { %8477 = vst [vmem:[#allocation19_spill] sm:$0xff] %v6657_v54  ;;  %vm2205_vm6 = vcmp.eq.f32.partialorder %v6392_v11, %v6657_v54  ;;  %v2217_v11 = vcvt.s32.f32 %v2215_v10  ;;  %4353 = vpow2.f32 %v1338_v15  ;;  %v1280_v50 = vsub.f32 %v4679_v33, %v8491_v56  ;;  %v8541_v54 = vld [vmem:[#allocation102_spill] sm:$0xff] }
 0x2bd   : > { %v2206_v57 = vsel %vm2205_vm6, %v2201_v39, inf  ;;  %v2233_v39 = vcvt.s32.f32 %v2231_v49  ;;  %4355 = vpow2.f32 %v1340_v63  ;;  %v1354_v49 = vmul.f32 1.442695, %v1278_v38  ;;  %v8494_v63 = vld [vmem:[#allocation90_spill] sm:$0xff] }
 0x2be   : > { %2207 = vmin.xlane.f32.xlu0 %v2206_v57  ;;  %4357 = vpow2.f32 %v1342_v14  ;;  %v1282_v19 = vsub.f32 %v4681_v17, %v8494_v63  ;;  %v4682_v14 = vld [vmem:[%s5425_s14 + $0x88] sm:$0xff] }
 0x2bf   : > { %v6670_v60 = vpop.xlane.xlu0 %2219  ;;  %4359 = vpow2.f32 %v1344_v6  ;;  %v1283_v21 = vsub.f32 %v4682_v14, %v8494_v63 }
 0x2c0   : > { %8484 = vst [vmem:[#allocation21_spill] sm:$0xff] %v6670_v60  ;;  %vm2221_vm7 = vcmp.eq.f32.partialorder %v6400_v37, %v6670_v60  ;;  %v2247_v37 = vand.u32 65535, %v6420_v35  ;;  %v1350_v35 = vmul.f32 1.442695, %v1276_v45  ;;  %4361 = vpow2.f32 %v1346_v12  ;;  %v8496_v45 = vld [vmem:[#allocation91_spill] sm:$0xff] }
 0x2c1   : > { %v2222_v23 = vsel %vm2221_vm7, %v2217_v11, inf  ;;  %v4680_v11 = vld [vmem:[%s5425_s14 + $0x78] sm:$0xff]  ;;  %4363 = vpow2.f32 %v1348_v48  ;;  %v1285_v38 = vsub.f32 %v4684_v34, %v8496_v45  ;;  %v1362_v26 = vmul.f32 1.442695, %v1282_v19  ;;  %v8506_v19 = vld [vmem:[#allocation13_spill] sm:$0xff]  ;;  %v8510_v34 = vld [vmem:[#allocation94_spill] sm:$0xff] }
 0x2c2   : > { %2223 = vmin.xlane.f32.xlu1 %v2222_v23  ;;  %v2249_v24 = vcvt.s32.f32 %v2247_v37  ;;  %v1281_v15 = vsub.f32 %v4680_v11, %v8491_v56  ;;  %v6704_v23 = vpop.eup %4347  ;;  %4365 = vpow2.f32 %v1350_v35  ;;  %v8498_v37 = vld [vmem:[#allocation112_spill] sm:$0xff]  ;;  %v8500_v48 = vld [vmem:[#allocation111_spill] sm:$0xff]  ;;  %v4687_v11 = vld [vmem:[%s5425_s14 + $0xb0] sm:$0xff] }
 0x2c3   : > { %v6683_v10 = vpop.xlane.xlu0 %2235  ;;  %8495 = vst [vmem:[#allocation27_spill] sm:$0xff] %v6704_v23  ;;  %4367 = vpow2.f32 %v1352_v16  ;;  %v4686_v16 = vld [vmem:[%s5425_s14 + $0xa8] sm:$0xff] }
 0x2c4   : > { %8489 = vst [vmem:[#allocation23_spill] sm:$0xff] %v6683_v10  ;;  %vm2237_vm8 = vcmp.eq.f32.partialorder %v6418_v43, %v6683_v10  ;;  %v2263_v43 = vand.u32 65535, %v6434_v20  ;;  %v1358_v20 = vmul.f32 1.442695, %v1280_v50  ;;  %v6708_v30 = vpop.eup %4349  ;;  %4369 = vpow2.f32 %v1354_v49  ;;  %v8533_v10 = vld [vmem:[#allocation100_spill] sm:$0xff] }
 0x2c5   : > { %v2238_v57 = vsel %vm2237_vm8, %v2233_v39, inf  ;;  %v2279_v39 = vand.u32 65535, %v8498_v37  ;;  %v6715_v12 = vpop.eup %4351  ;;  %v1360_v53 = vmul.f32 1.442695, %v1281_v15  ;;  %4371 = vpow2.f32 %v1356_v52  ;;  %v8504_v15 = vld [vmem:[#allocation93_spill] sm:$0xff]  ;;  %v4689_v37 = vld [vmem:[%s5425_s14 + $0xc0] sm:$0xff] }
 0x2c6   : > { %2239 = vmin.xlane.f32.xlu0 %v2238_v57  ;;  %v2265_v41 = vcvt.s32.f32 %v2263_v43  ;;  %8499 = vst [vmem:[#allocation74_spill] sm:$0xff] %v6715_v12  ;;  %v8501_v57 = vld [vmem:[#allocation92_spill] sm:$0xff]  ;;  %v6723_v56 = vpop.eup %4353  ;;  %4373 = vpow2.f32 %v1358_v20  ;;  %v1364_v50 = vmul.f32 1.442695, %v1283_v21  ;;  %v1288_v52 = vsub.f32 %v4687_v11, %v8504_v15  ;;  %v4688_v21 = vld [vmem:[%s5425_s14 + $0xb8] sm:$0xff] }
 0x2c7   : > { %v6693_v29 = vpop.xlane.xlu0 %2251  ;;  %v1286_v35 = vsub.f32 %v4685_v25, %v8501_v57  ;;  %8502 = vst [vmem:[#allocation76_spill] sm:$0xff] %v6723_v56  ;;  %v6727_v43 = vpop.eup %4355  ;;  %v2281_v63 = vcvt.s32.f32 %v2279_v39  ;;  %4375 = vpow2.f32 %v1360_v53  ;;  %v1368_v20 = vmul.f32 1.442695, %v1285_v38  ;;  %v4690_v38 = vld [vmem:[%s5425_s14 + $0xc8] sm:$0xff] }
 0x2c8   : > { %8492 = vst [vmem:[#allocation25_spill] sm:$0xff] %v6693_v29  ;;  %vm2253_vm9 = vcmp.eq.f32.partialorder %v6432_v2, %v6693_v29  ;;  %v4683_v2 = vld [vmem:[%s5425_s14 + $0x90] sm:$0xff]  ;;  %8503 = vst [vmem:[#allocation14_spill] sm:$0xff] %v6727_v43  ;;  %v6734_v14 = vpop.eup %4357  ;;  %4377 = vpow2.f32 %v1362_v26  ;;  %v1290_v39 = vsub.f32 %v4689_v37, %v8510_v34  ;;  %v2311_v11 = vand.u32 65535, %v6480_v47 }
 0x2c9   : > { %v2254_v31 = vsel %vm2253_vm9, %v2249_v24, inf  ;;  %v1284_v6 = vsub.f32 %v4683_v2, %v8496_v45  ;;  %v1287_v24 = vsub.f32 %v4686_v16, %v8501_v57  ;;  %8507 = vst [vmem:[#allocation84_spill] sm:$0xff] %v6734_v14  ;;  %v1289_v2 = vsub.f32 %v4688_v21, %v8504_v15  ;;  %v8508_v45 = vld [vmem:[#allocation60_spill] sm:$0xff]  ;;  %v8516_v21 = vld [vmem:[#allocation61_spill] sm:$0xff] }
 0x2ca   : > { %2255 = vmin.xlane.f32.xlu1 %v2254_v31  ;;  %v2295_v31 = vand.u32 65535, %v8506_v19  ;;  %4379 = vpow2.f32 %v1364_v50  ;;  %v1291_v57 = vsub.f32 %v4690_v38, %v8510_v34  ;;  %v1374_v16 = vmul.f32 1.442695, %v1288_v52  ;;  %v4692_v52 = vld [vmem:[%s5425_s14 + $0xd8] sm:$0xff]  ;;  %v8519_v34 = vld [vmem:[#allocation96_spill] sm:$0xff] }
 0x2cb   : > { %v6712_v3 = vpop.xlane.xlu0 %2267  ;;  %v1366_v49 = vmul.f32 1.442695, %v1284_v6  ;;  %v6740_v6 = vpop.eup %4359  ;;  %v1372_v53 = vmul.f32 1.442695, %v1287_v24  ;;  %v1376_v50 = vmul.f32 1.442695, %v1289_v2 }
 0x2cc   : > { %8497 = vst [vmem:[#allocation12_spill] sm:$0xff] %v6712_v3  ;;  %vm2269_vm10 = vcmp.eq.f32.partialorder %v8500_v48, %v6712_v3  ;;  %8509 = vst [vmem:[#allocation83_spill] sm:$0xff] %v6740_v6  ;;  %v6744_v25 = vpop.eup %4361  ;;  %v4691_v24 = vld [vmem:[%s5425_s14 + $0xd0] sm:$0xff]  ;;  %v4693_v2 = vld [vmem:[%s5425_s14 + $0xe0] sm:$0xff] }
 0x2cd   : > { %v2270_v33 = vsel %vm2269_vm10, %v2265_v41, inf  ;;  %v1370_v41 = vmul.f32 1.442695, %v1286_v35  ;;  %8511 = vst [vmem:[#allocation18_spill] sm:$0xff] %v6744_v25  ;;  %4381 = vpow2.f32 %v1366_v49  ;;  %v2297_v35 = vcvt.s32.f32 %v2295_v31  ;;  %v8531_v3 = vld [vmem:[#allocation15_spill] sm:$0xff] }
 0x2ce   : > { %2271 = vmin.xlane.f32.xlu0 %v2270_v33  ;;  %v6748_v33 = vpop.eup %4363  ;;  %4383 = vpow2.f32 %v1368_v20  ;;  %v1378_v49 = vmul.f32 1.442695, %v1290_v39  ;;  %v1380_v20 = vmul.f32 1.442695, %v1291_v57  ;;  %v4695_v57 = vld [vmem:[%s5425_s14 + $0xf0] sm:$0xff] }
 0x2cf   : > { %v6731_v17 = vpop.xlane.xlu0 %2283  ;;  %8512 = vst [vmem:[#allocation20_spill] sm:$0xff] %v6748_v33  ;;  %v6753_v15 = vpop.eup %4365  ;;  %4385 = vpow2.f32 %v1370_v41 }
 0x2d0   : > { %8505 = vst [vmem:[#allocation16_spill] sm:$0xff] %v6731_v17  ;;  %vm2285_vm11 = vcmp.eq.f32.partialorder %v8508_v45, %v6731_v17  ;;  %8514 = vst [vmem:[#allocation24_spill] sm:$0xff] %v6753_v15  ;;  %v6759_v45 = vpop.eup %4367  ;;  %4387 = vpow2.f32 %v1372_v53 }
 0x2d1   : > { %v2286_v48 = vsel %vm2285_vm11, %v2281_v63, inf  ;;  %v8515_v63 = vld [vmem:[#allocation95_spill] sm:$0xff]  ;;  %8517 = vst [vmem:[#allocation26_spill] sm:$0xff] %v6759_v45  ;;  %v6763_v37 = vpop.eup %4369  ;;  %4389 = vpow2.f32 %v1374_v16 }
 0x2d2   : > { %2287 = vmin.xlane.f32.xlu1 %v2286_v48  ;;  %v1292_v19 = vsub.f32 %v4691_v24, %v8515_v63  ;;  %v1293_v31 = vsub.f32 %v4692_v52, %v8515_v63  ;;  %8518 = vst [vmem:[#allocation67_spill] sm:$0xff] %v6763_v37  ;;  %v1294_v48 = vsub.f32 %v4693_v2, %v8519_v34  ;;  %v6767_v38 = vpop.eup %4371  ;;  %v4694_v24 = vld [vmem:[%s5425_s14 + $0xe8] sm:$0xff]  ;;  %v2313_v63 = vcvt.s32.f32 %v2311_v11  ;;  %v4696_v2 = vld [vmem:[%s5425_s14 + $0xf8] sm:$0xff] }
 0x2d3   : > { %v6750_v26 = vpop.xlane.xlu0 %2299  ;;  %8520 = vst [vmem:[#allocation68_spill] sm:$0xff] %v6767_v38  ;;  %v1295_v41 = vsub.f32 %v4694_v24, %v8519_v34  ;;  %4391 = vpow2.f32 %v1376_v50  ;;  %v8523_v52 = vld [vmem:[#allocation97_spill] sm:$0xff]  ;;  %v4697_v50 = vld [vmem:[%s5425_s14 + $0x100] sm:$0xff] }
 0x2d4   : > { %8513 = vst [vmem:[#allocation22_spill] sm:$0xff] %v6750_v26  ;;  %vm2301_vm12 = vcmp.eq.f32.partialorder %v8516_v21, %v6750_v26  ;;  %v6774_v21 = vpop.eup %4373  ;;  %v1382_v53 = vmul.f32 1.442695, %v1292_v19  ;;  %4393 = vpow2.f32 %v1378_v49  ;;  %v1384_v16 = vmul.f32 1.442695, %v1293_v31  ;;  %v8525_v19 = vld [vmem:[#allocation98_spill] sm:$0xff] }
 0x2d5   : > { %v2302_v47 = vsel %vm2301_vm12, %v2297_v35, inf  ;;  %v2327_v35 = vand.u32 65535, %v6496_v61  ;;  %8522 = vst [vmem:[#allocation70_spill] sm:$0xff] %v6774_v21  ;;  %v1297_v34 = vsub.f32 %v4696_v2, %v8523_v52  ;;  %v6782_v24 = vpop.eup %4375  ;;  %4395 = vpow2.f32 %v1380_v20 }
 0x2d6   : > { %2303 = vmin.xlane.f32.xlu0 %v2302_v47  ;;  %v1296_v47 = vsub.f32 %v4695_v57, %v8523_v52  ;;  %8524 = vst [vmem:[#allocation72_spill] sm:$0xff] %v6782_v24  ;;  %v1386_v61 = vmul.f32 1.442695, %v1294_v48  ;;  %v1298_v26 = vsub.f32 %v4697_v50, %v8525_v19  ;;  %v6786_v17 = vpop.eup %4377  ;;  %v1388_v57 = vmul.f32 1.442695, %v1295_v41  ;;  %v4699_v48 = vld [vmem:[%s5425_s14 + $0x110] sm:$0xff] }
 0x2d7   : > { %v6771_v39 = vpop.xlane.xlu0 %2315  ;;  %8526 = vst [vmem:[#allocation73_spill] sm:$0xff] %v6786_v17  ;;  %v2329_v52 = vcvt.s32.f32 %v2327_v35  ;;  %4397 = vpow2.f32 %v1382_v53  ;;  %v8530_v50 = vld [vmem:[#allocation99_spill] sm:$0xff] }
 0x2d8   : > { %8521 = vst [vmem:[#allocation69_spill] sm:$0xff] %v6771_v39  ;;  %vm2317_vm13 = vcmp.eq.f32.partialorder %v6493_v42, %v6771_v39  ;;  %v4698_v42 = vld [vmem:[%s5425_s14 + $0x108] sm:$0xff]  ;;  %v6793_v39 = vpop.eup %4379  ;;  %v1390_v20 = vmul.f32 1.442695, %v1296_v47  ;;  %4399 = vpow2.f32 %v1384_v16  ;;  %v1394_v53 = vmul.f32 1.442695, %v1298_v26 }
 0x2d9   : > { %v2318_v11 = vsel %vm2317_vm13, %v2313_v63, inf  ;;  %v1299_v49 = vsub.f32 %v4698_v42, %v8525_v19  ;;  %v8528_v63 = vld [vmem:[#allocation63_spill] sm:$0xff]  ;;  %8529 = vst [vmem:[#allocation77_spill] sm:$0xff] %v6793_v39  ;;  %v6799_v41 = vpop.eup %4381  ;;  %v1392_v19 = vmul.f32 1.442695, %v1297_v34  ;;  %4401 = vpow2.f32 %v1386_v61  ;;  %v4701_v47 = vld [vmem:[%s5425_s14 + $0x120] sm:$0xff] }
 0x2da   : > { %2319 = vmin.xlane.f32.xlu1 %v2318_v11  ;;  %v2343_v2 = vand.u32 65535, %v8528_v63  ;;  %v1300_v11 = vsub.f32 %v4699_v48, %v8530_v50  ;;  %v4700_v42 = vld [vmem:[%s5425_s14 + $0x118] sm:$0xff]  ;;  %v6803_v29 = vpop.eup %4383  ;;  %v1302_v48 = vsub.f32 %v4701_v47, %v8533_v10  ;;  %4403 = vpow2.f32 %v1388_v57  ;;  %v4702_v34 = vld [vmem:[%s5425_s14 + $0x128] sm:$0xff] }
 0x2db   : > { %v6790_v31 = vpop.xlane.xlu0 %2331  ;;  %v1301_v35 = vsub.f32 %v4700_v42, %v8530_v50  ;;  %8532 = vst [vmem:[#allocation78_spill] sm:$0xff] %v6803_v29  ;;  %v1396_v16 = vmul.f32 1.442695, %v1299_v49  ;;  %4405 = vpow2.f32 %v1390_v20  ;;  %v8537_v47 = vld [vmem:[#allocation101_spill] sm:$0xff] }
 0x2dc   : > { %8527 = vst [vmem:[#allocation75_spill] sm:$0xff] %v6790_v31  ;;  %vm2333_vm14 = vcmp.eq.f32.partialorder %v8531_v3, %v6790_v31  ;;  %v1458_v3 = vadd.f32 %v6704_v23, %v6700_v9  ;;  %v6809_v31 = vpop.eup %4385  ;;  %v2345_v61 = vcvt.s32.f32 %v2343_v2  ;;  %v1398_v42 = vmul.f32 1.442695, %v1300_v11  ;;  %v8538_v23 = vld [vmem:[#allocation64_spill] sm:$0xff] }
 0x2dd   : > { %v2334_v63 = vsel %vm2333_vm14, %v2329_v52, inf  ;;  %8534 = vst [vmem:[#allocation79_spill] sm:$0xff] %v6809_v31  ;;  %v1303_v52 = vsub.f32 %v4702_v34, %v8533_v10  ;;  %v6815_v26 = vpop.eup %4387  ;;  %4407 = vpow2.f32 %v1392_v19  ;;  %v1400_v57 = vmul.f32 1.442695, %v1301_v35  ;;  %v4704_v10 = vld [vmem:[%s5425_s14 + $0x138] sm:$0xff]  ;;  %v4705_v11 = vld [vmem:[%s5425_s14 + $0x140] sm:$0xff] }
 0x2de   : > { %2335 = vmin.xlane.f32.xlu0 %v2334_v63  ;;  %8536 = vst [vmem:[#allocation81_spill] sm:$0xff] %v6815_v26  ;;  %v4703_v63 = vld [vmem:[%s5425_s14 + $0x130] sm:$0xff]  ;;  %v6821_v9 = vpop.eup %4389  ;;  %v1305_v49 = vsub.f32 %v4704_v10, %v8537_v47  ;;  %4409 = vpow2.f32 %v1394_v53  ;;  %v1402_v20 = vmul.f32 1.442695, %v1302_v48  ;;  %v4706_v35 = vld [vmem:[%s5425_s14 + $0x148] sm:$0xff] }
 0x2df   : > { %v6813_v50 = vpop.xlane.xlu0 %2347  ;;  %v1304_v60 = vsub.f32 %v4703_v63, %v8537_v47  ;;  %8539 = vst [vmem:[#allocation82_spill] sm:$0xff] %v6821_v9  ;;  %v6825_v34 = vpop.eup %4391  ;;  %v1306_v63 = vsub.f32 %v4705_v11, %v8541_v54  ;;  %4411 = vpow2.f32 %v1396_v16  ;;  %v1404_v19 = vmul.f32 1.442695, %v1303_v52  ;;  %v4707_v48 = vld [vmem:[%s5425_s14 + $0x150] sm:$0xff]  ;;  %v8544_v11 = vld [vmem:[#allocation103_spill] sm:$0xff] }
 0x2e0   : > { %8535 = vst [vmem:[#allocation80_spill] sm:$0xff] %v6813_v50  ;;  %vm2349_vm15 = vcmp.eq.f32.partialorder %v8538_v23, %v6813_v50  ;;  %8540 = vst [vmem:[#allocation85_spill] sm:$0xff] %v6825_v34  ;;  %v6829_v23 = vpop.eup %4393  ;;  %v1307_v47 = vsub.f32 %v4706_v35, %v8541_v54  ;;  %4413 = vpow2.f32 %v1398_v42  ;;  %v1408_v16 = vmul.f32 1.442695, %v1305_v49  ;;  %v4708_v52 = vld [vmem:[%s5425_s14 + $0x158] sm:$0xff] }
 0x2e1   : > { %v2350_v2 = vsel %vm2349_vm15, %v2345_v61, inf  ;;  %8542 = vst [vmem:[#allocation86_spill] sm:$0xff] %v6829_v23  ;;  %v1464_v61 = vadd.f32 %v6727_v43, %v6723_v56  ;;  %v6835_v10 = vpop.eup %4395  ;;  %v1406_v53 = vmul.f32 1.442695, %v1304_v60  ;;  %4415 = vpow2.f32 %v1400_v57  ;;  %v4709_v43 = vld [vmem:[%s5425_s14 + $0x160] sm:$0xff] }
 0x2e2   : > { %1459 = vadd.xlane.f32.xlu0 %v1458_v3  ;;  %2351 = vmin.xlane.f32.xlu1 %v2350_v2  ;;  %8543 = vst [vmem:[#allocation87_spill] sm:$0xff] %v6835_v10  ;;  %v1308_v3 = vsub.f32 %v4707_v48, %v8544_v11  ;;  %v1461_v2 = vadd.f32 %v6715_v12, %v6708_v30  ;;  %v6843_v54 = vpop.eup %4397  ;;  %4417 = vpow2.f32 %v1402_v20  ;;  %v1410_v35 = vmul.f32 1.442695, %v1306_v63  ;;  %v8545_v56 = vld [vmem:[#allocation104_spill] sm:$0xff]  ;;  %v4710_v12 = vld [vmem:[%s5425_s14 + $0x168] sm:$0xff] }
 0x2e3   : > { %v1309_v50 = vsub.f32 %v4708_v52, %v8544_v11  ;;  %v1310_v42 = vsub.f32 %v4709_v43, %v8545_v56  ;;  %v6847_v60 = vpop.eup %4399  ;;  %4419 = vpow2.f32 %v1404_v19  ;;  %v1412_v48 = vmul.f32 1.442695, %v1307_v47  ;;  %v8547_v52 = vld [vmem:[#allocation17_spill] sm:$0xff] }
 0x2e4   : > { %v1311_v57 = vsub.f32 %v4710_v12, %v8545_v56  ;;  %v6851_v49 = vpop.eup %4401  ;;  %4421 = vpow2.f32 %v1406_v53  ;;  %v1414_v11 = vmul.f32 1.442695, %v1308_v3  ;;  %v1470_v20 = vadd.f32 %v6748_v33, %v6744_v25  ;;  %v4711_v12 = vld [vmem:[%s5425_s14 + $0x170] sm:$0xff]  ;;  %v8546_v56 = vld [vmem:[#allocation105_spill] sm:$0xff] }
 0x2e5   : > { %v1467_v43 = vadd.f32 %v6740_v6, %v6734_v14  ;;  %v6857_v63 = vpop.eup %4403  ;;  %4423 = vpow2.f32 %v1408_v16  ;;  %v1418_v47 = vmul.f32 1.442695, %v1310_v42  ;;  %v1858_v33 = vcvt.f32.s32 %v8547_v52  ;;  %v4714_v52 = vld [vmem:[%s5425_s14 + $0x188] sm:$0xff] }
 0x2e6   : > { %1465 = vadd.xlane.f32.xlu0 %v1464_v61  ;;  %1462 = vadd.xlane.f32.xlu1 %v1461_v2  ;;  %v1416_v61 = vmul.f32 1.442695, %v1309_v50  ;;  %v6859_v19 = vpop.eup %4405  ;;  %4425 = vpow2.f32 %v1410_v35  ;;  %v1312_v2 = vsub.f32 %v4711_v12, %v8546_v56  ;;  %v1420_v3 = vmul.f32 1.442695, %v1311_v57  ;;  %v4712_v50 = vld [vmem:[%s5425_s14 + $0x178] sm:$0xff]  ;;  %v8549_v12 = vld [vmem:[#allocation106_spill] sm:$0xff] }
 0x2e7   : > { %v6863_v53 = vpop.eup %4407  ;;  %4427 = vpow2.f32 %v1412_v48  ;;  %v1313_v16 = vsub.f32 %v4712_v50, %v8546_v56  ;;  %v1476_v35 = vadd.f32 %v6767_v38, %v6763_v37  ;;  %v1473_v42 = vadd.f32 %v6759_v45, %v6753_v15  ;;  %v4715_v37 = vld [vmem:[%s5425_s14 + $0x190] sm:$0xff]  ;;  %v8551_v45 = vld [vmem:[#allocation107_spill] sm:$0xff] }
 0x2e8   : > { %v6866_v25 = vpop.eup %4409  ;;  %4429 = vpow2.f32 %v1414_v11  ;;  %v1422_v57 = vmul.f32 1.442695, %v1312_v2  ;;  %v1315_v56 = vsub.f32 %v4714_v52, %v8549_v12  ;;  %v1859_v15 = vshll.u32 %v1858_v33, 16  ;;  %v4716_v52 = vld [vmem:[%s5425_s14 + $0x198] sm:$0xff] }
 0x2e9   : > { %4431 = vpow2.f32 %v1416_v61  ;;  %v1316_v61 = vsub.f32 %v4715_v37, %v8551_v45  ;;  %v1424_v6 = vmul.f32 1.442695, %v1313_v16  ;;  %v1874_v33 = vcvt.f32.s32 %v6532_v40  ;;  %v8556_v40 = vld [vmem:[#allocation66_spill] sm:$0xff] }
 0x2ea   : > { %1471 = vadd.xlane.f32.xlu0 %v1470_v20  ;;  %1468 = vadd.xlane.f32.xlu1 %v1467_v43  ;;  %v6874_v20 = vpop.eup %4411  ;;  %4433 = vpow2.f32 %v1418_v47  ;;  %v4713_v43 = vld [vmem:[%s5425_s14 + $0x180] sm:$0xff] }
 0x2eb   : > { %v6876_v48 = vpop.eup %4413  ;;  %v1314_v11 = vsub.f32 %v4713_v43, %v8549_v12  ;;  %4435 = vpow2.f32 %v1420_v3  ;;  %v1482_v43 = vadd.f32 %v6793_v39, %v6786_v17  ;;  %v1428_v12 = vmul.f32 1.442695, %v1315_v56 }
 0x2ec   : > { %8548 = vst [vmem:[#allocation88_spill] sm:$0xff] %v6876_v48  ;;  %v6882_v38 = vpop.eup %4415  ;;  %4437 = vpow2.f32 %v1422_v57  ;;  %v1430_v17 = vmul.f32 1.442695, %v1316_v61  ;;  %v8315_v61 = vmov 0.0  }
 0x2ed   : > { %8550 = vst [vmem:[#allocation89_spill] sm:$0xff] %v6882_v38  ;;  %v6886_v2 = vpop.eup %4417  ;;  %4439 = vpow2.f32 %v1424_v6 }
 0x2ee   : > { %1477 = vadd.xlane.f32.xlu0 %v1476_v35  ;;  %1474 = vadd.xlane.f32.xlu1 %v1473_v42  ;;  %8552 = vst [vmem:[#allocation90_spill] sm:$0xff] %v6886_v2  ;;  %v1479_v35 = vadd.f32 %v6782_v24, %v6774_v21  ;;  %v6898_v37 = vpop.eup %4419  ;;  %v1426_v42 = vmul.f32 1.442695, %v1314_v11  ;;  %v4717_v24 = vld [vmem:[%s5425_s14 + $0x1a0] sm:$0xff]  ;;  %v1485_v11 = vadd.f32 %v6803_v29, %v6799_v41 }
 0x2ef   : > { %8554 = vst [vmem:[#allocation91_spill] sm:$0xff] %v6898_v37  ;;  %v6901_v16 = vpop.eup %4421  ;;  %v8555_v21 = vld [vmem:[#allocation108_spill] sm:$0xff] }
 0x2f0   : > { %v6905_v39 = vpop.eup %4423  ;;  %v1318_v14 = vsub.f32 %v4717_v24, %v8555_v21  ;;  %v8313_v24 = vmov 1.0   ;;  %4441 = vpow2.f32 %v1426_v42  ;;  %v1491_v42 = vadd.f32 %v6825_v34, %v6821_v9 }
 0x2f1   : > { %v6913_v57 = vpop.eup %4425  ;;  %4443 = vpow2.f32 %v1428_v12  ;;  %v8558_v12 = vld [vmem:[#allocation109_spill] sm:$0xff] }
 0x2f2   : > { %1483 = vadd.xlane.f32.xlu0 %v1482_v43  ;;  %1480 = vadd.xlane.f32.xlu1 %v1479_v35  ;;  %v6924_v35 = vpop.eup %4427  ;;  %4445 = vpow2.f32 %v1430_v17  ;;  %v1906_v17 = vcvt.f32.s32 %v6546_v55 }
 0x2f3   : > { %v1856_v50 = vpop.xlane.xlu1 %1855  ;;  %v6935_v29 = vpop.eup %4429 }
 0x2f4   : > { %v1857_v47 = vcvt.f32.s32 %v1856_v50  ;;  %v1317_v50 = vsub.f32 %v4716_v52, %v8551_v45  ;;  %v1488_v45 = vadd.f32 %v6815_v26, %v6809_v31  ;;  %v1875_v52 = vshll.u32 %v1874_v33, 16  ;;  %v6937_v6 = vpop.eup %4431  ;;  %v4718_v33 = vld [vmem:[%s5425_s14 + $0x1a8] sm:$0xff] }
 0x2f5   : > { %v1890_v26 = vcvt.f32.s32 %v6539_v4 }
 0x2f6   : > { %v1860_v3 = vadd.s32 %v1859_v15, %v1857_v47  ;;  %v8557_v15 = vld [vmem:[#allocation65_spill] sm:$0xff]  ;;  %1489 = vadd.xlane.f32.xlu0 %v1488_v45  ;;  %1486 = vadd.xlane.f32.xlu1 %v1485_v11  ;;  %v1432_v4 = vmul.f32 1.442695, %v1317_v50  ;;  %v4719_v11 = vld [vmem:[%s5425_s14 + $0x1b0] sm:$0xff] }
 0x2f7   : > { %v1872_v56 = vpop.xlane.xlu1 %1871  ;;  %v1320_v50 = vsub.f32 %v4719_v11, %v8558_v12  ;;  %v4720_v11 = vld [vmem:[%s5425_s14 + $0x1b8] sm:$0xff] }
 0x2f8   : > { %2358 = vst.msk [vmem:[%s6896_s18] sm:$0xff] %vm2357_vm0, %v1860_v3  ;;  %vm2391_vm1 = vcmp.eq.s32.totalorder %v8556_v40, %v1860_v3  ;;  %vm2390_vm2 = vcmp.eq.s32.totalorder %v8557_v15, %v1860_v3  ;;  %v1873_v31 = vcvt.f32.s32 %v1872_v56  ;;  %v1319_v56 = vsub.f32 %v4718_v33, %v8555_v21 }
 0x2f9   : > { %v3829_v47 = vsel %vm2391_vm1, 1.0, %v8315_v61  ;;  %3892 = vmatprep.mubr.msk.f32.mxu1 %vm2391_vm1, %v8313_v24  ;;  %v3828_v43 = vsel %vm2390_vm2, 1.0, %v8315_v61  ;;  %v1434_v3 = vmul.f32 1.442695, %v1318_v14  ;;  %v1891_v61 = vshll.u32 %v1890_v26, 16 }
 0x2fa   : > { %2583 = vst [vmem:[%s6928_s20 + $0x8] sm:$0xff] %v3829_v47  ;;  %2582 = vst [vmem:[%s6928_s20] sm:$0xff] %v3828_v43  ;;  %3893 = vmatmul.mubr.msk.f32.vlgmr.msra.gmra.mrb[0].mxu1 %vm2390_vm2, %v8313_v24  ;;  %v1876_v47 = vadd.s32 %v1875_v52, %v1873_v31  ;;  %v6941_v43 = vpop.eup %4433  ;;  %v1494_v24 = vadd.f32 %v6835_v10, %v6829_v23  ;;  %1492 = vadd.xlane.f32.xlu1 %v1491_v42  ;;  %v8559_v31 = vmov 0.0   ;;  %4447 = vpow2.f32 %v1432_v4  ;;  %v8561_v42 = vld [vmem:[#allocation110_spill] sm:$0xff] }
 0x2fb   : > { %v6947_v45 = vpop.eup %4435  ;;  %v1888_v21 = vpop.xlane.xlu1 %1887  ;;  %v1436_v33 = vmul.f32 1.442695, %v1319_v56  ;;  %v1321_v10 = vsub.f32 %v4720_v11, %v8558_v12  ;;  %v8560_v23 = vmov 1.0   ;;  %v1500_v4 = vadd.f32 %v6857_v63, %v6851_v49 }
 0x2fc   : > { %2359 = vst.msk [vmem:[%s6896_s18 + $0x8] sm:$0xff] %vm2357_vm0, %v1876_v47  ;;  %vm2393_vm3 = vcmp.eq.s32.totalorder %v8556_v40, %v1876_v47  ;;  %vm2392_vm4 = vcmp.eq.s32.totalorder %v8557_v15, %v1876_v47  ;;  %1495 = vadd.xlane.f32.xlu0 %v1494_v24  ;;  %v1889_v14 = vcvt.f32.s32 %v1888_v21  ;;  %v6965_v55 = vpop.eup %4437  ;;  %v4721_v24 = vld [vmem:[%s5425_s14 + $0x1c0] sm:$0xff]  ;;  %v1497_v56 = vadd.f32 %v6847_v60, %v6843_v54 }
 0x2fd   : > { %v3831_v52 = vsel %vm2393_vm3, 1.0, %v8559_v31  ;;  %v3830_v26 = vsel %vm2392_vm4, 1.0, %v8559_v31  ;;  %3894 = vmatprep.mubr.msk.f32.mxu1 %vm2393_vm3, %v8560_v23  ;;  %v1322_v21 = vsub.f32 %v4721_v24, %v8561_v42  ;;  %4449 = vpow2.f32 %v1434_v3  ;;  %v6983_v47 = vpop.eup %4439 }
 0x2fe   : > { %2585 = vst [vmem:[%s6928_s20 + $0x18] sm:$0xff] %v3831_v52  ;;  %2584 = vst [vmem:[%s6928_s20 + $0x10] sm:$0xff] %v3830_v26  ;;  %v1892_v34 = vadd.s32 %v1891_v61, %v1889_v14  ;;  %3895 = vmatmul.mubr.msk.f32.gmra.mrb[2].mxu1 %vm2392_vm4, %v8560_v23  ;;  %v1438_v12 = vmul.f32 1.442695, %v1320_v50  ;;  %v4722_v52 = vld [vmem:[%s5425_s14 + $0x1c8] sm:$0xff]  ;;  %v1922_v11 = vcvt.f32.s32 %v6553_v5  ;;  %v1907_v24 = vshll.u32 %v1906_v17, 16  ;;  %1498 = vadd.xlane.f32.xlu1 %v1497_v56  ;;  %v6988_v17 = vpop.eup %4441 }
 0x2ff   : > { %v1323_v26 = vsub.f32 %v4722_v52, %v8561_v42  ;;  %v1904_v9 = vpop.xlane.xlu1 %1903  ;;  %4451 = vpow2.f32 %v1436_v33  ;;  %v1440_v3 = vmul.f32 1.442695, %v1321_v10  ;;  %v1442_v14 = vmul.f32 1.442695, %v1322_v21  ;;  %v6997_v33 = vpop.eup %4443  ;;  %v8562_v56 = vld [vmem:[#allocation113_spill] sm:$0xff] }
 0x300   : > { %2360 = vst.msk [vmem:[%s6896_s18 + $0x10] sm:$0xff] %vm2357_vm0, %v1892_v34  ;;  %1501 = vadd.xlane.f32.xlu0 %v1500_v4  ;;  %v1905_v61 = vcvt.f32.s32 %v1904_v9  ;;  %vm2395_vm5 = vcmp.eq.s32.totalorder %v8556_v40, %v1892_v34  ;;  %vm2394_vm6 = vcmp.eq.s32.totalorder %v8557_v15, %v1892_v34  ;;  %v1506_v34 = vadd.f32 %v6874_v20, %v6866_v25  ;;  %v4723_v4 = vld [vmem:[%s5425_s14 + $0x1d0] sm:$0xff] }
 0x301   : > { %v3833_v5 = vsel %vm2395_vm5, 1.0, %v8559_v31  ;;  %3896 = vmatprep.mubr.msk.f32.mxu1 %vm2395_vm5, %v8560_v23  ;;  %v3832_v50 = vsel %vm2394_vm6, 1.0, %v8559_v31  ;;  %v1503_v10 = vadd.f32 %v6863_v53, %v6859_v19  ;;  %4453 = vpow2.f32 %v1438_v12  ;;  %v4724_v12 = vld [vmem:[%s5425_s14 + $0x1d8] sm:$0xff] }
 0x302   : > { %v1908_v9 = vadd.s32 %v1907_v24, %v1905_v61  ;;  %2587 = vst [vmem:[%s6928_s20 + $0x28] sm:$0xff] %v3833_v5  ;;  %2586 = vst [vmem:[%s6928_s20 + $0x20] sm:$0xff] %v3832_v50  ;;  %3897 = vmatmul.mubr.msk.f32.gmra.mrb[4].mxu1 %vm2394_vm6, %v8560_v23  ;;  %v1444_v42 = vmul.f32 1.442695, %v1323_v26  ;;  %v1324_v21 = vsub.f32 %v4723_v4, %v8562_v56  ;;  %v1923_v52 = vshll.u32 %v1922_v11, 16  ;;  %v7001_v61 = vpop.eup %4445 }
 0x303   : > { %v1920_v24 = vpop.xlane.xlu1 %1919  ;;  %v1938_v5 = vcvt.f32.s32 %v6560_v44  ;;  %1504 = vadd.xlane.f32.xlu1 %v1503_v10  ;;  %4455 = vpow2.f32 %v1440_v3  ;;  %v1325_v26 = vsub.f32 %v4724_v12, %v8562_v56  ;;  %v1512_v3 = vadd.f32 %v6898_v37, %v6886_v2  ;;  %v4725_v56 = vld [vmem:[%s5425_s14 + $0x1e0] sm:$0xff]  ;;  %v4728_v2 = vld [vmem:[%s5425_s14 + $0x1f8] sm:$0xff] }
 0x304   : > { %2361 = vst.msk [vmem:[%s6896_s18 + $0x18] sm:$0xff] %vm2357_vm0, %v1908_v9  ;;  %1507 = vadd.xlane.f32.xlu0 %v1506_v34  ;;  %v1921_v50 = vcvt.f32.s32 %v1920_v24  ;;  %vm2397_vm7 = vcmp.eq.s32.totalorder %v8556_v40, %v1908_v9  ;;  %vm2396_vm8 = vcmp.eq.s32.totalorder %v8557_v15, %v1908_v9  ;;  %4457 = vpow2.f32 %v1442_v14  ;;  %v7020_v10 = vpop.eup %4447  ;;  %v8563_v24 = vld [vmem:[#allocation114_spill] sm:$0xff] }
 0x305   : > { %v3835_v11 = vsel %vm2397_vm7, 1.0, %v8559_v31  ;;  %3898 = vmatprep.mubr.msk.f32.mxu1 %vm2397_vm7, %v8560_v23  ;;  %v3834_v44 = vsel %vm2396_vm8, 1.0, %v8559_v31  ;;  %v1509_v9 = vadd.f32 %v6882_v38, %v6876_v48  ;;  %4459 = vpow2.f32 %v1444_v42 }
 0x306   : > { %v1924_v34 = vadd.s32 %v1923_v52, %v1921_v50  ;;  %2589 = vst [vmem:[%s6928_s20 + $0x38] sm:$0xff] %v3835_v11  ;;  %2588 = vst [vmem:[%s6928_s20 + $0x30] sm:$0xff] %v3834_v44  ;;  %3899 = vmatmul.mubr.msk.f32.gmra.mrb[6].mxu1 %vm2396_vm8, %v8560_v23  ;;  %v1446_v4 = vmul.f32 1.442695, %v1324_v21  ;;  %v1326_v12 = vsub.f32 %v4725_v56, %v8563_v24  ;;  %v1954_v14 = vcvt.f32.s32 %v6567_v7  ;;  %v4726_v44 = vld [vmem:[%s5425_s14 + $0x1e8] sm:$0xff]  ;;  %v4727_v56 = vld [vmem:[%s5425_s14 + $0x1f0] sm:$0xff] }
 0x307   : > { %v1936_v52 = vpop.xlane.xlu1 %1935  ;;  %v1939_v50 = vshll.u32 %v1938_v5, 16  ;;  %1510 = vadd.xlane.f32.xlu1 %v1509_v9  ;;  %v7029_v42 = vpop.eup %4449  ;;  %v1448_v21 = vmul.f32 1.442695, %v1325_v26  ;;  %v1327_v7 = vsub.f32 %v4726_v44, %v8563_v24  ;;  %v8564_v9 = vld [vmem:[#allocation62_spill] sm:$0xff]  ;;  %v1518_v26 = vadd.f32 %v6924_v35, %v6913_v57 }
 0x308   : > { %2362 = vst.msk [vmem:[%s6896_s18 + $0x20] sm:$0xff] %vm2357_vm0, %v1924_v34  ;;  %1513 = vadd.xlane.f32.xlu0 %v1512_v3  ;;  %v1937_v11 = vcvt.f32.s32 %v1936_v52  ;;  %vm2399_vm9 = vcmp.eq.s32.totalorder %v8556_v40, %v1924_v34  ;;  %vm2398_vm10 = vcmp.eq.s32.totalorder %v8557_v15, %v1924_v34  ;;  %v1328_v52 = vsub.f32 %v4727_v56, %v8564_v9 }
 0x309   : > { %v3837_v5 = vsel %vm2399_vm9, 1.0, %v8559_v31  ;;  %3900 = vmatprep.mubr.msk.f32.mxu1 %vm2399_vm9, %v8560_v23  ;;  %v3836_v3 = vsel %vm2398_vm10, 1.0, %v8559_v31  ;;  %v1515_v34 = vadd.f32 %v6905_v39, %v6901_v16  ;;  %v7045_v24 = vpop.eup %4451  ;;  %4461 = vpow2.f32 %v1446_v4 }
 0x30a   : > { %v1940_v37 = vadd.s32 %v1939_v50, %v1937_v11  ;;  %2591 = vst [vmem:[%s6928_s20 + $0x48] sm:$0xff] %v3837_v5  ;;  %2590 = vst [vmem:[%s6928_s20 + $0x40] sm:$0xff] %v3836_v3  ;;  %3901 = vmatmul.mubr.msk.f32.gmra.mrb[8].mxu1 %vm2398_vm10, %v8560_v23  ;;  %v1450_v44 = vmul.f32 1.442695, %v1326_v12  ;;  %v1329_v38 = vsub.f32 %v4728_v2, %v8564_v9  ;;  %v1955_v48 = vshll.u32 %v1954_v14, 16 }
 0x30b   : > { %v1952_v56 = vpop.xlane.xlu1 %1951  ;;  %v1970_v50 = vcvt.f32.s32 %v6574_v18  ;;  %1516 = vadd.xlane.f32.xlu1 %v1515_v34  ;;  %v7054_v4 = vpop.eup %4453  ;;  %4463 = vpow2.f32 %v1448_v21  ;;  %v1452_v12 = vmul.f32 1.442695, %v1327_v7  ;;  %v1454_v14 = vmul.f32 1.442695, %v1328_v52 }
 0x30c   : > { %2363 = vst.msk [vmem:[%s6896_s18 + $0x28] sm:$0xff] %vm2357_vm0, %v1940_v37  ;;  %1519 = vadd.xlane.f32.xlu0 %v1518_v26  ;;  %v1953_v11 = vcvt.f32.s32 %v1952_v56  ;;  %vm2401_vm11 = vcmp.eq.s32.totalorder %v8556_v40, %v1940_v37  ;;  %vm2400_vm12 = vcmp.eq.s32.totalorder %v8557_v15, %v1940_v37  ;;  %v1524_v37 = vadd.f32 %v6947_v45, %v6941_v43 }
 0x30d   : > { %v3839_v2 = vsel %vm2401_vm11, 1.0, %v8559_v31  ;;  %3902 = vmatprep.mubr.msk.f32.mxu1 %vm2401_vm11, %v8560_v23  ;;  %v3838_v18 = vsel %vm2400_vm12, 1.0, %v8559_v31  ;;  %v1521_v21 = vadd.f32 %v6937_v6, %v6935_v29  ;;  %v7066_v7 = vpop.eup %4455  ;;  %4465 = vpow2.f32 %v1450_v44 }
 0x30e   : > { %v1956_v5 = vadd.s32 %v1955_v48, %v1953_v11  ;;  %2593 = vst [vmem:[%s6928_s20 + $0x58] sm:$0xff] %v3839_v2  ;;  %2592 = vst [vmem:[%s6928_s20 + $0x50] sm:$0xff] %v3838_v18  ;;  %3903 = vmatmul.mubr.msk.f32.gmra.mrb[10].mxu1 %vm2400_vm12, %v8560_v23  ;;  %v1456_v3 = vmul.f32 1.442695, %v1329_v38  ;;  %v1986_v9 = vcvt.f32.s32 %v6579_v13  ;;  %v7069_v52 = vpop.eup %4457  ;;  %v1971_v48 = vshll.u32 %v1970_v50, 16 }
 0x30f   : > { %v1968_v26 = vpop.xlane.xlu1 %1967  ;;  %1522 = vadd.xlane.f32.xlu1 %v1521_v21  ;;  %v7075_v56 = vpop.eup %4459  ;;  %4467 = vpow2.f32 %v1452_v12  ;;  %v1530_v50 = vadd.f32 %v6997_v33, %v6988_v17  ;;  %v1527_v11 = vadd.f32 %v6983_v47, %v6965_v55  ;;  %v2002_v18 = vcvt.f32.s32 %v6583_v32 }
 0x310   : > { %2364 = vst.msk [vmem:[%s6896_s18 + $0x30] sm:$0xff] %vm2357_vm0, %v1956_v5  ;;  %1525 = vadd.xlane.f32.xlu0 %v1524_v37  ;;  %v1969_v34 = vcvt.f32.s32 %v1968_v26  ;;  %vm2403_vm13 = vcmp.eq.s32.totalorder %v8556_v40, %v1956_v5  ;;  %vm2402_vm14 = vcmp.eq.s32.totalorder %v8557_v15, %v1956_v5  ;;  %4469 = vpow2.f32 %v1454_v14 }
 0x311   : > { %v3841_v13 = vsel %vm2403_vm13, 1.0, %v8559_v31  ;;  %3904 = vmatprep.mubr.msk.f32.mxu1 %vm2403_vm13, %v8560_v23  ;;  %v3840_v38 = vsel %vm2402_vm14, 1.0, %v8559_v31  ;;  %4471 = vpow2.f32 %v1456_v3  ;;  %v1987_v12 = vshll.u32 %v1986_v9, 16 }
 0x312   : > { %v1972_v44 = vadd.s32 %v1971_v48, %v1969_v34  ;;  %2595 = vst [vmem:[%s6928_s20 + $0x68] sm:$0xff] %v3841_v13  ;;  %2594 = vst [vmem:[%s6928_s20 + $0x60] sm:$0xff] %v3840_v38  ;;  %3905 = vmatmul.mubr.msk.f32.gmra.mrb[12].mxu1 %vm2402_vm14, %v8560_v23  ;;  %v1536_v32 = vadd.f32 %v7045_v24, %v7029_v42  ;;  %v1533_v9 = vadd.f32 %v7020_v10, %v7001_v61 }
 0x313   : > { %v1984_v2 = vpop.xlane.xlu1 %1983  ;;  %1528 = vadd.xlane.f32.xlu1 %v1527_v11  ;;  %v7092_v5 = vpop.eup %4461  ;;  %v2003_v34 = vshll.u32 %v2002_v18, 16  ;;  %v2018_v11 = vcvt.f32.s32 %v6589_v0  ;;  %v1539_v18 = vadd.f32 %v7066_v7, %v7054_v4 }
 0x314   : > { %2365 = vst.msk [vmem:[%s6896_s18 + $0x38] sm:$0xff] %vm2357_vm0, %v1972_v44  ;;  %1531 = vadd.xlane.f32.xlu0 %v1530_v50  ;;  %v1985_v14 = vcvt.f32.s32 %v1984_v2  ;;  %vm2405_vm15 = vcmp.eq.s32.totalorder %v8556_v40, %v1972_v44  ;;  %vm2404_vm1 = vcmp.eq.s32.totalorder %v8557_v15, %v1972_v44  ;;  %v1542_v2 = vadd.f32 %v7075_v56, %v7069_v52 }
 0x315   : > { %v3843_v37 = vsel %vm2405_vm15, 1.0, %v8559_v31  ;;  %3906 = vmatprep.mubr.msk.f32.mxu1 %vm2405_vm15, %v8560_v23  ;;  %v3842_v21 = vsel %vm2404_vm1, 1.0, %v8559_v31  ;;  %v7104_v26 = vpop.eup %4463 }
 0x316   : > { %v1988_v3 = vadd.s32 %v1987_v12, %v1985_v14  ;;  %2597 = vst [vmem:[%s6928_s20 + $0x78] sm:$0xff] %v3843_v37  ;;  %2596 = vst [vmem:[%s6928_s20 + $0x70] sm:$0xff] %v3842_v21  ;;  %3907 = vmatmul.mubr.msk.f32.gmra.mrb[14].mxu1 %vm2404_vm1, %v8560_v23  ;;  %v2034_v21 = vcvt.f32.s32 %v6594_v27  ;;  %v1545_v27 = vadd.f32 %v7104_v26, %v7092_v5 }
 0x317   : > { %v2000_v48 = vpop.xlane.xlu1 %1999  ;;  %1534 = vadd.xlane.f32.xlu1 %v1533_v9  ;;  %v7110_v38 = vpop.eup %4465 }
 0x318   : > { %2366 = vst.msk [vmem:[%s6896_s18 + $0x40] sm:$0xff] %vm2357_vm0, %v1988_v3  ;;  %1537 = vadd.xlane.f32.xlu0 %v1536_v32  ;;  %v2001_v13 = vcvt.f32.s32 %v2000_v48  ;;  %vm2407_vm2 = vcmp.eq.s32.totalorder %v8556_v40, %v1988_v3  ;;  %vm2406_vm3 = vcmp.eq.s32.totalorder %v8557_v15, %v1988_v3  ;;  %v2019_v48 = vshll.u32 %v2018_v11, 16 }
 0x319   : > { %v3845_v44 = vsel %vm2407_vm2, 1.0, %v8559_v31  ;;  %3908 = vmatprep.mubr.msk.f32.mxu1 %vm2407_vm2, %v8560_v23  ;;  %v3844_v50 = vsel %vm2406_vm3, 1.0, %v8559_v31  ;;  %v7123_v14 = vpop.eup %4467 }
 0x31a   : > { %v2004_v12 = vadd.s32 %v2003_v34, %v2001_v13  ;;  %2599 = vst [vmem:[%s6928_s20 + $0x88] sm:$0xff] %v3845_v44  ;;  %2598 = vst [vmem:[%s6928_s20 + $0x80] sm:$0xff] %v3844_v50  ;;  %3909 = vmatmul.mubr.msk.f32.gmra.mrb[16].mxu1 %vm2406_vm3, %v8560_v23  ;;  %v7125_v37 = vpop.eup %4469  ;;  %v1548_v13 = vadd.f32 %v7123_v14, %v7110_v38  ;;  %v2035_v50 = vshll.u32 %v2034_v21, 16 }
 0x31b   : > { %1540 = vadd.xlane.f32.xlu1 %v1539_v18  ;;  %v7131_v0 = vpop.eup %4471  ;;  %v2016_v3 = vpop.xlane.xlu1 %2015 }
 0x31c   : > { %2367 = vst.msk [vmem:[%s6896_s18 + $0x48] sm:$0xff] %vm2357_vm0, %v2004_v12  ;;  %1543 = vadd.xlane.f32.xlu0 %v1542_v2  ;;  %vm2409_vm4 = vcmp.eq.s32.totalorder %v8556_v40, %v2004_v12  ;;  %vm2408_vm5 = vcmp.eq.s32.totalorder %v8557_v15, %v2004_v12  ;;  %v2017_v34 = vcvt.f32.s32 %v2016_v3  ;;  %v1551_v11 = vadd.f32 %v7131_v0, %v7125_v37 }
 0x31d   : > { %v3847_v32 = vsel %vm2409_vm4, 1.0, %v8559_v31  ;;  %3910 = vmatprep.mubr.msk.f32.mxu1 %vm2409_vm4, %v8560_v23  ;;  %v3846_v9 = vsel %vm2408_vm5, 1.0, %v8559_v31  ;;  %v2050_v2 = vcvt.f32.s32 %v6599_v1  ;;  %v2066_v1 = vcvt.f32.s32 %v6603_v58 }
 0x31e   : > { %2601 = vst [vmem:[%s6928_s20 + $0x98] sm:$0xff] %v3847_v32  ;;  %2600 = vst [vmem:[%s6928_s20 + $0x90] sm:$0xff] %v3846_v9  ;;  %3911 = vmatmul.mubr.msk.f32.gmra.mrb[18].mxu1 %vm2408_vm5, %v8560_v23  ;;  %v2020_v44 = vadd.s32 %v2019_v48, %v2017_v34 }
 0x31f   : > { %1546 = vadd.xlane.f32.xlu1 %v1545_v27  ;;  %v2032_v12 = vpop.xlane.xlu1 %2031  ;;  %v2051_v48 = vshll.u32 %v2050_v2, 16  ;;  %v2067_v58 = vshll.u32 %v2066_v1, 16 }
 0x320   : > { %1549 = vadd.xlane.f32.xlu0 %v1548_v13  ;;  %2368 = vst.msk [vmem:[%s6896_s18 + $0x50] sm:$0xff] %vm2357_vm0, %v2020_v44  ;;  %v2033_v18 = vcvt.f32.s32 %v2032_v12  ;;  %vm2411_vm6 = vcmp.eq.s32.totalorder %v8556_v40, %v2020_v44  ;;  %vm2410_vm7 = vcmp.eq.s32.totalorder %v8557_v15, %v2020_v44  ;;  %v2082_v12 = vcvt.f32.s32 %v6609_v8 }
 0x321   : > { %v3849_v3 = vsel %vm2411_vm6, 1.0, %v8559_v31  ;;  %3912 = vmatprep.mubr.msk.f32.mxu1 %vm2411_vm6, %v8560_v23  ;;  %v3848_v21 = vsel %vm2410_vm7, 1.0, %v8559_v31 }
 0x322   : > { %v2036_v32 = vadd.s32 %v2035_v50, %v2033_v18  ;;  %2603 = vst [vmem:[%s6928_s20 + $0xa8] sm:$0xff] %v3849_v3  ;;  %2602 = vst [vmem:[%s6928_s20 + $0xa0] sm:$0xff] %v3848_v21  ;;  %3913 = vmatmul.mubr.msk.f32.gmra.mrb[20].mxu1 %vm2410_vm7, %v8560_v23  ;;  %v2098_v3 = vcvt.f32.s32 %v6614_v59 }
 0x323   : > { %1552 = vadd.xlane.f32.xlu1 %v1551_v11  ;;  %v2048_v9 = vpop.xlane.xlu1 %2047 }
 0x324   : > { %2369 = vst.msk [vmem:[%s6896_s18 + $0x58] sm:$0xff] %vm2357_vm0, %v2036_v32  ;;  %v2049_v34 = vcvt.f32.s32 %v2048_v9  ;;  %vm2413_vm8 = vcmp.eq.s32.totalorder %v8556_v40, %v2036_v32  ;;  %vm2412_vm9 = vcmp.eq.s32.totalorder %v8557_v15, %v2036_v32  ;;  %v2083_v32 = vshll.u32 %v2082_v12, 16 }
 0x325   : > { %v3851_v13 = vsel %vm2413_vm8, 1.0, %v8559_v31  ;;  %3914 = vmatprep.mubr.msk.f32.mxu1 %vm2413_vm8, %v8560_v23  ;;  %v3850_v27 = vsel %vm2412_vm9, 1.0, %v8559_v31 }
 0x326   : > { %v2052_v44 = vadd.s32 %v2051_v48, %v2049_v34  ;;  %2605 = vst [vmem:[%s6928_s20 + $0xb8] sm:$0xff] %v3851_v13  ;;  %2604 = vst [vmem:[%s6928_s20 + $0xb0] sm:$0xff] %v3850_v27  ;;  %3915 = vmatmul.mubr.msk.f32.gmra.mrb[22].mxu1 %vm2412_vm9, %v8560_v23  ;;  %v2099_v34 = vshll.u32 %v2098_v3, 16  ;;  %v2114_v13 = vcvt.f32.s32 %v6619_v22 }
 0x327   : > { %v2064_v50 = vpop.xlane.xlu1 %2063 }
 0x328   : > { %2370 = vst.msk [vmem:[%s6896_s18 + $0x60] sm:$0xff] %vm2357_vm0, %v2052_v44  ;;  %v2065_v11 = vcvt.f32.s32 %v2064_v50  ;;  %vm2415_vm10 = vcmp.eq.s32.totalorder %v8556_v40, %v2052_v44  ;;  %vm2414_vm11 = vcmp.eq.s32.totalorder %v8557_v15, %v2052_v44  ;;  %v2130_v50 = vcvt.f32.s32 %v6623_v36 }
 0x329   : > { %v3853_v2 = vsel %vm2415_vm10, 1.0, %v8559_v31  ;;  %3916 = vmatprep.mubr.msk.f32.mxu1 %vm2415_vm10, %v8560_v23  ;;  %v3852_v18 = vsel %vm2414_vm11, 1.0, %v8559_v31 }
 0x32a   : > { %v2068_v21 = vadd.s32 %v2067_v58, %v2065_v11  ;;  %2607 = vst [vmem:[%s6928_s20 + $0xc8] sm:$0xff] %v3853_v2  ;;  %2606 = vst [vmem:[%s6928_s20 + $0xc0] sm:$0xff] %v3852_v18  ;;  %3917 = vmatmul.mubr.msk.f32.gmra.mrb[24].mxu1 %vm2414_vm11, %v8560_v23  ;;  %v2115_v2 = vshll.u32 %v2114_v13, 16 }
 0x32b   : > { %v2080_v8 = vpop.xlane.xlu0 %2079 }
 0x32c   : > { %2371 = vst.msk [vmem:[%s6896_s18 + $0x68] sm:$0xff] %vm2357_vm0, %v2068_v21  ;;  %v2081_v1 = vcvt.f32.s32 %v2080_v8  ;;  %vm2417_vm12 = vcmp.eq.s32.totalorder %v8556_v40, %v2068_v21  ;;  %vm2416_vm13 = vcmp.eq.s32.totalorder %v8557_v15, %v2068_v21 }
 0x32d   : > { %v3855_v9 = vsel %vm2417_vm12, 1.0, %v8559_v31  ;;  %3918 = vmatprep.mubr.msk.f32.mxu1 %vm2417_vm12, %v8560_v23  ;;  %v3854_v59 = vsel %vm2416_vm13, 1.0, %v8559_v31 }
 0x32e   : > { %v2084_v27 = vadd.s32 %v2083_v32, %v2081_v1  ;;  %2609 = vst [vmem:[%s6928_s20 + $0xd8] sm:$0xff] %v3855_v9  ;;  %2608 = vst [vmem:[%s6928_s20 + $0xd0] sm:$0xff] %v3854_v59  ;;  %3919 = vmatmul.mubr.msk.f32.gmra.mrb[26].mxu1 %vm2416_vm13, %v8560_v23  ;;  %v2131_v32 = vshll.u32 %v2130_v50, 16 }
 0x32f   : > { %v2096_v48 = vpop.xlane.xlu1 %2095 }
 0x330   : > { %v2097_v44 = vcvt.f32.s32 %v2096_v48  ;;  %2372 = vst.msk [vmem:[%s6896_s18 + $0x70] sm:$0xff] %vm2357_vm0, %v2084_v27  ;;  %vm2419_vm14 = vcmp.eq.s32.totalorder %v8556_v40, %v2084_v27  ;;  %vm2418_vm15 = vcmp.eq.s32.totalorder %v8557_v15, %v2084_v27 }
 0x331   : > { %v3857_v22 = vsel %vm2419_vm14, 1.0, %v8559_v31  ;;  %3920 = vmatprep.mubr.msk.f32.mxu1 %vm2419_vm14, %v8560_v23  ;;  %v3856_v12 = vsel %vm2418_vm15, 1.0, %v8559_v31 }
 0x332   : > { %v2100_v58 = vadd.s32 %v2099_v34, %v2097_v44  ;;  %2611 = vst [vmem:[%s6928_s20 + $0xe8] sm:$0xff] %v3857_v22  ;;  %2610 = vst [vmem:[%s6928_s20 + $0xe0] sm:$0xff] %v3856_v12  ;;  %3921 = vmatmul.mubr.msk.f32.gmra.mrb[28].mxu1 %vm2418_vm15, %v8560_v23  ;;  %v2146_v34 = vcvt.f32.s32 %v6629_v62  ;;  %v2162_v44 = vcvt.f32.s32 %v6634_v51 }
 0x333   : > { %v2112_v11 = vpop.xlane.xlu0 %2111 }
 0x334   : > { %2373 = vst.msk [vmem:[%s6896_s18 + $0x78] sm:$0xff] %vm2357_vm0, %v2100_v58  ;;  %v2113_v18 = vcvt.f32.s32 %v2112_v11  ;;  %vm2421_vm1 = vcmp.eq.s32.totalorder %v8556_v40, %v2100_v58  ;;  %vm2420_vm2 = vcmp.eq.s32.totalorder %v8557_v15, %v2100_v58  ;;  %v2147_v62 = vshll.u32 %v2146_v34, 16  ;;  %v8565_v34 = vld [vmem:[#allocation19_spill] sm:$0xff] }
 0x335   : > { %v3859_v36 = vsel %vm2421_vm1, 1.0, %v8559_v31  ;;  %3922 = vmatprep.mubr.msk.f32.mxu1 %vm2421_vm1, %v8560_v23  ;;  %v3858_v3 = vsel %vm2420_vm2, 1.0, %v8559_v31  ;;  %v2163_v12 = vshll.u32 %v2162_v44, 16 }
 0x336   : > { %v2116_v21 = vadd.s32 %v2115_v2, %v2113_v18  ;;  %2613 = vst [vmem:[%s6928_s20 + $0xf8] sm:$0xff] %v3859_v36  ;;  %2612 = vst [vmem:[%s6928_s20 + $0xf0] sm:$0xff] %v3858_v3  ;;  %3923 = vmatmul.mubr.msk.f32.gmra.mrb[30].mxu1 %vm2420_vm2, %v8560_v23  ;;  %v2178_v2 = vcvt.f32.s32 %v6639_v46  ;;  %v2194_v46 = vcvt.f32.s32 %v6646_v28 }
 0x337   : > { %v2128_v8 = vpop.xlane.xlu1 %2127 }
 0x338   : > { %v2129_v1 = vcvt.f32.s32 %v2128_v8  ;;  %2374 = vst.msk [vmem:[%s6896_s18 + $0x80] sm:$0xff] %vm2357_vm0, %v2116_v21  ;;  %vm2423_vm3 = vcmp.eq.s32.totalorder %v8556_v40, %v2116_v21  ;;  %vm2422_vm4 = vcmp.eq.s32.totalorder %v8557_v15, %v2116_v21  ;;  %v2179_v8 = vshll.u32 %v2178_v2, 16 }
 0x339   : > { %v3861_v59 = vsel %vm2423_vm3, 1.0, %v8559_v31  ;;  %3924 = vmatprep.mubr.msk.f32.mxu1 %vm2423_vm3, %v8560_v23  ;;  %v3860_v48 = vsel %vm2422_vm4, 1.0, %v8559_v31  ;;  %v2195_v28 = vshll.u32 %v2194_v46, 16 }
 0x33a   : > { %v2132_v9 = vadd.s32 %v2131_v32, %v2129_v1  ;;  %2615 = vst [vmem:[%s6928_s20 + $0x108] sm:$0xff] %v3861_v59  ;;  %2614 = vst [vmem:[%s6928_s20 + $0x100] sm:$0xff] %v3860_v48  ;;  %3925 = vmatmul.mubr.msk.f32.gmra.mrb[32].mxu1 %vm2422_vm4, %v8560_v23 }
 0x33b   : > { %v2144_v58 = vpop.xlane.xlu0 %2143 }
 0x33c   : > { %2375 = vst.msk [vmem:[%s6896_s18 + $0x88] sm:$0xff] %vm2357_vm0, %v2132_v9  ;;  %vm2425_vm5 = vcmp.eq.s32.totalorder %v8556_v40, %v2132_v9  ;;  %vm2424_vm6 = vcmp.eq.s32.totalorder %v8557_v15, %v2132_v9  ;;  %v2145_v50 = vcvt.f32.s32 %v2144_v58 }
 0x33d   : > { %v3863_v13 = vsel %vm2425_vm5, 1.0, %v8559_v31  ;;  %v3862_v27 = vsel %vm2424_vm6, 1.0, %v8559_v31  ;;  %3926 = vmatprep.mubr.msk.f32.mxu1 %vm2425_vm5, %v8560_v23 }
 0x33e   : > { %2617 = vst [vmem:[%s6928_s20 + $0x118] sm:$0xff] %v3863_v13  ;;  %2616 = vst [vmem:[%s6928_s20 + $0x110] sm:$0xff] %v3862_v27  ;;  %v2148_v22 = vadd.s32 %v2147_v62, %v2145_v50  ;;  %3927 = vmatmul.mubr.msk.f32.gmra.mrb[34].mxu1 %vm2424_vm6, %v8560_v23  ;;  %v2210_v13 = vcvt.f32.s32 %v8565_v34  ;;  %v8566_v50 = vld [vmem:[#allocation21_spill] sm:$0xff] }
 0x33f   : > { %v2160_v11 = vpop.xlane.xlu1 %2159 }
 0x340   : > { %2376 = vst.msk [vmem:[%s6896_s18 + $0x90] sm:$0xff] %vm2357_vm0, %v2148_v22  ;;  %v2161_v51 = vcvt.f32.s32 %v2160_v11  ;;  %vm2427_vm7 = vcmp.eq.s32.totalorder %v8556_v40, %v2148_v22  ;;  %vm2426_vm8 = vcmp.eq.s32.totalorder %v8557_v15, %v2148_v22  ;;  %v2226_v22 = vcvt.f32.s32 %v8566_v50 }
 0x341   : > { %v3865_v18 = vsel %vm2427_vm7, 1.0, %v8559_v31  ;;  %3928 = vmatprep.mubr.msk.f32.mxu1 %vm2427_vm7, %v8560_v23  ;;  %v3864_v36 = vsel %vm2426_vm8, 1.0, %v8559_v31  ;;  %v2211_v11 = vshll.u32 %v2210_v13, 16 }
 0x342   : > { %v2164_v3 = vadd.s32 %v2163_v12, %v2161_v51  ;;  %2619 = vst [vmem:[%s6928_s20 + $0x128] sm:$0xff] %v3865_v18  ;;  %2618 = vst [vmem:[%s6928_s20 + $0x120] sm:$0xff] %v3864_v36  ;;  %3929 = vmatmul.mubr.msk.f32.gmra.mrb[36].mxu1 %vm2426_vm8, %v8560_v23 }
 0x343   : > { %v2176_v21 = vpop.xlane.xlu0 %2175 }
 0x344   : > { %2377 = vst.msk [vmem:[%s6896_s18 + $0x98] sm:$0xff] %vm2357_vm0, %v2164_v3  ;;  %v2177_v32 = vcvt.f32.s32 %v2176_v21  ;;  %vm2429_vm9 = vcmp.eq.s32.totalorder %v8556_v40, %v2164_v3  ;;  %vm2428_vm10 = vcmp.eq.s32.totalorder %v8557_v15, %v2164_v3  ;;  %v2227_v3 = vshll.u32 %v2226_v22, 16  ;;  %v8567_v21 = vld [vmem:[#allocation23_spill] sm:$0xff] }
 0x345   : > { %v3867_v1 = vsel %vm2429_vm9, 1.0, %v8559_v31  ;;  %3930 = vmatprep.mubr.msk.f32.mxu1 %vm2429_vm9, %v8560_v23  ;;  %v3866_v9 = vsel %vm2428_vm10, 1.0, %v8559_v31 }
 0x346   : > { %v2180_v59 = vadd.s32 %v2179_v8, %v2177_v32  ;;  %2621 = vst [vmem:[%s6928_s20 + $0x138] sm:$0xff] %v3867_v1  ;;  %2620 = vst [vmem:[%s6928_s20 + $0x130] sm:$0xff] %v3866_v9  ;;  %3931 = vmatmul.mubr.msk.f32.gmra.mrb[38].mxu1 %vm2428_vm10, %v8560_v23  ;;  %v2242_v8 = vcvt.f32.s32 %v8567_v21 }
 0x347   : > { %v2192_v48 = vpop.xlane.xlu1 %2191 }
 0x348   : > { %2378 = vst.msk [vmem:[%s6896_s18 + $0xa0] sm:$0xff] %vm2357_vm0, %v2180_v59  ;;  %v2193_v27 = vcvt.f32.s32 %v2192_v48  ;;  %vm2431_vm11 = vcmp.eq.s32.totalorder %v8556_v40, %v2180_v59  ;;  %vm2430_vm12 = vcmp.eq.s32.totalorder %v8557_v15, %v2180_v59  ;;  %v2243_v13 = vshll.u32 %v2242_v8, 16 }
 0x349   : > { %v3869_v44 = vsel %vm2431_vm11, 1.0, %v8559_v31  ;;  %3932 = vmatprep.mubr.msk.f32.mxu1 %vm2431_vm11, %v8560_v23  ;;  %v3868_v58 = vsel %vm2430_vm12, 1.0, %v8559_v31 }
 0x34a   : > { %v2196_v62 = vadd.s32 %v2195_v28, %v2193_v27  ;;  %2623 = vst [vmem:[%s6928_s20 + $0x148] sm:$0xff] %v3869_v44  ;;  %2622 = vst [vmem:[%s6928_s20 + $0x140] sm:$0xff] %v3868_v58  ;;  %3933 = vmatmul.mubr.msk.f32.gmra.mrb[40].mxu1 %vm2430_vm12, %v8560_v23  ;;  %v8568_v28 = vld [vmem:[#allocation25_spill] sm:$0xff] }
 0x34b   : > { %v2208_v12 = vpop.xlane.xlu0 %2207  ;;  %v2258_v48 = vcvt.f32.s32 %v8568_v28 }
 0x34c   : > { %2379 = vst.msk [vmem:[%s6896_s18 + $0xa8] sm:$0xff] %vm2357_vm0, %v2196_v62  ;;  %v2209_v2 = vcvt.f32.s32 %v2208_v12  ;;  %vm2433_vm13 = vcmp.eq.s32.totalorder %v8556_v40, %v2196_v62  ;;  %vm2432_vm14 = vcmp.eq.s32.totalorder %v8557_v15, %v2196_v62  ;;  %v8569_v12 = vld [vmem:[#allocation12_spill] sm:$0xff] }
 0x34d   : > { %v3871_v51 = vsel %vm2433_vm13, 1.0, %v8559_v31  ;;  %3934 = vmatprep.mubr.msk.f32.mxu1 %vm2433_vm13, %v8560_v23  ;;  %v3870_v18 = vsel %vm2432_vm14, 1.0, %v8559_v31  ;;  %v2259_v50 = vshll.u32 %v2258_v48, 16 }
 0x34e   : > { %v2212_v36 = vadd.s32 %v2211_v11, %v2209_v2  ;;  %2625 = vst [vmem:[%s6928_s20 + $0x158] sm:$0xff] %v3871_v51  ;;  %2624 = vst [vmem:[%s6928_s20 + $0x150] sm:$0xff] %v3870_v18  ;;  %3935 = vmatmul.mubr.msk.f32.gmra.mrb[42].mxu1 %vm2432_vm14, %v8560_v23  ;;  %v2274_v11 = vcvt.f32.s32 %v8569_v12 }
 0x34f   : > { %v2224_v46 = vpop.xlane.xlu1 %2223 }
 0x350   : > { %2380 = vst.msk [vmem:[%s6896_s18 + $0xb0] sm:$0xff] %vm2357_vm0, %v2212_v36  ;;  %v2225_v32 = vcvt.f32.s32 %v2224_v46  ;;  %vm2435_vm15 = vcmp.eq.s32.totalorder %v8556_v40, %v2212_v36  ;;  %vm2434_vm1 = vcmp.eq.s32.totalorder %v8557_v15, %v2212_v36  ;;  %v2275_v8 = vshll.u32 %v2274_v11, 16 }
 0x351   : > { %v3873_v1 = vsel %vm2435_vm15, 1.0, %v8559_v31  ;;  %3936 = vmatprep.mubr.msk.f32.mxu1 %vm2435_vm15, %v8560_v23  ;;  %v3872_v9 = vsel %vm2434_vm1, 1.0, %v8559_v31 }
 0x352   : > { %v2228_v59 = vadd.s32 %v2227_v3, %v2225_v32  ;;  %2627 = vst [vmem:[%s6928_s20 + $0x168] sm:$0xff] %v3873_v1  ;;  %2626 = vst [vmem:[%s6928_s20 + $0x160] sm:$0xff] %v3872_v9  ;;  %3937 = vmatmul.mubr.msk.f32.gmra.mrb[44].mxu1 %vm2434_vm1, %v8560_v23  ;;  %v8570_v3 = vld [vmem:[#allocation16_spill] sm:$0xff] }
 0x353   : > { %v2240_v34 = vpop.xlane.xlu0 %2239  ;;  %v2290_v46 = vcvt.f32.s32 %v8570_v3 }
 0x354   : > { %2381 = vst.msk [vmem:[%s6896_s18 + $0xb8] sm:$0xff] %vm2357_vm0, %v2228_v59  ;;  %v2241_v27 = vcvt.f32.s32 %v2240_v34  ;;  %vm2437_vm2 = vcmp.eq.s32.totalorder %v8556_v40, %v2228_v59  ;;  %vm2436_vm3 = vcmp.eq.s32.totalorder %v8557_v15, %v2228_v59  ;;  %v8571_v34 = vld [vmem:[#allocation22_spill] sm:$0xff] }
 0x355   : > { %v3875_v44 = vsel %vm2437_vm2, 1.0, %v8559_v31  ;;  %3938 = vmatprep.mubr.msk.f32.mxu1 %vm2437_vm2, %v8560_v23  ;;  %v3874_v58 = vsel %vm2436_vm3, 1.0, %v8559_v31  ;;  %v2291_v28 = vshll.u32 %v2290_v46, 16 }
 0x356   : > { %v2244_v62 = vadd.s32 %v2243_v13, %v2241_v27  ;;  %2629 = vst [vmem:[%s6928_s20 + $0x178] sm:$0xff] %v3875_v44  ;;  %2628 = vst [vmem:[%s6928_s20 + $0x170] sm:$0xff] %v3874_v58  ;;  %3939 = vmatmul.mubr.msk.f32.gmra.mrb[46].mxu1 %vm2436_vm3, %v8560_v23  ;;  %v2306_v13 = vcvt.f32.s32 %v8571_v34 }
 0x357   : > { %v2256_v22 = vpop.xlane.xlu1 %2255 }
 0x358   : > { %2382 = vst.msk [vmem:[%s6896_s18 + $0xc0] sm:$0xff] %vm2357_vm0, %v2244_v62  ;;  %v2257_v2 = vcvt.f32.s32 %v2256_v22  ;;  %vm2439_vm4 = vcmp.eq.s32.totalorder %v8556_v40, %v2244_v62  ;;  %vm2438_vm5 = vcmp.eq.s32.totalorder %v8557_v15, %v2244_v62  ;;  %v2307_v11 = vshll.u32 %v2306_v13, 16 }
 0x359   : > { %v3877_v51 = vsel %vm2439_vm4, 1.0, %v8559_v31  ;;  %3940 = vmatprep.mubr.msk.f32.mxu1 %vm2439_vm4, %v8560_v23  ;;  %v3876_v18 = vsel %vm2438_vm5, 1.0, %v8559_v31 }
 0x35a   : > { %v2260_v36 = vadd.s32 %v2259_v50, %v2257_v2  ;;  %2631 = vst [vmem:[%s6928_s20 + $0x188] sm:$0xff] %v3877_v51  ;;  %2630 = vst [vmem:[%s6928_s20 + $0x180] sm:$0xff] %v3876_v18  ;;  %3941 = vmatmul.mubr.msk.f32.gmra.mrb[48].mxu1 %vm2438_vm5, %v8560_v23  ;;  %v8572_v50 = vld [vmem:[#allocation69_spill] sm:$0xff] }
 0x35b   : > { %v2272_v21 = vpop.xlane.xlu0 %2271  ;;  %v2322_v22 = vcvt.f32.s32 %v8572_v50 }
 0x35c   : > { %2383 = vst.msk [vmem:[%s6896_s18 + $0xc8] sm:$0xff] %vm2357_vm0, %v2260_v36  ;;  %v2273_v32 = vcvt.f32.s32 %v2272_v21  ;;  %vm2441_vm6 = vcmp.eq.s32.totalorder %v8556_v40, %v2260_v36  ;;  %vm2440_vm7 = vcmp.eq.s32.totalorder %v8557_v15, %v2260_v36  ;;  %v8573_v21 = vld [vmem:[#allocation75_spill] sm:$0xff] }
 0x35d   : > { %v3879_v1 = vsel %vm2441_vm6, 1.0, %v8559_v31  ;;  %3942 = vmatprep.mubr.msk.f32.mxu1 %vm2441_vm6, %v8560_v23  ;;  %v3878_v9 = vsel %vm2440_vm7, 1.0, %v8559_v31  ;;  %v2323_v3 = vshll.u32 %v2322_v22, 16 }
 0x35e   : > { %v2276_v59 = vadd.s32 %v2275_v8, %v2273_v32  ;;  %2633 = vst [vmem:[%s6928_s20 + $0x198] sm:$0xff] %v3879_v1  ;;  %2632 = vst [vmem:[%s6928_s20 + $0x190] sm:$0xff] %v3878_v9  ;;  %3943 = vmatmul.mubr.msk.f32.gmra.mrb[50].mxu1 %vm2440_vm7, %v8560_v23  ;;  %v2338_v8 = vcvt.f32.s32 %v8573_v21 }
 0x35f   : > { %v2288_v48 = vpop.xlane.xlu1 %2287 }
 0x360   : > { %2384 = vst.msk [vmem:[%s6896_s18 + $0xd0] sm:$0xff] %vm2357_vm0, %v2276_v59  ;;  %v2289_v27 = vcvt.f32.s32 %v2288_v48  ;;  %vm2443_vm8 = vcmp.eq.s32.totalorder %v8556_v40, %v2276_v59  ;;  %vm2442_vm9 = vcmp.eq.s32.totalorder %v8557_v15, %v2276_v59  ;;  %v2339_v13 = vshll.u32 %v2338_v8, 16 }
 0x361   : > { %v3881_v44 = vsel %vm2443_vm8, 1.0, %v8559_v31  ;;  %3944 = vmatprep.mubr.msk.f32.mxu1 %vm2443_vm8, %v8560_v23  ;;  %v3880_v58 = vsel %vm2442_vm9, 1.0, %v8559_v31 }
 0x362   : > { %v2292_v62 = vadd.s32 %v2291_v28, %v2289_v27  ;;  %2635 = vst [vmem:[%s6928_s20 + $0x1a8] sm:$0xff] %v3881_v44  ;;  %2634 = vst [vmem:[%s6928_s20 + $0x1a0] sm:$0xff] %v3880_v58  ;;  %3945 = vmatmul.mubr.msk.f32.gmra.mrb[52].mxu1 %vm2442_vm9, %v8560_v23  ;;  %v8574_v28 = vld [vmem:[#allocation80_spill] sm:$0xff] }
 0x363   : > { %v2304_v12 = vpop.xlane.xlu0 %2303  ;;  %v2354_v48 = vcvt.f32.s32 %v8574_v28 }
 0x364   : > { %2385 = vst.msk [vmem:[%s6896_s18 + $0xd8] sm:$0xff] %vm2357_vm0, %v2292_v62  ;;  %v2305_v2 = vcvt.f32.s32 %v2304_v12  ;;  %vm2445_vm10 = vcmp.eq.s32.totalorder %v8556_v40, %v2292_v62  ;;  %vm2444_vm11 = vcmp.eq.s32.totalorder %v8557_v15, %v2292_v62 }
 0x365   : > { %v3883_v51 = vsel %vm2445_vm10, 1.0, %v8559_v31  ;;  %3946 = vmatprep.mubr.msk.f32.mxu1 %vm2445_vm10, %v8560_v23  ;;  %v3882_v18 = vsel %vm2444_vm11, 1.0, %v8559_v31  ;;  %v2355_v50 = vshll.u32 %v2354_v48, 16 }
 0x366   : > { %v2308_v36 = vadd.s32 %v2307_v11, %v2305_v2  ;;  %2637 = vst [vmem:[%s6928_s20 + $0x1b8] sm:$0xff] %v3883_v51  ;;  %2636 = vst [vmem:[%s6928_s20 + $0x1b0] sm:$0xff] %v3882_v18  ;;  %3947 = vmatmul.mubr.msk.f32.gmra.mrb[54].mxu1 %vm2444_vm11, %v8560_v23 }
 0x367   : > { %v2320_v46 = vpop.xlane.xlu1 %2319 }
 0x368   : > { %2386 = vst.msk [vmem:[%s6896_s18 + $0xe0] sm:$0xff] %vm2357_vm0, %v2308_v36  ;;  %v2321_v32 = vcvt.f32.s32 %v2320_v46  ;;  %vm2447_vm12 = vcmp.eq.s32.totalorder %v8556_v40, %v2308_v36  ;;  %vm2446_vm13 = vcmp.eq.s32.totalorder %v8557_v15, %v2308_v36 }
 0x369   : > { %v3885_v1 = vsel %vm2447_vm12, 1.0, %v8559_v31  ;;  %3948 = vmatprep.mubr.msk.f32.mxu1 %vm2447_vm12, %v8560_v23  ;;  %v3884_v9 = vsel %vm2446_vm13, 1.0, %v8559_v31 }
 0x36a   : > { %v2324_v59 = vadd.s32 %v2323_v3, %v2321_v32  ;;  %2639 = vst [vmem:[%s6928_s20 + $0x1c8] sm:$0xff] %v3885_v1  ;;  %2638 = vst [vmem:[%s6928_s20 + $0x1c0] sm:$0xff] %v3884_v9  ;;  %3949 = vmatmul.mubr.msk.f32.gmra.mrb[56].mxu1 %vm2446_vm13, %v8560_v23 }
 0x36b   : > { %v2336_v34 = vpop.xlane.xlu0 %2335 }
 0x36c   : > { %2387 = vst.msk [vmem:[%s6896_s18 + $0xe8] sm:$0xff] %vm2357_vm0, %v2324_v59  ;;  %v2337_v27 = vcvt.f32.s32 %v2336_v34  ;;  %vm2449_vm14 = vcmp.eq.s32.totalorder %v8556_v40, %v2324_v59  ;;  %vm2448_vm15 = vcmp.eq.s32.totalorder %v8557_v15, %v2324_v59 }
 0x36d   : > { %v3887_v44 = vsel %vm2449_vm14, 1.0, %v8559_v31  ;;  %3950 = vmatprep.mubr.msk.f32.mxu1 %vm2449_vm14, %v8560_v23  ;;  %v3886_v58 = vsel %vm2448_vm15, 1.0, %v8559_v31 }
 0x36e   : > { %v2340_v62 = vadd.s32 %v2339_v13, %v2337_v27  ;;  %2641 = vst [vmem:[%s6928_s20 + $0x1d8] sm:$0xff] %v3887_v44  ;;  %2640 = vst [vmem:[%s6928_s20 + $0x1d0] sm:$0xff] %v3886_v58  ;;  %3951 = vmatmul.mubr.msk.f32.gmra.mrb[58].mxu1 %vm2448_vm15, %v8560_v23  ;;  %v8577_v13 = vld [vmem:[#allocation74_spill] sm:$0xff] }
 0x36f   : > { %v2352_v22 = vpop.xlane.xlu1 %2351  ;;  %v1460_v12 = vpop.xlane.xlu0 %1459 }
 0x370   : > { %2388 = vst.msk [vmem:[%s6896_s18 + $0xf0] sm:$0xff] %vm2357_vm0, %v2340_v62  ;;  %v2353_v11 = vcvt.f32.s32 %v2352_v22  ;;  %4473 = vrcp.f32 %v1460_v12  ;;  %vm2451_vm1 = vcmp.eq.s32.totalorder %v8556_v40, %v2340_v62  ;;  %vm2450_vm2 = vcmp.eq.s32.totalorder %v8557_v15, %v2340_v62  ;;  %v8578_v62 = vld [vmem:[#allocation76_spill] sm:$0xff]  ;;  %v8579_v22 = vld [vmem:[#allocation14_spill] sm:$0xff] }
 0x371   : > { %v3889_v2 = vsel %vm2451_vm1, 1.0, %v8559_v31  ;;  %3952 = vmatprep.mubr.msk.f32.mxu1 %vm2451_vm1, %v8560_v23  ;;  %v3888_v51 = vsel %vm2450_vm2, 1.0, %v8559_v31 }
 0x372   : > { %v2356_v18 = vadd.s32 %v2355_v50, %v2353_v11  ;;  %2643 = vst [vmem:[%s6928_s20 + $0x1e8] sm:$0xff] %v3889_v2  ;;  %2642 = vst [vmem:[%s6928_s20 + $0x1e0] sm:$0xff] %v3888_v51  ;;  %3953 = vmatmul.mubr.msk.f32.gmra.mrb[60].mxu1 %vm2450_vm2, %v8560_v23  ;;  %v8580_v2 = vld [vmem:[#allocation84_spill] sm:$0xff] }
 0x373   : > { %v1463_v36 = vpop.xlane.xlu1 %1462  ;;  %v1466_v3 = vpop.xlane.xlu0 %1465 }
 0x374   : > { %2389 = vst.msk [vmem:[%s6896_s18 + $0xf8] sm:$0xff] %vm2357_vm0, %v2356_v18  ;;  %4475 = vrcp.f32 %v1463_v36  ;;  %vm2453_vm3 = vcmp.eq.s32.totalorder %v8556_v40, %v2356_v18  ;;  %vm2452_vm4 = vcmp.eq.s32.totalorder %v8557_v15, %v2356_v18  ;;  %v8575_v40 = vld [vmem:[#allocation71_spill] sm:$0xff]  ;;  %s4765_s18 = sshll.u32 %s4920_s16, 4  ;;  %s4766_s18 = int_to_ptr.vmem [resolvable:$false] %s4765_s18 }
 0x375   : > { %4477 = vrcp.f32 %v1466_v3  ;;  %v3891_v46 = vsel %vm2453_vm3, 1.0, %v8559_v31  ;;  %3954 = vmatprep.mubr.msk.f32.mxu1 %vm2453_vm3, %v8560_v23  ;;  %v3890_v21 = vsel %vm2452_vm4, 1.0, %v8559_v31  ;;  %v8576_v15 = vld [vmem:[#allocation27_spill] sm:$0xff]  ;;  %s4767_s8 = scalar_lea.vmem %s4766_s18, 16384 }
 0x376   : > { %2645 = vst [vmem:[%s6928_s20 + $0x1f8] sm:$0xff] %v3891_v46  ;;  %2644 = vst [vmem:[%s6928_s20 + $0x1f0] sm:$0xff] %v3890_v21  ;;  %3955 = vmatmul.mubr.msk.f32.gmra.mrb[62].mxu1 %vm2452_vm4, %v8560_v23  ;;  %v8581_v18 = vld [vmem:[#allocation83_spill] sm:$0xff]  ;;  %v8582_v21 = vld [vmem:[#allocation18_spill] sm:$0xff] }
 0x377   : > { %v1469_v8 = vpop.xlane.xlu1 %1468  ;;  %v1472_v32 = vpop.xlane.xlu0 %1471 }
 0x378   : > { %4479 = vrcp.f32 %v1469_v8 }
 0x379   : > { %4481 = vrcp.f32 %v1472_v32  ;;  %v8583_v32 = vld [vmem:[#allocation20_spill] sm:$0xff] }
 0x37a   : > { %v4474_v1 = vpop.eup %4473 }
 0x37b   : > { %v1586_v9 = vmul.f32 %v4474_v1, %v8575_v40  ;;  %v1587_v59 = vmul.f32 %v4474_v1, %v8576_v15  ;;  %v1475_v28 = vpop.xlane.xlu1 %1474  ;;  %v1478_v48 = vpop.xlane.xlu0 %1477  ;;  %v8584_v15 = vld [vmem:[#allocation24_spill] sm:$0xff] }
 0x37c   : > { %4483 = vrcp.f32 %v1475_v28  ;;  %v8585_v28 = vld [vmem:[#allocation26_spill] sm:$0xff] }
 0x37d   : > { %1650 = vst [vmem:[%s7389_s21] sm:$0xff] %v1586_v9  ;;  %1651 = vst [vmem:[%s7389_s21 + $0x8] sm:$0xff] %v1587_v59  ;;  %4485 = vrcp.f32 %v1478_v48 }
 0x37e   : > { %v4476_v23 = vpop.eup %4475 }
 0x37f   : > { %v4478_v31 = vpop.eup %4477  ;;  %v1588_v34 = vmul.f32 %v4476_v23, %v6708_v30  ;;  %v1589_v27 = vmul.f32 %v4476_v23, %v8577_v13  ;;  %v1481_v44 = vpop.xlane.xlu1 %1480 }
 0x380   : > { %v1484_v58 = vpop.xlane.xlu0 %1483  ;;  %v1590_v50 = vmul.f32 %v4478_v31, %v8578_v62  ;;  %v1591_v12 = vmul.f32 %v4478_v31, %v8579_v22  ;;  %4487 = vrcp.f32 %v1481_v44 }
 0x381   : > { %1652 = vst [vmem:[%s7389_s21 + $0x10] sm:$0xff] %v1588_v34  ;;  %1653 = vst [vmem:[%s7389_s21 + $0x18] sm:$0xff] %v1589_v27  ;;  %4489 = vrcp.f32 %v1484_v58  ;;  %v8586_v34 = vld [vmem:[#allocation67_spill] sm:$0xff]  ;;  %v8587_v27 = vld [vmem:[#allocation68_spill] sm:$0xff] }
 0x382   : > { %v4480_v11 = vpop.eup %4479  ;;  %1654 = vst [vmem:[%s7389_s21 + $0x20] sm:$0xff] %v1590_v50  ;;  %1655 = vst [vmem:[%s7389_s21 + $0x28] sm:$0xff] %v1591_v12  ;;  %v8588_v50 = vld [vmem:[#allocation70_spill] sm:$0xff]  ;;  %v8589_v12 = vld [vmem:[#allocation72_spill] sm:$0xff] }
 0x383   : > { %v4482_v30 = vpop.eup %4481  ;;  %v1592_v51 = vmul.f32 %v4480_v11, %v8580_v2  ;;  %v1593_v36 = vmul.f32 %v4480_v11, %v8581_v18  ;;  %v1487_v3 = vpop.xlane.xlu1 %1486 }
 0x384   : > { %v1490_v46 = vpop.xlane.xlu0 %1489  ;;  %v1594_v8 = vmul.f32 %v4482_v30, %v8582_v21  ;;  %v1595_v1 = vmul.f32 %v4482_v30, %v8583_v32  ;;  %4491 = vrcp.f32 %v1487_v3  ;;  %v8592_v32 = vld [vmem:[#allocation78_spill] sm:$0xff] }
 0x385   : > { %1656 = vst [vmem:[%s7389_s21 + $0x30] sm:$0xff] %v1592_v51  ;;  %1657 = vst [vmem:[%s7389_s21 + $0x38] sm:$0xff] %v1593_v36  ;;  %4493 = vrcp.f32 %v1490_v46  ;;  %v8590_v51 = vld [vmem:[#allocation73_spill] sm:$0xff] }
 0x386   : > { %v4484_v40 = vpop.eup %4483  ;;  %1658 = vst [vmem:[%s7389_s21 + $0x40] sm:$0xff] %v1594_v8  ;;  %1659 = vst [vmem:[%s7389_s21 + $0x48] sm:$0xff] %v1595_v1  ;;  %v8591_v36 = vld [vmem:[#allocation77_spill] sm:$0xff] }
 0x387   : > { %v4486_v9 = vpop.eup %4485  ;;  %v1596_v59 = vmul.f32 %v4484_v40, %v8584_v15  ;;  %v1597_v48 = vmul.f32 %v4484_v40, %v8585_v28  ;;  %v1493_v23 = vpop.xlane.xlu1 %1492  ;;  %v8593_v15 = vld [vmem:[#allocation79_spill] sm:$0xff]  ;;  %v8594_v28 = vld [vmem:[#allocation81_spill] sm:$0xff] }
 0x388   : > { %v1598_v13 = vmul.f32 %v4486_v9, %v8586_v34  ;;  %v1599_v44 = vmul.f32 %v4486_v9, %v8587_v27  ;;  %4495 = vrcp.f32 %v1493_v23 }
 0x389   : > { %v1496_v31 = vpop.xlane.xlu0 %1495  ;;  %1660 = vst [vmem:[%s7389_s21 + $0x50] sm:$0xff] %v1596_v59  ;;  %1661 = vst [vmem:[%s7389_s21 + $0x58] sm:$0xff] %v1597_v48 }
 0x38a   : > { %4497 = vrcp.f32 %v1496_v31  ;;  %v4488_v58 = vpop.eup %4487  ;;  %1662 = vst [vmem:[%s7389_s21 + $0x60] sm:$0xff] %v1598_v13  ;;  %1663 = vst [vmem:[%s7389_s21 + $0x68] sm:$0xff] %v1599_v44  ;;  %v8595_v31 = vld [vmem:[#allocation82_spill] sm:$0xff]  ;;  %v8596_v13 = vld [vmem:[#allocation85_spill] sm:$0xff] }
 0x38b   : > { %v4490_v62 = vpop.eup %4489  ;;  %v1600_v22 = vmul.f32 %v4488_v58, %v8588_v50  ;;  %v1601_v11 = vmul.f32 %v4488_v58, %v8589_v12  ;;  %v1499_v30 = vpop.xlane.xlu1 %1498 }
 0x38c   : > { %v1602_v18 = vmul.f32 %v4490_v62, %v8590_v51  ;;  %v1603_v3 = vmul.f32 %v4490_v62, %v8591_v36  ;;  %4499 = vrcp.f32 %v1499_v30  ;;  %v8597_v62 = vld [vmem:[#allocation86_spill] sm:$0xff] }
 0x38d   : > { %v1502_v2 = vpop.xlane.xlu0 %1501  ;;  %1664 = vst [vmem:[%s7389_s21 + $0x70] sm:$0xff] %v1600_v22  ;;  %1665 = vst [vmem:[%s7389_s21 + $0x78] sm:$0xff] %v1601_v11  ;;  %v8598_v22 = vld [vmem:[#allocation87_spill] sm:$0xff] }
 0x38e   : > { %4501 = vrcp.f32 %v1502_v2  ;;  %v4492_v46 = vpop.eup %4491  ;;  %1666 = vst [vmem:[%s7389_s21 + $0x80] sm:$0xff] %v1602_v18  ;;  %1667 = vst [vmem:[%s7389_s21 + $0x88] sm:$0xff] %v1603_v3 }
 0x38f   : > { %v4494_v21 = vpop.eup %4493  ;;  %v1604_v8 = vmul.f32 %v4492_v46, %v6799_v41  ;;  %v1605_v1 = vmul.f32 %v4492_v46, %v8592_v32 }
 0x390   : > { %v1505_v40 = vpop.xlane.xlu1 %1504  ;;  %v1606_v59 = vmul.f32 %v4494_v21, %v8593_v15  ;;  %v1607_v48 = vmul.f32 %v4494_v21, %v8594_v28  ;;  %v8600_v15 = vld [vmem:[#allocation89_spill] sm:$0xff] }
 0x391   : > { %v1508_v9 = vpop.xlane.xlu0 %1507  ;;  %4503 = vrcp.f32 %v1505_v40  ;;  %1668 = vst [vmem:[%s7389_s21 + $0x90] sm:$0xff] %v1604_v8  ;;  %1669 = vst [vmem:[%s7389_s21 + $0x98] sm:$0xff] %v1605_v1 }
 0x392   : > { %4505 = vrcp.f32 %v1508_v9  ;;  %v4496_v23 = vpop.eup %4495  ;;  %1670 = vst [vmem:[%s7389_s21 + $0xa0] sm:$0xff] %v1606_v59  ;;  %1671 = vst [vmem:[%s7389_s21 + $0xa8] sm:$0xff] %v1607_v48  ;;  %v8599_v9 = vld [vmem:[#allocation88_spill] sm:$0xff]  ;;  %v8601_v48 = vld [vmem:[#allocation90_spill] sm:$0xff] }
 0x393   : > { %v1608_v34 = vmul.f32 %v4496_v23, %v8595_v31  ;;  %v1609_v27 = vmul.f32 %v4496_v23, %v8596_v13  ;;  %v8602_v23 = vld [vmem:[#allocation91_spill] sm:$0xff] }
 0x394   : > { %v4498_v41 = vpop.eup %4497  ;;  %v1511_v44 = vpop.xlane.xlu1 %1510 }
 0x395   : > { %v1514_v58 = vpop.xlane.xlu0 %1513  ;;  %v1610_v50 = vmul.f32 %v4498_v41, %v8597_v62  ;;  %v1611_v12 = vmul.f32 %v4498_v41, %v8598_v22  ;;  %4507 = vrcp.f32 %v1511_v44  ;;  %1672 = vst [vmem:[%s7389_s21 + $0xb0] sm:$0xff] %v1608_v34  ;;  %1673 = vst [vmem:[%s7389_s21 + $0xb8] sm:$0xff] %v1609_v27 }
 0x396   : > { %4509 = vrcp.f32 %v1514_v58  ;;  %v4500_v11 = vpop.eup %4499 }
 0x397   : > { %1674 = vst [vmem:[%s7389_s21 + $0xc0] sm:$0xff] %v1610_v50  ;;  %1675 = vst [vmem:[%s7389_s21 + $0xc8] sm:$0xff] %v1611_v12  ;;  %v1612_v2 = vmul.f32 %v4500_v11, %v6843_v54  ;;  %v1613_v51 = vmul.f32 %v4500_v11, %v6847_v60 }
 0x398   : > { %v4502_v30 = vpop.eup %4501  ;;  %v1517_v18 = vpop.xlane.xlu1 %1516 }
 0x399   : > { %v1520_v36 = vpop.xlane.xlu0 %1519  ;;  %v1614_v3 = vmul.f32 %v4502_v30, %v6851_v49  ;;  %v1615_v46 = vmul.f32 %v4502_v30, %v6857_v63  ;;  %4511 = vrcp.f32 %v1517_v18  ;;  %1676 = vst [vmem:[%s7389_s21 + $0xd0] sm:$0xff] %v1612_v2  ;;  %1677 = vst [vmem:[%s7389_s21 + $0xd8] sm:$0xff] %v1613_v51 }
 0x39a   : > { %4513 = vrcp.f32 %v1520_v36 }
 0x39b   : > { %v4504_v21 = vpop.eup %4503  ;;  %1678 = vst [vmem:[%s7389_s21 + $0xe0] sm:$0xff] %v1614_v3  ;;  %1679 = vst [vmem:[%s7389_s21 + $0xe8] sm:$0xff] %v1615_v46 }
 0x39c   : > { %v4506_v54 = vpop.eup %4505  ;;  %v1616_v60 = vmul.f32 %v4504_v21, %v6859_v19  ;;  %v1617_v8 = vmul.f32 %v4504_v21, %v6863_v53  ;;  %v1523_v32 = vpop.xlane.xlu1 %1522 }
 0x39d   : > { %v1526_v49 = vpop.xlane.xlu0 %1525  ;;  %v1618_v63 = vmul.f32 %v4506_v54, %v6866_v25  ;;  %v1619_v1 = vmul.f32 %v4506_v54, %v6874_v20  ;;  %4515 = vrcp.f32 %v1523_v32 }
 0x39e   : > { %1680 = vst [vmem:[%s7389_s21 + $0xf0] sm:$0xff] %v1616_v60  ;;  %1681 = vst [vmem:[%s7389_s21 + $0xf8] sm:$0xff] %v1617_v8  ;;  %4517 = vrcp.f32 %v1526_v49 }
 0x39f   : > { %v4508_v40 = vpop.eup %4507  ;;  %1682 = vst [vmem:[%s7389_s21 + $0x100] sm:$0xff] %v1618_v63  ;;  %1683 = vst [vmem:[%s7389_s21 + $0x108] sm:$0xff] %v1619_v1 }
 0x3a0   : > { %v4510_v19 = vpop.eup %4509  ;;  %v1620_v53 = vmul.f32 %v4508_v40, %v8599_v9  ;;  %v1621_v59 = vmul.f32 %v4508_v40, %v8600_v15  ;;  %v1529_v28 = vpop.xlane.xlu1 %1528 }
 0x3a1   : > { %v1532_v25 = vpop.xlane.xlu0 %1531  ;;  %v1622_v20 = vmul.f32 %v4510_v19, %v8601_v48  ;;  %v1623_v41 = vmul.f32 %v4510_v19, %v8602_v23  ;;  %4519 = vrcp.f32 %v1529_v28  ;;  %v4731_v48 = vld [vmem:[%s5064_s9 + $0x10] sm:$0xff] }
 0x3a2   : > { %1684 = vst [vmem:[%s7389_s21 + $0x110] sm:$0xff] %v1620_v53  ;;  %1685 = vst [vmem:[%s7389_s21 + $0x118] sm:$0xff] %v1621_v59  ;;  %4521 = vrcp.f32 %v1532_v25  ;;  %v4730_v53 = vld [vmem:[%s5064_s9 + $0x8] sm:$0xff] }
 0x3a3   : > { %v4512_v31 = vpop.eup %4511  ;;  %1686 = vst [vmem:[%s7389_s21 + $0x120] sm:$0xff] %v1622_v20  ;;  %1687 = vst [vmem:[%s7389_s21 + $0x128] sm:$0xff] %v1623_v41 }
 0x3a4   : > { %v4514_v34 = vpop.eup %4513  ;;  %v1624_v13 = vmul.f32 %v4512_v31, %v6901_v16  ;;  %v1625_v27 = vmul.f32 %v4512_v31, %v6905_v39  ;;  %v1535_v44 = vpop.xlane.xlu1 %1534 }
 0x3a5   : > { %v1538_v58 = vpop.xlane.xlu0 %1537  ;;  %v1626_v62 = vmul.f32 %v4514_v34, %v6913_v57  ;;  %v1627_v50 = vmul.f32 %v4514_v34, %v6924_v35  ;;  %4523 = vrcp.f32 %v1535_v44  ;;  %v4732_v34 = vld [vmem:[%s5064_s9 + $0x18] sm:$0xff] }
 0x3a6   : > { %1688 = vst [vmem:[%s7389_s21 + $0x130] sm:$0xff] %v1624_v13  ;;  %1689 = vst [vmem:[%s7389_s21 + $0x138] sm:$0xff] %v1625_v27  ;;  %4525 = vrcp.f32 %v1538_v58 }
 0x3a7   : > { %v4516_v22 = vpop.eup %4515  ;;  %1690 = vst [vmem:[%s7389_s21 + $0x140] sm:$0xff] %v1626_v62  ;;  %1691 = vst [vmem:[%s7389_s21 + $0x148] sm:$0xff] %v1627_v50  ;;  %v4733_v62 = vld [vmem:[%s5064_s9 + $0x20] sm:$0xff] }
 0x3a8   : > { %v4518_v16 = vpop.eup %4517  ;;  %v1628_v39 = vmul.f32 %v4516_v22, %v6935_v29  ;;  %v1629_v12 = vmul.f32 %v4516_v22, %v6937_v6  ;;  %v1541_v11 = vpop.xlane.xlu1 %1540 }
 0x3a9   : > { %v1544_v57 = vpop.xlane.xlu0 %1543  ;;  %v1630_v35 = vmul.f32 %v4518_v16, %v6941_v43  ;;  %v1631_v30 = vmul.f32 %v4518_v16, %v6947_v45  ;;  %4527 = vrcp.f32 %v1541_v11 }
 0x3aa   : > { %1692 = vst [vmem:[%s7389_s21 + $0x150] sm:$0xff] %v1628_v39  ;;  %1693 = vst [vmem:[%s7389_s21 + $0x158] sm:$0xff] %v1629_v12  ;;  %4529 = vrcp.f32 %v1544_v57  ;;  %v4734_v12 = vld [vmem:[%s5064_s9 + $0x28] sm:$0xff] }
 0x3ab   : > { %v4520_v2 = vpop.eup %4519  ;;  %1694 = vst [vmem:[%s7389_s21 + $0x160] sm:$0xff] %v1630_v35  ;;  %1695 = vst [vmem:[%s7389_s21 + $0x168] sm:$0xff] %v1631_v30 }
 0x3ac   : > { %v4522_v29 = vpop.eup %4521  ;;  %v1632_v6 = vmul.f32 %v4520_v2, %v6965_v55  ;;  %v1633_v51 = vmul.f32 %v4520_v2, %v6983_v47  ;;  %v1547_v18 = vpop.xlane.xlu1 %1546  ;;  %v4735_v2 = vld [vmem:[%s5064_s9 + $0x30] sm:$0xff] }
 0x3ad   : > { %v1550_v43 = vpop.xlane.xlu0 %1549  ;;  %v1634_v45 = vmul.f32 %v4522_v29, %v6988_v17  ;;  %v1635_v36 = vmul.f32 %v4522_v29, %v6997_v33  ;;  %4531 = vrcp.f32 %v1547_v18 }
 0x3ae   : > { %1696 = vst [vmem:[%s7389_s21 + $0x170] sm:$0xff] %v1632_v6  ;;  %1697 = vst [vmem:[%s7389_s21 + $0x178] sm:$0xff] %v1633_v51  ;;  %4533 = vrcp.f32 %v1550_v43  ;;  %v4736_v43 = vld [vmem:[%s5064_s9 + $0x38] sm:$0xff] }
 0x3af   : > { %v4524_v3 = vpop.eup %4523  ;;  %1698 = vst [vmem:[%s7389_s21 + $0x180] sm:$0xff] %v1634_v45  ;;  %1699 = vst [vmem:[%s7389_s21 + $0x188] sm:$0xff] %v1635_v36 }
 0x3b0   : > { %v4526_v55 = vpop.eup %4525  ;;  %v1636_v47 = vmul.f32 %v4524_v3, %v7001_v61  ;;  %v1637_v46 = vmul.f32 %v4524_v3, %v7020_v10  ;;  %v1553_v17 = vpop.xlane.xlu1 %1552 }
 0x3b1   : > { %v1638_v33 = vmul.f32 %v4526_v55, %v7029_v42  ;;  %v1639_v21 = vmul.f32 %v4526_v55, %v7045_v24  ;;  %4535 = vrcp.f32 %v1553_v17 }
 0x3b2   : > { %1700 = vst [vmem:[%s7389_s21 + $0x190] sm:$0xff] %v1636_v47  ;;  %1701 = vst [vmem:[%s7389_s21 + $0x198] sm:$0xff] %v1637_v46  ;;  %v4737_v47 = vld [vmem:[%s5064_s9 + $0x40] sm:$0xff] }
 0x3b3   : > { %v4528_v54 = vpop.eup %4527  ;;  %1702 = vst [vmem:[%s7389_s21 + $0x1a0] sm:$0xff] %v1638_v33  ;;  %1703 = vst [vmem:[%s7389_s21 + $0x1a8] sm:$0xff] %v1639_v21  ;;  %v4738_v21 = vld [vmem:[%s5064_s9 + $0x48] sm:$0xff] }
 0x3b4   : > { %v4530_v60 = vpop.eup %4529  ;;  %v1640_v61 = vmul.f32 %v4528_v54, %v7054_v4  ;;  %v1641_v10 = vmul.f32 %v4528_v54, %v7066_v7 }
 0x3b5   : > { %v1642_v42 = vmul.f32 %v4530_v60, %v7069_v52  ;;  %v1643_v24 = vmul.f32 %v4530_v60, %v7075_v56 }
 0x3b6   : > { %1704 = vst [vmem:[%s7389_s21 + $0x1b0] sm:$0xff] %v1640_v61  ;;  %1705 = vst [vmem:[%s7389_s21 + $0x1b8] sm:$0xff] %v1641_v10 }
 0x3b7   : > { %v4532_v8 = vpop.eup %4531  ;;  %1706 = vst [vmem:[%s7389_s21 + $0x1c0] sm:$0xff] %v1642_v42  ;;  %1707 = vst [vmem:[%s7389_s21 + $0x1c8] sm:$0xff] %v1643_v24  ;;  %v4739_v24 = vld [vmem:[%s5064_s9 + $0x50] sm:$0xff] }
 0x3b8   : > { %v4534_v32 = vpop.eup %4533  ;;  %v1644_v49 = vmul.f32 %v4532_v8, %v7092_v5  ;;  %v1645_v4 = vmul.f32 %v4532_v8, %v7104_v26 }
 0x3b9   : > { %v1646_v7 = vmul.f32 %v4534_v32, %v7110_v38  ;;  %v1647_v52 = vmul.f32 %v4534_v32, %v7123_v14  ;;  %v4729_v14 = vld [vmem:[%s5064_s9] sm:$0xff] }
 0x3ba   : > { %1708 = vst [vmem:[%s7389_s21 + $0x1d0] sm:$0xff] %v1644_v49  ;;  %1709 = vst [vmem:[%s7389_s21 + $0x1d8] sm:$0xff] %v1645_v4 }
 0x3bb   : > { %v4536_v56 = vpop.eup %4535  ;;  %1710 = vst [vmem:[%s7389_s21 + $0x1e0] sm:$0xff] %v1646_v7  ;;  %1711 = vst [vmem:[%s7389_s21 + $0x1e8] sm:$0xff] %v1647_v52  ;;  %v4740_v7 = vld [vmem:[%s5064_s9 + $0x58] sm:$0xff] }
 0x3bc   : > { %v1648_v63 = vmul.f32 %v4536_v56, %v7125_v37  ;;  %v1649_v1 = vmul.f32 %v4536_v56, %v7131_v0 }
 0x3be   : > { %1712 = vst [vmem:[%s7389_s21 + $0x1f0] sm:$0xff] %v1648_v63  ;;  %1713 = vst [vmem:[%s7389_s21 + $0x1f8] sm:$0xff] %v1649_v1 }
 0x3cd   : > { %v2712_v5 = vpop.f32.mrb[0].mxu1 }
 0x3ce   : > { %2871 = vst [vmem:[%s7518_s23] sm:$0xff] %v2712_v5  ;;  %v2903_v26 = vmul.f32 %v2712_v5, %v2712_v5  ;;  %v2714_v38 = vpop.f32.mrb[1].mxu1  ;;  %v3223_v40 = vmul.f32 %v4729_v14, %v2712_v5  ;;  %v4741_v5 = vld [vmem:[%s5064_s9 + $0x60] sm:$0xff] }
 0x3d0   : > { %2935 = vadd.xlane.f32.xlu0 %v2903_v26 }
 0x3d1   : > { %v2717_v37 = vpop.f32.mrb[2].mxu1 }
 0x3d2   : > { %2872 = vst [vmem:[%s7518_s23 + $0x8] sm:$0xff] %v2717_v37  ;;  %v2904_v0 = vmul.f32 %v2717_v37, %v2717_v37  ;;  %v2719_v19 = vpop.f32.mrb[3].mxu1  ;;  %v3224_v15 = vmul.f32 %v4730_v53, %v2717_v37  ;;  %v4742_v37 = vld [vmem:[%s5064_s9 + $0x68] sm:$0xff] }
 0x3d4   : > { %3255 = vadd.xlane.f32.xlu0 %v3223_v40  ;;  %2937 = vadd.xlane.f32.xlu1 %v2904_v0 }
 0x3d5   : > { %v2722_v9 = vpop.f32.mrb[4].mxu1 }
 0x3d6   : > { %2873 = vst [vmem:[%s7518_s23 + $0x10] sm:$0xff] %v2722_v9  ;;  %v2905_v59 = vmul.f32 %v2722_v9, %v2722_v9  ;;  %v2724_v28 = vpop.f32.mrb[5].mxu1  ;;  %v3225_v20 = vmul.f32 %v4731_v48, %v2722_v9 }
 0x3d8   : > { %2939 = vadd.xlane.f32.xlu0 %v2905_v59  ;;  %3257 = vadd.xlane.f32.xlu1 %v3224_v15  ;;  %v4743_v15 = vld [vmem:[%s5064_s9 + $0x70] sm:$0xff] }
 0x3d9   : > { %v2727_v25 = vpop.f32.mrb[6].mxu1 }
 0x3da   : > { %2874 = vst [vmem:[%s7518_s23 + $0x18] sm:$0xff] %v2727_v25  ;;  %v2906_v23 = vmul.f32 %v2727_v25, %v2727_v25  ;;  %v2729_v41 = vpop.f32.mrb[7].mxu1  ;;  %v3226_v13 = vmul.f32 %v4732_v34, %v2727_v25 }
 0x3dc   : > { %3259 = vadd.xlane.f32.xlu0 %v3225_v20  ;;  %2941 = vadd.xlane.f32.xlu1 %v2906_v23  ;;  %v4744_v20 = vld [vmem:[%s5064_s9 + $0x78] sm:$0xff] }
 0x3dd   : > { %v2732_v31 = vpop.f32.mrb[8].mxu1 }
 0x3de   : > { %2875 = vst [vmem:[%s7518_s23 + $0x20] sm:$0xff] %v2732_v31  ;;  %v2907_v27 = vmul.f32 %v2732_v31, %v2732_v31  ;;  %v2734_v44 = vpop.f32.mrb[9].mxu1  ;;  %v3227_v50 = vmul.f32 %v4733_v62, %v2732_v31 }
 0x3e0   : > { %2943 = vadd.xlane.f32.xlu0 %v2907_v27  ;;  %3261 = vadd.xlane.f32.xlu1 %v3226_v13 }
 0x3e1   : > { %v2737_v58 = vpop.f32.mrb[10].mxu1 }
 0x3e2   : > { %2876 = vst [vmem:[%s7518_s23 + $0x28] sm:$0xff] %v2737_v58  ;;  %v2908_v22 = vmul.f32 %v2737_v58, %v2737_v58  ;;  %v2739_v16 = vpop.f32.mrb[11].mxu1  ;;  %v3228_v11 = vmul.f32 %v4734_v12, %v2737_v58 }
 0x3e4   : > { %3263 = vadd.xlane.f32.xlu0 %v3227_v50  ;;  %2945 = vadd.xlane.f32.xlu1 %v2908_v22 }
 0x3e5   : > { %v2742_v39 = vpop.f32.mrb[12].mxu1 }
 0x3e6   : > { %2877 = vst [vmem:[%s7518_s23 + $0x30] sm:$0xff] %v2742_v39  ;;  %v2909_v57 = vmul.f32 %v2742_v39, %v2742_v39  ;;  %v2744_v35 = vpop.f32.mrb[13].mxu1  ;;  %v3229_v29 = vmul.f32 %v4735_v2, %v2742_v39 }
 0x3e8   : > { %2947 = vadd.xlane.f32.xlu0 %v2909_v57  ;;  %3265 = vadd.xlane.f32.xlu1 %v3228_v11 }
 0x3e9   : > { %v2747_v30 = vpop.f32.mrb[14].mxu1 }
 0x3ea   : > { %2878 = vst [vmem:[%s7518_s23 + $0x38] sm:$0xff] %v2747_v30  ;;  %v2910_v6 = vmul.f32 %v2747_v30, %v2747_v30  ;;  %v2749_v51 = vpop.f32.mrb[15].mxu1  ;;  %v3230_v45 = vmul.f32 %v4736_v43, %v2747_v30 }
 0x3ec   : > { %3267 = vadd.xlane.f32.xlu0 %v3229_v29  ;;  %2949 = vadd.xlane.f32.xlu1 %v2910_v6 }
 0x3ed   : > { %v2752_v18 = vpop.f32.mrb[16].mxu1 }
 0x3ee   : > { %2879 = vst [vmem:[%s7518_s23 + $0x40] sm:$0xff] %v2752_v18  ;;  %v2911_v36 = vmul.f32 %v2752_v18, %v2752_v18  ;;  %v2754_v3 = vpop.f32.mrb[17].mxu1  ;;  %v3231_v46 = vmul.f32 %v4737_v47, %v2752_v18 }
 0x3f0   : > { %2951 = vadd.xlane.f32.xlu0 %v2911_v36  ;;  %3269 = vadd.xlane.f32.xlu1 %v3230_v45 }
 0x3f1   : > { %v2757_v55 = vpop.f32.mrb[18].mxu1 }
 0x3f2   : > { %2880 = vst [vmem:[%s7518_s23 + $0x48] sm:$0xff] %v2757_v55  ;;  %v2912_v17 = vmul.f32 %v2757_v55, %v2757_v55  ;;  %v2759_v33 = vpop.f32.mrb[19].mxu1  ;;  %v3232_v54 = vmul.f32 %v4738_v21, %v2757_v55 }
 0x3f4   : > { %3271 = vadd.xlane.f32.xlu0 %v3231_v46  ;;  %2953 = vadd.xlane.f32.xlu1 %v2912_v17 }
 0x3f5   : > { %v2762_v60 = vpop.f32.mrb[20].mxu1 }
 0x3f6   : > { %2881 = vst [vmem:[%s7518_s23 + $0x50] sm:$0xff] %v2762_v60  ;;  %v2913_v61 = vmul.f32 %v2762_v60, %v2762_v60  ;;  %v2764_v10 = vpop.f32.mrb[21].mxu1  ;;  %v3233_v8 = vmul.f32 %v4739_v24, %v2762_v60 }
 0x3f8   : > { %3273 = vadd.xlane.f32.xlu1 %v3232_v54  ;;  %2955 = vadd.xlane.f32.xlu0 %v2913_v61 }
 0x3f9   : > { %v2767_v42 = vpop.f32.mrb[22].mxu1 }
 0x3fa   : > { %2882 = vst [vmem:[%s7518_s23 + $0x58] sm:$0xff] %v2767_v42  ;;  %v2914_v32 = vmul.f32 %v2767_v42, %v2767_v42  ;;  %v2769_v49 = vpop.f32.mrb[23].mxu1  ;;  %v3234_v52 = vmul.f32 %v4740_v7, %v2767_v42 }
 0x3fc   : > { %3275 = vadd.xlane.f32.xlu0 %v3233_v8  ;;  %2957 = vadd.xlane.f32.xlu1 %v2914_v32 }
 0x3fd   : > { %v2772_v4 = vpop.f32.mrb[24].mxu1 }
 0x3fe   : > { %2883 = vst [vmem:[%s7518_s23 + $0x60] sm:$0xff] %v2772_v4  ;;  %v2915_v56 = vmul.f32 %v2772_v4, %v2772_v4  ;;  %v2774_v63 = vpop.f32.mrb[25].mxu1  ;;  %v3235_v26 = vmul.f32 %v4741_v5, %v2772_v4 }
 0x3ff   : > { %v4745_v63 = vld [vmem:[%s5064_s9 + $0x80] sm:$0xff] }
 0x400   : > { %2959 = vadd.xlane.f32.xlu0 %v2915_v56  ;;  %3277 = vadd.xlane.f32.xlu1 %v3234_v52 }
 0x401   : > { %v2777_v1 = vpop.f32.mrb[26].mxu1 }
 0x402   : > { %2884 = vst [vmem:[%s7518_s23 + $0x68] sm:$0xff] %v2777_v1  ;;  %v2916_v38 = vmul.f32 %v2777_v1, %v2777_v1  ;;  %v2779_v14 = vpop.f32.mrb[27].mxu1  ;;  %v3236_v0 = vmul.f32 %v4742_v37, %v2777_v1 }
 0x404   : > { %3279 = vadd.xlane.f32.xlu0 %v3235_v26  ;;  %2961 = vadd.xlane.f32.xlu1 %v2916_v38  ;;  %v4746_v38 = vld [vmem:[%s5064_s9 + $0x88] sm:$0xff] }
 0x405   : > { %v2782_v40 = vpop.f32.mrb[28].mxu1 }
 0x406   : > { %2885 = vst [vmem:[%s7518_s23 + $0x70] sm:$0xff] %v2782_v40  ;;  %v2917_v19 = vmul.f32 %v2782_v40, %v2782_v40  ;;  %v2784_v9 = vpop.f32.mrb[29].mxu1  ;;  %v3237_v59 = vmul.f32 %v4743_v15, %v2782_v40  ;;  %v4747_v40 = vld [vmem:[%s5064_s9 + $0x90] sm:$0xff]  ;;  %v4750_v15 = vld [vmem:[%s5064_s9 + $0xa8] sm:$0xff] }
 0x407   : > { %v4749_v9 = vld [vmem:[%s5064_s9 + $0xa0] sm:$0xff] }
 0x408   : > { %3281 = vadd.xlane.f32.xlu1 %v3236_v0  ;;  %2963 = vadd.xlane.f32.xlu0 %v2917_v19  ;;  %v4748_v0 = vld [vmem:[%s5064_s9 + $0x98] sm:$0xff] }
 0x409   : > { %v2787_v53 = vpop.f32.mrb[30].mxu1 }
 0x40a   : > { %2886 = vst [vmem:[%s7518_s23 + $0x78] sm:$0xff] %v2787_v53  ;;  %v2918_v28 = vmul.f32 %v2787_v53, %v2787_v53  ;;  %v2789_v25 = vpop.f32.mrb[31].mxu1  ;;  %v3238_v23 = vmul.f32 %v4744_v20, %v2787_v53  ;;  %v4752_v20 = vld [vmem:[%s5064_s9 + $0xb8] sm:$0xff] }
 0x40c   : > { %3283 = vadd.xlane.f32.xlu0 %v3237_v59  ;;  %2965 = vadd.xlane.f32.xlu1 %v2918_v28  ;;  %v4751_v28 = vld [vmem:[%s5064_s9 + $0xb0] sm:$0xff] }
 0x40d   : > { %v7551_v48 = vpop.f32.mrb[32].mxu1 }
 0x40e   : > { %2887 = vst [vmem:[%s7518_s23 + $0x80] sm:$0xff] %v7551_v48  ;;  %v2919_v41 = vmul.f32 %v7551_v48, %v7551_v48  ;;  %v2794_v31 = vpop.f32.mrb[33].mxu1  ;;  %v3239_v1 = vmul.f32 %v4745_v63, %v7551_v48 }
 0x410   : > { %3285 = vadd.xlane.f32.xlu1 %v3238_v23  ;;  %2967 = vadd.xlane.f32.xlu0 %v2919_v41  ;;  %v4753_v41 = vld [vmem:[%s5064_s9 + $0xc0] sm:$0xff] }
 0x411   : > { %v7558_v34 = vpop.f32.mrb[34].mxu1 }
 0x412   : > { %2888 = vst [vmem:[%s7518_s23 + $0x88] sm:$0xff] %v7558_v34  ;;  %v2920_v13 = vmul.f32 %v7558_v34, %v7558_v34  ;;  %v2799_v27 = vpop.f32.mrb[35].mxu1  ;;  %v3240_v14 = vmul.f32 %v4746_v38, %v7558_v34 }
 0x414   : > { %2969 = vadd.xlane.f32.xlu1 %v2920_v13  ;;  %v4754_v13 = vld [vmem:[%s5064_s9 + $0xc8] sm:$0xff] }
 0x415   : > { %v7564_v44 = vpop.f32.mrb[36].mxu1 }
 0x416   : > { %2889 = vst [vmem:[%s7518_s23 + $0x90] sm:$0xff] %v7564_v44  ;;  %v2921_v58 = vmul.f32 %v7564_v44, %v7564_v44  ;;  %v2804_v62 = vpop.f32.mrb[37].mxu1  ;;  %v3241_v37 = vmul.f32 %v4747_v40, %v7564_v44  ;;  %v4755_v44 = vld [vmem:[%s5064_s9 + $0xd0] sm:$0xff] }
 0x418   : > { %2971 = vadd.xlane.f32.xlu0 %v2921_v58 }
 0x419   : > { %v7570_v50 = vpop.f32.mrb[38].mxu1 }
 0x41a   : > { %2890 = vst [vmem:[%s7518_s23 + $0x98] sm:$0xff] %v7570_v50  ;;  %v2922_v22 = vmul.f32 %v7570_v50, %v7570_v50  ;;  %v2809_v16 = vpop.f32.mrb[39].mxu1  ;;  %v3242_v19 = vmul.f32 %v4748_v0, %v7570_v50  ;;  %v4756_v50 = vld [vmem:[%s5064_s9 + $0xd8] sm:$0xff] }
 0x41b   : > { %v4757_v16 = vld [vmem:[%s5064_s9 + $0xe0] sm:$0xff] }
 0x41c   : > { %2973 = vadd.xlane.f32.xlu1 %v2922_v22 }
 0x41d   : > { %v7576_v39 = vpop.f32.mrb[40].mxu1 }
 0x41e   : > { %2891 = vst [vmem:[%s7518_s23 + $0xa0] sm:$0xff] %v7576_v39  ;;  %v2923_v12 = vmul.f32 %v7576_v39, %v7576_v39  ;;  %v2814_v11 = vpop.f32.mrb[41].mxu1  ;;  %v3243_v53 = vmul.f32 %v4749_v9, %v7576_v39 }
 0x420   : > { %2975 = vadd.xlane.f32.xlu0 %v2923_v12 }
 0x421   : > { %v7582_v57 = vpop.f32.mrb[42].mxu1 }
 0x422   : > { %2892 = vst [vmem:[%s7518_s23 + $0xa8] sm:$0xff] %v7582_v57  ;;  %v2924_v35 = vmul.f32 %v7582_v57, %v7582_v57  ;;  %v2819_v30 = vpop.f32.mrb[43].mxu1  ;;  %v3244_v59 = vmul.f32 %v4750_v15, %v7582_v57 }
 0x424   : > { %2977 = vadd.xlane.f32.xlu1 %v2924_v35 }
 0x425   : > { %v7588_v2 = vpop.f32.mrb[44].mxu1 }
 0x426   : > { %2893 = vst [vmem:[%s7518_s23 + $0xb0] sm:$0xff] %v7588_v2  ;;  %v2925_v29 = vmul.f32 %v7588_v2, %v7588_v2  ;;  %v2824_v6 = vpop.f32.mrb[45].mxu1  ;;  %v3245_v25 = vmul.f32 %v4751_v28, %v7588_v2  ;;  %v4758_v2 = vld [vmem:[%s5064_s9 + $0xe8] sm:$0xff] }
 0x427   : > { %v4759_v6 = vld [vmem:[%s5064_s9 + $0xf0] sm:$0xff] }
 0x428   : > { %2979 = vadd.xlane.f32.xlu0 %v2925_v29 }
 0x429   : > { %v7594_v51 = vpop.f32.mrb[46].mxu1 }
 0x42a   : > { %2894 = vst [vmem:[%s7518_s23 + $0xb8] sm:$0xff] %v7594_v51  ;;  %v2926_v18 = vmul.f32 %v7594_v51, %v7594_v51  ;;  %v2829_v43 = vpop.f32.mrb[47].mxu1  ;;  %v3246_v23 = vmul.f32 %v4752_v20, %v7594_v51 }
 0x42c   : > { %2981 = vadd.xlane.f32.xlu1 %v2926_v18 }
 0x42d   : > { %v7600_v45 = vpop.f32.mrb[48].mxu1 }
 0x42e   : > { %2895 = vst [vmem:[%s7518_s23 + $0xc0] sm:$0xff] %v7600_v45  ;;  %v2927_v36 = vmul.f32 %v7600_v45, %v7600_v45  ;;  %v2834_v3 = vpop.f32.mrb[49].mxu1  ;;  %v3247_v31 = vmul.f32 %v4753_v41, %v7600_v45  ;;  %v8607_v41 = vld [vmem:[#allocation31_spill] sm:$0xff] }
 0x430   : > { %2983 = vadd.xlane.f32.xlu0 %v2927_v36 }
 0x431   : > { %v7606_v55 = vpop.f32.mrb[50].mxu1 }
 0x432   : > { %2896 = vst [vmem:[%s7518_s23 + $0xc8] sm:$0xff] %v7606_v55  ;;  %v2928_v47 = vmul.f32 %v7606_v55, %v7606_v55  ;;  %v2839_v46 = vpop.f32.mrb[51].mxu1  ;;  %v3248_v27 = vmul.f32 %v4754_v13, %v7606_v55  ;;  %v8603_v55 = vld [vmem:[#allocation28_spill] sm:$0xff] }
 0x434   : > { %2985 = vadd.xlane.f32.xlu1 %v2928_v47  ;;  %v3351_v47 = vmax.f32 %v8603_v55, 1e-08  ;;  %v8609_v55 = vld [vmem:[#allocation33_spill] sm:$0xff] }
 0x435   : > { %v7612_v17 = vpop.f32.mrb[52].mxu1 }
 0x436   : > { %2897 = vst [vmem:[%s7518_s23 + $0xd0] sm:$0xff] %v7612_v17  ;;  %v2929_v33 = vmul.f32 %v7612_v17, %v7612_v17  ;;  %v2844_v21 = vpop.f32.mrb[53].mxu1  ;;  %v3249_v58 = vmul.f32 %v4755_v44, %v7612_v17  ;;  %v4760_v17 = vld [vmem:[%s5064_s9 + $0xf8] sm:$0xff]  ;;  %s3568_s9 = sshll.u32 %s7389_s21, 4  ;;  %s7741_s9 = int_to_ptr.vmem [resolvable:$true] %s3568_s9 }
 0x437   : > { %s4761_s21 = scalar_lea.vmem %s7741_s9, 8192  ;;  %p4768_p0 = scmp.lt.s32.totalorder %s7741_s9, %s4766_s18 }
 0x438   : > { %2987 = vadd.xlane.f32.xlu0 %v2929_v33  ;;  %p4762_p11 = scmp.ne.s32.totalorder %s7741_s9, %s4761_s21  ;;  %p4769_p1 = scmp.lt.s32.totalorder %s4767_s8, %s4761_s21 }
 0x439   : > { %v7618_v54 = vpop.f32.mrb[54].mxu1 }
 0x43a   : > { %2898 = vst [vmem:[%s7518_s23 + $0xd8] sm:$0xff] %v7618_v54  ;;  %v2930_v60 = vmul.f32 %v7618_v54, %v7618_v54  ;;  %v2849_v61 = vpop.f32.mrb[55].mxu1  ;;  %v3250_v22 = vmul.f32 %v4756_v50, %v7618_v54  ;;  %p4763_p12 = pnand %p4762_p11, %p5008_p5  ;;  %p4770_p2 = por %p4769_p1, %p4768_p0 }
 0x43c   : > { %2989 = vadd.xlane.f32.xlu1 %v2930_v60  ;;  %p4764_p13 = pneg %p4763_p12 }
 0x43d   : > { %v2852_v10 = vpop.f32.mrb[56].mxu1 }
 0x43e   : > { %2899 = vst [vmem:[%s7518_s23 + $0xe0] sm:$0xff] %v2852_v10  ;;  %v2931_v42 = vmul.f32 %v2852_v10, %v2852_v10  ;;  %v2854_v24 = vpop.f32.mrb[57].mxu1  ;;  %v3251_v39 = vmul.f32 %v4757_v16, %v2852_v10  ;;  %p4771_p3 = pnand %p4770_p2, %p4764_p13 }
 0x440   : > { %2991 = vadd.xlane.f32.xlu0 %v2931_v42 }
 0x441   : > { %v7625_v8 = vpop.f32.mrb[58].mxu1 }
 0x442   : > { %2900 = vst [vmem:[%s7518_s23 + $0xe8] sm:$0xff] %v7625_v8  ;;  %v2932_v32 = vmul.f32 %v7625_v8, %v7625_v8  ;;  %v2859_v49 = vpop.f32.mrb[59].mxu1  ;;  %v3252_v29 = vmul.f32 %v4758_v2, %v7625_v8 }
 0x443   : > { %v8604_v49 = vld [vmem:[#allocation29_spill] sm:$0xff] }
 0x444   : > { %2993 = vadd.xlane.f32.xlu1 %v2932_v32 }
 0x445   : > { %v7631_v4 = vpop.f32.mrb[60].mxu1 }
 0x446   : > { %2901 = vst [vmem:[%s7518_s23 + $0xf0] sm:$0xff] %v7631_v4  ;;  %v2933_v7 = vmul.f32 %v7631_v4, %v7631_v4  ;;  %v2864_v52 = vpop.f32.mrb[61].mxu1  ;;  %v3253_v51 = vmul.f32 %v4759_v6, %v7631_v4  ;;  %v3352_v4 = vmax.f32 %v8604_v49, 1e-08 }
 0x448   : > { %2995 = vadd.xlane.f32.xlu0 %v2933_v7 }
 0x449   : > { %v7637_v56 = vpop.f32.mrb[62].mxu1 }
 0x44a   : > { %2902 = vst [vmem:[%s7518_s23 + $0xf8] sm:$0xff] %v7637_v56  ;;  %v2934_v5 = vmul.f32 %v7637_v56, %v7637_v56  ;;  %v2869_v26 = vpop.f32.mrb[63].mxu1  ;;  %v3254_v33 = vmul.f32 %v4760_v17, %v7637_v56 }
 0x44c   : > { %3287 = vadd.xlane.f32.xlu0 %v3239_v1  ;;  %2997 = vadd.xlane.f32.xlu1 %v2934_v5 }
 0x450   : > { %3291 = vadd.xlane.f32.xlu0 %v3241_v37  ;;  %3289 = vadd.xlane.f32.xlu1 %v3240_v14  ;;  %v8605_v37 = vld [vmem:[#allocation30_spill] sm:$0xff] }
 0x451   : > { %v3353_v0 = vmax.f32 %v8605_v37, 1e-08 }
 0x454   : > { %3295 = vadd.xlane.f32.xlu0 %v3243_v53  ;;  %3293 = vadd.xlane.f32.xlu1 %v3242_v19 }
 0x458   : > { %3299 = vadd.xlane.f32.xlu0 %v3245_v25  ;;  %3297 = vadd.xlane.f32.xlu1 %v3244_v59 }
 0x45c   : > { %3303 = vadd.xlane.f32.xlu0 %v3247_v31  ;;  %3301 = vadd.xlane.f32.xlu1 %v3246_v23  ;;  %v3354_v31 = vmax.f32 %v8607_v41, 1e-08 }
 0x45d   : > { %v2936_v48 = vpop.xlane.xlu0 %2935 }
 0x45e   : > { %4537 = vrsqrt.f32 %v2936_v48  ;;  %vm3001_vm5 = vcmp.eq.f32.partialorder %v2936_v48, inf  ;;  %v3004_v30 = vand.u32 2147483648, %v2936_v48  ;;  %vm3003_vm6 = vcmp.eq.f32.partialorder %v2936_v48, 0.0 }
 0x460   : > { %3307 = vadd.xlane.f32.xlu0 %v3249_v58  ;;  %3305 = vadd.xlane.f32.xlu1 %v3248_v27 }
 0x461   : > { %v7661_v34 = vpop.xlane.xlu0 %3255  ;;  %v2938_v62 = vpop.xlane.xlu1 %2937 }
 0x462   : > { %4539 = vrsqrt.f32 %v2938_v62  ;;  %vm3008_vm7 = vcmp.eq.f32.partialorder %v2938_v62, inf  ;;  %v3011_v10 = vand.u32 2147483648, %v2938_v62  ;;  %vm3010_vm8 = vcmp.eq.f32.partialorder %v2938_v62, 0.0 }
 0x464   : > { %3311 = vadd.xlane.f32.xlu0 %v3251_v39  ;;  %3309 = vadd.xlane.f32.xlu1 %v3250_v22  ;;  %v8608_v39 = vld [vmem:[#allocation32_spill] sm:$0xff] }
 0x465   : > { %v7670_v11 = vpop.xlane.xlu1 %3257  ;;  %v2940_v57 = vpop.xlane.xlu0 %2939 }
 0x466   : > { %4541 = vrsqrt.f32 %v2940_v57  ;;  %vm3015_vm9 = vcmp.eq.f32.partialorder %v2940_v57, inf  ;;  %v3018_v63 = vand.u32 2147483648, %v2940_v57  ;;  %vm3017_vm10 = vcmp.eq.f32.partialorder %v2940_v57, 0.0 }
 0x468   : > { %v4538_v12 = vpop.eup %4537  ;;  %3315 = vadd.xlane.f32.xlu0 %v3253_v51  ;;  %3313 = vadd.xlane.f32.xlu1 %v3252_v29 }
 0x469   : > { %v3000_v35 = vmul.f32 %v4538_v12, %v2936_v48  ;;  %v2942_v45 = vpop.xlane.xlu1 %2941  ;;  %v7676_v36 = vpop.xlane.xlu0 %3259  ;;  %v3355_v12 = vmax.f32 %v8608_v39, 1e-08 }
 0x46a   : > { %4543 = vrsqrt.f32 %v2942_v45  ;;  %vm3022_vm11 = vcmp.eq.f32.partialorder %v2942_v45, inf  ;;  %v3025_v53 = vand.u32 2147483648, %v2942_v45  ;;  %vm3024_vm12 = vcmp.eq.f32.partialorder %v2942_v45, 0.0 }
 0x46b   : > { %v3002_v18 = vsel %vm3001_vm5, %v2936_v48, %v3000_v35 }
 0x46c   : > { %v3005_v43 = vsel %vm3003_vm6, %v3004_v30, %v3002_v18  ;;  %v4540_v46 = vpop.eup %4539  ;;  %3317 = vadd.xlane.f32.xlu1 %v3254_v33 }
 0x46d   : > { %v3319_v3 = vmax.f32 %v3005_v43, 1e-08  ;;  %v3007_v54 = vmul.f32 %v4540_v46, %v2938_v62  ;;  %v7681_v60 = vpop.xlane.xlu1 %3261  ;;  %v2944_v61 = vpop.xlane.xlu0 %2943 }
 0x46e   : > { %vm3029_vm13 = vcmp.eq.f32.partialorder %v2944_v61, inf  ;;  %vm3031_vm14 = vcmp.eq.f32.partialorder %v2944_v61, 0.0 }
 0x46f   : > { %v3383_v21 = vmul.f32 %v3351_v47, %v3319_v3  ;;  %v3009_v42 = vsel %vm3008_vm7, %v2938_v62, %v3007_v54  ;;  %v3032_v62 = vand.u32 2147483648, %v2944_v61  ;;  %v3356_v47 = vmax.f32 %v8609_v55, 1e-08 }
 0x470   : > { %v4542_v24 = vpop.eup %4541  ;;  %v3012_v8 = vsel %vm3010_vm8, %v3011_v10, %v3009_v42 }
 0x471   : > { %4545 = vrcp.f32 %v3383_v21  ;;  %v3320_v32 = vmax.f32 %v3012_v8, 1e-08  ;;  %v3014_v7 = vmul.f32 %v4542_v24, %v2940_v57  ;;  %v2946_v52 = vpop.xlane.xlu1 %2945  ;;  %v7684_v56 = vpop.xlane.xlu0 %3263 }
 0x472   : > { %4547 = vrsqrt.f32 %v2944_v61  ;;  %vm3036_vm15 = vcmp.eq.f32.partialorder %v2946_v52, inf  ;;  %v3039_v30 = vand.u32 2147483648, %v2946_v52  ;;  %vm3038_vm1 = vcmp.eq.f32.partialorder %v2946_v52, 0.0 }
 0x473   : > { %4549 = vrsqrt.f32 %v2946_v52  ;;  %v3384_v1 = vmul.f32 %v3352_v4, %v3320_v32  ;;  %v3016_v5 = vsel %vm3015_vm9, %v2940_v57, %v3014_v7 }
 0x474   : > { %v4544_v26 = vpop.eup %4543  ;;  %v3019_v38 = vsel %vm3017_vm10, %v3018_v63, %v3016_v5 }
 0x475   : > { %4551 = vrcp.f32 %v3384_v1  ;;  %v3021_v14 = vmul.f32 %v4544_v26, %v2942_v45  ;;  %v3321_v40 = vmax.f32 %v3019_v38, 1e-08  ;;  %v7687_v19 = vpop.xlane.xlu1 %3265  ;;  %v7689_v9 = vpop.xlane.xlu0 %2947 }
 0x476   : > { %4553 = vrsqrt.f32 %v7689_v9  ;;  %vm3043_vm2 = vcmp.eq.f32.partialorder %v7689_v9, inf  ;;  %vm3045_vm3 = vcmp.eq.f32.partialorder %v7689_v9, 0.0 }
 0x477   : > { %v3023_v15 = vsel %vm3022_vm11, %v2942_v45, %v3021_v14  ;;  %v3385_v59 = vmul.f32 %v3353_v0, %v3321_v40 }
 0x478   : > { %v3026_v25 = vsel %vm3024_vm12, %v3025_v53, %v3023_v15 }
 0x479   : > { %4555 = vrcp.f32 %v3385_v59  ;;  %v3322_v23 = vmax.f32 %v3026_v25, 1e-08  ;;  %v7700_v13 = vpop.xlane.xlu1 %2949  ;;  %v7702_v27 = vpop.xlane.xlu0 %3267 }
 0x47a   : > { %4557 = vrsqrt.f32 %v7700_v13 }
 0x47b   : > { %v4546_v28 = vpop.eup %4545  ;;  %v3386_v58 = vmul.f32 %v3354_v31, %v3322_v23 }
 0x47c   : > { %v4548_v48 = vpop.eup %4547  ;;  %v3447_v20 = vmul.f32 %v4546_v28, %v7661_v34 }
 0x47d   : > { %v3028_v44 = vmul.f32 %v4548_v48, %v2944_v61  ;;  %v4550_v50 = vpop.eup %4549  ;;  %4559 = vrcp.f32 %v3386_v58  ;;  %v7708_v57 = vpop.xlane.xlu1 %3269 }
 0x47e   : > { %3479 = vst.msk [vmem:[%s7696_s13] sm:$0xff] %vm2357_vm0, %v3447_v20  ;;  %v3035_v16 = vmul.f32 %v4550_v50, %v2946_v52  ;;  %v7710_v35 = vpop.xlane.xlu0 %2951 }
 0x47f   : > { %v3030_v34 = vsel %vm3029_vm13, %v2944_v61, %v3028_v44  ;;  %4561 = vrsqrt.f32 %v7710_v35  ;;  %v4552_v29 = vpop.eup %4551 }
 0x480   : > { %v3033_v22 = vsel %vm3031_vm14, %v3032_v62, %v3030_v34  ;;  %v3037_v6 = vsel %vm3036_vm15, %v2946_v52, %v3035_v16  ;;  %v4554_v51 = vpop.eup %4553  ;;  %v3448_v18 = vmul.f32 %v4552_v29, %v7670_v11  ;;  %v3046_v11 = vand.u32 2147483648, %v7689_v9 }
 0x481   : > { %v3323_v2 = vmax.f32 %v3033_v22, 1e-08  ;;  %v3040_v43 = vsel %vm3038_vm1, %v3039_v30, %v3037_v6  ;;  %v3042_v46 = vmul.f32 %v4554_v51, %v7689_v9  ;;  %v7726_v17 = vpop.xlane.xlu1 %2953 }
 0x482   : > { %v3324_v3 = vmax.f32 %v3040_v43, 1e-08  ;;  %v7728_v33 = vpop.xlane.xlu0 %3271  ;;  %3480 = vst.msk [vmem:[%s7696_s13 + $0x8] sm:$0xff] %vm2357_vm0, %v3448_v18 }
 0x483   : > { %v3387_v45 = vmul.f32 %v3355_v12, %v3323_v2  ;;  %v4556_v21 = vpop.eup %4555  ;;  %v3044_v61 = vsel %vm3043_vm2, %v7689_v9, %v3042_v46 }
 0x484   : > { %v3388_v54 = vmul.f32 %v3356_v47, %v3324_v3 }
 0x485   : > { %4563 = vrcp.f32 %v3387_v45 }
 0x486   : > { %4565 = vrsqrt.f32 %v7726_v17 }
 0x487   : > { %4774 = shalt.err (!%p4771_p3)
}
 0x488   : > { %s4775_s17 = scalar_lea.hbm %s7722_s22, 8192  ;;  %s4779_s16 = scalar_lea.hbm %s8133_s3, 16384 }
 0x489   : > { %p4776_p4 = scmp.ne.s32.totalorder %s7722_s22, %s4775_s17  ;;  %p4780_p9 = scmp.lt.u32.totalorder %s7722_s22, %s8133_s3 }
 0x48a   : > { %p4781_p10 = scmp.lt.u32.totalorder %s4779_s16, %s4775_s17  ;;  %p4783_p12 = scmp.lt.u32.totalorder %s4775_s17, %s7722_s22 }
 0x48b   : > { %p4777_p7 = pnand %p4776_p4, %p5008_p5 }
 0x48c   : > { %p4782_p11 = por %p4781_p10, %p4780_p9 }
 0x48d   : > { %p4778_p8 = pneg %p4777_p7 }
 0x48e   : > { %p4784_p13 = por %p4783_p12, %p4782_p11 }
 0x490   : > { %p4785_p0 = pnand %p4784_p13, %p4778_p8 }
 0x492   : > { %4788 = shalt.err (!%p4785_p0)
}
 0x493   : > { %s4921_s21 = smov 256   ;;  %s4922_s1 = smov 16   ;;  %v4558_v10 = vpop.eup %4557  ;;  %v3449_v42 = vmul.f32 %v4556_v21, %v7676_v36  ;;  %v3047_v24 = vsel %vm3045_vm3, %v3046_v11, %v3044_v61  ;;  %4567 = vrcp.f32 %v3388_v54  ;;  %v8610_v49 = vld [vmem:[#allocation34_spill] sm:$0xff]  ;;  %v7785_v7 = vpop.xlane.xlu1 %3273  ;;  %vm3050_vm4 = vcmp.eq.f32.partialorder %v7700_v13, inf }
 0x494   : > { %4157 = dma.vmem_to_hbm [thread:$0]  (%p5008_p5), %s7741_s9, 8192, %s7722_s22, %s7746_s29, %s4921_s21, %s4921_s21, %s4922_s1   ;;  %v3049_v8 = vmul.f32 %v4558_v10, %v7700_v13  ;;  %v3325_v32 = vmax.f32 %v3047_v24, 1e-08  ;;  %v3357_v4 = vmax.f32 %v8610_v49, 1e-08  ;;  %v3053_v36 = vand.u32 2147483648, %v7700_v13 }
 0x495   : > { %s7780_s8 = scalar_lea.hbm %s8132_s2, %s7715_s15  ;;  %s3551_s17 = sshll.u32 %s5425_s14, 4  ;;  %3481 = vst.msk [vmem:[%s7696_s13 + $0x10] sm:$0xff] %vm2357_vm0, %v3449_v42  ;;  %s7787_s17 = int_to_ptr.vmem [resolvable:$true] %s3551_s17 }
 0x496   : > { %s4789_s15 = scalar_lea.vmem %s7787_s17, 8192  ;;  %s4923_s9 = smov [#allocation2]  }
 0x497   : > { %p4790_p1 = scmp.ne.s32.totalorder %s7787_s17, %s4789_s15  ;;  %s4793_s16 = sshll.u32 %s4923_s9, 4  ;;  %s4794_s16 = int_to_ptr.vmem [resolvable:$false] %s4793_s16 }
 0x498   : > { %s4795_s18 = scalar_lea.vmem %s4794_s16, 16384  ;;  %p4796_p4 = scmp.lt.s32.totalorder %s7787_s17, %s4794_s16 }
 0x499   : > { %p4791_p2 = pnand %p4790_p1, %p5008_p5  ;;  %p4797_p7 = scmp.lt.s32.totalorder %s4795_s18, %s4789_s15 }
 0x49b   : > { %p4792_p3 = pneg %p4791_p2  ;;  %p4798_p8 = por %p4797_p7, %p4796_p4 }
 0x49d   : > { %p4799_p9 = pnand %p4798_p8, %p4792_p3 }
 0x49f   : > { %4802 = shalt.err (!%p4799_p9)
}
 0x4a0   : > { %s4803_s5 = scalar_lea.hbm %s7780_s8, 8192  ;;  %s4807_s9 = scalar_lea.hbm %s8132_s2, 16384 }
 0x4a1   : > { %p4804_p10 = scmp.ne.s32.totalorder %s7780_s8, %s4803_s5  ;;  %p4808_p13 = scmp.lt.u32.totalorder %s7780_s8, %s8132_s2 }
 0x4a2   : > { %p4809_p0 = scmp.lt.u32.totalorder %s4807_s9, %s4803_s5  ;;  %p4811_p2 = scmp.lt.u32.totalorder %s4803_s5, %s7780_s8 }
 0x4a3   : > { %p4805_p11 = pnand %p4804_p10, %p5008_p5 }
 0x4a4   : > { %p4810_p1 = por %p4809_p0, %p4808_p13 }
 0x4a5   : > { %p4806_p12 = pneg %p4805_p11 }
 0x4a6   : > { %p4812_p3 = por %p4811_p2, %p4810_p1 }
 0x4a8   : > { %p4813_p4 = pnand %p4812_p3, %p4806_p12 }
 0x4aa   : > { %4816 = shalt.err (!%p4813_p4)
}
 0x4ab   : > { %s8611_s15 = scalar_lea.sflag [#allocation3], %s5397_s19  ;;  %v4560_v52 = vpop.eup %4559  ;;  %v3051_v63 = vsel %vm3050_vm4, %v7700_v13, %v3049_v8  ;;  %vm3052_vm5 = vcmp.eq.f32.partialorder %v7700_v13, 0.0  ;;  %v3389_v1 = vmul.f32 %v3357_v4, %v3325_v32  ;;  %v7825_v5 = vpop.xlane.xlu0 %2955  ;;  %s8612_s22 = sshll.u32 %s6928_s20, 4  ;;  %s7829_s22 = int_to_ptr.vmem [resolvable:$true] %s8612_s22 }
 0x4ac   : > { %4156 = dma.vmem_to_hbm [thread:$0]  (%p5008_p5), %s7787_s17, 8192, %s7780_s8, %s8611_s15, %s4921_s21, %s4921_s21, %s4922_s1   ;;  %v4562_v26 = vpop.eup %4561  ;;  %v3450_v38 = vmul.f32 %v4560_v52, %v7681_v60  ;;  %v3054_v14 = vsel %vm3052_vm5, %v3053_v36, %v3051_v63  ;;  %4569 = vrsqrt.f32 %v7825_v5 }
 0x4ad   : > { %s4817_s8 = scalar_lea.vmem %s7829_s22, 8192  ;;  %s4924_s17 = smov [#allocation6]  }
 0x4ae   : > { %p4818_p7 = scmp.ne.s32.totalorder %s7829_s22, %s4817_s8  ;;  %s4821_s14 = sshll.u32 %s4924_s17, 4  ;;  %s4822_s14 = int_to_ptr.vmem [resolvable:$false] %s4821_s14 }
 0x4af   : > { %s4823_s20 = scalar_lea.vmem %s4822_s14, 16384  ;;  %p4824_p10 = scmp.lt.s32.totalorder %s7829_s22, %s4822_s14 }
 0x4b0   : > { %p4819_p8 = pnand %p4818_p7, %p5008_p5  ;;  %p4825_p11 = scmp.lt.s32.totalorder %s4823_s20, %s4817_s8 }
 0x4b2   : > { %p4820_p9 = pneg %p4819_p8  ;;  %p4826_p12 = por %p4825_p11, %p4824_p10 }
 0x4b4   : > { %p4827_p13 = pnand %p4826_p12, %p4820_p9 }
 0x4b6   : > { %4830 = shalt.err (!%p4827_p13)
}
 0x4b7   : > { %s4831_s18 = scalar_lea.hbm %s7735_s0, 8192  ;;  %s4835_s9 = scalar_lea.hbm %s8134_s4, 16384 }
 0x4b8   : > { %p4832_p0 = scmp.ne.s32.totalorder %s7735_s0, %s4831_s18  ;;  %p4836_p3 = scmp.lt.u32.totalorder %s7735_s0, %s8134_s4 }
 0x4b9   : > { %p4837_p4 = scmp.lt.u32.totalorder %s4835_s9, %s4831_s18  ;;  %p4839_p8 = scmp.lt.u32.totalorder %s4831_s18, %s7735_s0 }
 0x4ba   : > { %p4833_p1 = pnand %p4832_p0, %p5008_p5 }
 0x4bb   : > { %p4838_p7 = por %p4837_p4, %p4836_p3 }
 0x4bc   : > { %p4834_p2 = pneg %p4833_p1 }
 0x4bd   : > { %p4840_p9 = por %p4839_p8, %p4838_p7 }
 0x4bf   : > { %p4841_p10 = pnand %p4840_p9, %p4834_p2 }
 0x4c1   : > { %4844 = shalt.err (!%p4841_p10)
}
 0x4c2   : > { %4158 = dma.vmem_to_hbm [thread:$0]  (%p5008_p5), %s7829_s22, 8192, %s7735_s0, %s7746_s29, %s4921_s21, %s4921_s21, %s4922_s1   ;;  %4571 = vrcp.f32 %v3389_v1  ;;  %v3326_v60 = vmax.f32 %v3054_v14, 1e-08  ;;  %v8613_v40 = vld [vmem:[#allocation35_spill] sm:$0xff]  ;;  %v3056_v0 = vmul.f32 %v4562_v26, %v7710_v35  ;;  %vm3057_vm6 = vcmp.eq.f32.partialorder %v7710_v35, inf  ;;  %v7875_v59 = vpop.xlane.xlu1 %2957  ;;  %v7877_v28 = vpop.xlane.xlu0 %3275 }
 0x4c3   : > { %v3358_v37 = vmax.f32 %v8613_v40, 1e-08  ;;  %s3979_s8 = sshll.u32 %s4989_s28, 12  ;;  %s3605_s17 = sshll.u32 %s7518_s23, 4  ;;  %3482 = vst.msk [vmem:[%s7696_s13 + $0x18] sm:$0xff] %vm2357_vm0, %v3450_v38  ;;  %v3060_v9 = vand.u32 2147483648, %v7710_v35  ;;  %v4564_v25 = vpop.eup %4563  ;;  %4573 = vrsqrt.f32 %v7875_v59  ;;  %s7871_s17 = int_to_ptr.vmem [resolvable:$true] %s3605_s17 }
 0x4c4   : > { %s7869_s0 = scalar_lea.hbm %s8136_s6, %s3979_s8  ;;  %v3058_v15 = vsel %vm3057_vm6, %v7710_v35, %v3056_v0  ;;  %vm3059_vm7 = vcmp.eq.f32.partialorder %v7710_v35, 0.0  ;;  %s3532_s28 = scalar_lea.sflag [#allocation8], %s5397_s19 }
 0x4c5   : > { %v3390_v53 = vmul.f32 %v3358_v37, %v3326_v60  ;;  %v3061_v48 = vsel %vm3059_vm7, %v3060_v9, %v3058_v15  ;;  %s4845_s23 = scalar_lea.vmem %s7871_s17, 4096  ;;  %s4925_s29 = smov [#allocation7]  }
 0x4c6   : > { %p4846_p11 = scmp.ne.s32.totalorder %s7871_s17, %s4845_s23  ;;  %s4849_s21 = sshll.u32 %s4925_s29, 4  ;;  %s4850_s21 = int_to_ptr.vmem [resolvable:$false] %s4849_s21 }
 0x4c7   : > { %s4851_s1 = scalar_lea.vmem %s4850_s21, 8192  ;;  %p4852_p0 = scmp.lt.s32.totalorder %s7871_s17, %s4850_s21 }
 0x4c8   : > { %p4847_p12 = pnand %p4846_p11, %p5008_p5  ;;  %p4853_p1 = scmp.lt.s32.totalorder %s4851_s1, %s4845_s23 }
 0x4ca   : > { %p4848_p13 = pneg %p4847_p12  ;;  %p4854_p2 = por %p4853_p1, %p4852_p0 }
 0x4cc   : > { %p4855_p3 = pnand %p4854_p2, %p4848_p13 }
 0x4ce   : > { %4858 = shalt.err (!%p4855_p3)
}
 0x4cf   : > { %s4859_s22 = scalar_lea.hbm %s7869_s0, 4096  ;;  %s4863_s7 = scalar_lea.hbm %s8136_s6, 8192 }
 0x4d0   : > { %p4860_p4 = scmp.ne.s32.totalorder %s7869_s0, %s4859_s22  ;;  %p4864_p9 = scmp.lt.u32.totalorder %s7869_s0, %s8136_s6 }
 0x4d1   : > { %p4865_p10 = scmp.lt.u32.totalorder %s4863_s7, %s4859_s22  ;;  %p4867_p12 = scmp.lt.u32.totalorder %s4859_s22, %s7869_s0 }
 0x4d2   : > { %p4861_p7 = pnand %p4860_p4, %p5008_p5 }
 0x4d3   : > { %p4866_p11 = por %p4865_p10, %p4864_p9 }
 0x4d4   : > { %p4862_p8 = pneg %p4861_p7 }
 0x4d5   : > { %p4868_p13 = por %p4867_p12, %p4866_p11 }
 0x4d7   : > { %p4869_p0 = pnand %p4868_p13, %p4862_p8 }
 0x4d9   : > { %4872 = shalt.err (!%p4869_p0)
}
 0x4da   : > { %s4926_s15 = smov 128   ;;  %s4927_s8 = smov 8   ;;  %v4566_v20 = vpop.eup %4565  ;;  %v3451_v23 = vmul.f32 %v4564_v25, %v7684_v56  ;;  %4575 = vrcp.f32 %v3390_v53  ;;  %v3327_v41 = vmax.f32 %v3061_v48, 1e-08  ;;  %v8614_v31 = vld [vmem:[#allocation36_spill] sm:$0xff]  ;;  %vm3064_vm8 = vcmp.eq.f32.partialorder %v7726_v17, inf  ;;  %v7911_v34 = vpop.xlane.xlu1 %3277 }
 0x4db   : > { %4159 = dma.vmem_to_hbm [thread:$0]  (%p5008_p5), %s7871_s17, 4096, %s7869_s0, %s3532_s28, %s4926_s15, %s4926_s15, %s4927_s8   ;;  %v3359_v13 = vmax.f32 %v8614_v31, 1e-08  ;;  %v3063_v44 = vmul.f32 %v4566_v20, %v7726_v17  ;;  %v4568_v58 = vpop.eup %4567  ;;  %v3067_v62 = vand.u32 2147483648, %v7726_v17  ;;  %v2960_v22 = vpop.xlane.xlu0 %2959  ;;  %vm3066_vm9 = vcmp.eq.f32.partialorder %v7726_v17, 0.0  ;;  %v8615_v30 = vld [vmem:[#allocation37_spill] sm:$0xff] }
 0x4dc   : > { %3483 = vst.msk [vmem:[%s7696_s13 + $0x20] sm:$0xff] %vm2357_vm0, %v3451_v23  ;;  %v3452_v56 = vmul.f32 %v4568_v58, %v7687_v19  ;;  %4577 = vrsqrt.f32 %v2960_v22  ;;  %v4570_v12 = vpop.eup %4569  ;;  %v3360_v2 = vmax.f32 %v8615_v30, 1e-08  ;;  %vm3071_vm10 = vcmp.eq.f32.partialorder %v7825_v5, inf  ;;  %v8616_v21 = vld [vmem:[#allocation38_spill] sm:$0xff]  ;;  %v8617_v52 = vld [vmem:[#allocation39_spill] sm:$0xff] }
 0x4dd   : > { %v3391_v50 = vmul.f32 %v3359_v13, %v3327_v41  ;;  %v3065_v16 = vsel %vm3064_vm8, %v7726_v17, %v3063_v44  ;;  %v4572_v29 = vpop.eup %4571  ;;  %v3070_v6 = vmul.f32 %v4570_v12, %v7825_v5  ;;  %v3074_v45 = vand.u32 2147483648, %v7825_v5  ;;  %v8618_v9 = vld [vmem:[#allocation40_spill] sm:$0xff]  ;;  %v8619_v31 = vld [vmem:[#allocation41_spill] sm:$0xff] }
 0x4de   : > { %v3068_v39 = vsel %vm3066_vm9, %v3067_v62, %v3065_v16  ;;  %3484 = vst.msk [vmem:[%s7696_s13 + $0x28] sm:$0xff] %vm2357_vm0, %v3452_v56  ;;  %v2962_v19 = vpop.xlane.xlu1 %2961  ;;  %v3453_v18 = vmul.f32 %v4572_v29, %v7702_v27  ;;  %vm3073_vm11 = vcmp.eq.f32.partialorder %v7825_v5, 0.0  ;;  %v4574_v55 = vpop.eup %4573  ;;  %v3361_v27 = vmax.f32 %v8616_v21, 1e-08 }
 0x4df   : > { %4579 = vrcp.f32 %v3391_v50  ;;  %v3328_v35 = vmax.f32 %v3068_v39, 1e-08  ;;  %v7921_v51 = vpop.xlane.xlu0 %3279  ;;  %v3072_v3 = vsel %vm3071_vm10, %v7825_v5, %v3070_v6  ;;  %v3077_v17 = vmul.f32 %v4574_v55, %v7875_v59 }
 0x4e0   : > { %4581 = vrsqrt.f32 %v2962_v19  ;;  %3485 = vst.msk [vmem:[%s7696_s13 + $0x30] sm:$0xff] %vm2357_vm0, %v3453_v18  ;;  %v3075_v47 = vsel %vm3073_vm11, %v3074_v45, %v3072_v3  ;;  %vm3078_vm12 = vcmp.eq.f32.partialorder %v7875_v59, inf  ;;  %v3081_v42 = vand.u32 2147483648, %v7875_v59 }
 0x4e1   : > { %v3392_v43 = vmul.f32 %v3360_v2, %v3328_v35  ;;  %v3329_v11 = vmax.f32 %v3075_v47, 1e-08  ;;  %v3079_v24 = vsel %vm3078_vm12, %v7875_v59, %v3077_v17  ;;  %vm3080_vm13 = vcmp.eq.f32.partialorder %v7875_v59, 0.0  ;;  %v8620_v2 = vld [vmem:[#allocation42_spill] sm:$0xff]  ;;  %v8621_v47 = vld [vmem:[#allocation43_spill] sm:$0xff] }
 0x4e2   : > { %v7931_v54 = vpop.xlane.xlu1 %3281  ;;  %v3082_v49 = vsel %vm3080_vm13, %v3081_v42, %v3079_v24  ;;  %vm3085_vm14 = vcmp.eq.f32.partialorder %v2960_v22, inf  ;;  %v3088_v26 = vand.u32 2147483648, %v2960_v22  ;;  %vm3087_vm15 = vcmp.eq.f32.partialorder %v2960_v22, 0.0 }
 0x4e3   : > { %4583 = vrcp.f32 %v3392_v43  ;;  %v2964_v61 = vpop.xlane.xlu0 %2963  ;;  %v3393_v8 = vmul.f32 %v3361_v27, %v3329_v11  ;;  %v3330_v36 = vmax.f32 %v3082_v49, 1e-08  ;;  %v3363_v53 = vmax.f32 %v8618_v9, 1e-08 }
 0x4e4   : > { %v4576_v46 = vpop.eup %4575  ;;  %4585 = vrsqrt.f32 %v2964_v61  ;;  %vm3092_vm1 = vcmp.eq.f32.partialorder %v2962_v19, inf  ;;  %v3095_v59 = vand.u32 2147483648, %v2962_v19  ;;  %vm3094_vm2 = vcmp.eq.f32.partialorder %v2962_v19, 0.0 }
 0x4e5   : > { %v3454_v10 = vmul.f32 %v4576_v46, %v7708_v57  ;;  %4587 = vrcp.f32 %v3393_v8  ;;  %v3362_v57 = vmax.f32 %v8617_v52, 1e-08  ;;  %v3364_v13 = vmax.f32 %v8619_v31, 1e-08 }
 0x4e6   : > { %v4578_v32 = vpop.eup %4577  ;;  %v2966_v1 = vpop.xlane.xlu1 %2965  ;;  %vm3099_vm3 = vcmp.eq.f32.partialorder %v2964_v61, inf  ;;  %v3102_v62 = vand.u32 2147483648, %v2964_v61  ;;  %vm3101_vm4 = vcmp.eq.f32.partialorder %v2964_v61, 0.0  ;;  %v3365_v29 = vmax.f32 %v8620_v2, 1e-08 }
 0x4e7   : > { %3486 = vst.msk [vmem:[%s7696_s13 + $0x38] sm:$0xff] %vm2357_vm0, %v3454_v10  ;;  %v3084_v63 = vmul.f32 %v4578_v32, %v2960_v22  ;;  %4589 = vrsqrt.f32 %v2966_v1  ;;  %v3394_v38 = vmul.f32 %v3362_v57, %v3330_v36  ;;  %v3284_v58 = vpop.xlane.xlu0 %3283  ;;  %vm3106_vm5 = vcmp.eq.f32.partialorder %v2966_v1, inf }
 0x4e8   : > { %v3109_v6 = vand.u32 2147483648, %v2966_v1  ;;  %vm3108_vm6 = vcmp.eq.f32.partialorder %v2966_v1, 0.0  ;;  %v3366_v46 = vmax.f32 %v8621_v47, 1e-08 }
 0x4e9   : > { %v4580_v4 = vpop.eup %4579  ;;  %v3086_v14 = vsel %vm3085_vm14, %v2960_v22, %v3084_v63  ;;  %4591 = vrcp.f32 %v3394_v38 }
 0x4ea   : > { %v3455_v5 = vmul.f32 %v4580_v4, %v7728_v33  ;;  %v4582_v60 = vpop.eup %4581  ;;  %v3089_v40 = vsel %vm3087_vm15, %v3088_v26, %v3086_v14 }
 0x4eb   : > { %v3091_v37 = vmul.f32 %v4582_v60, %v2962_v19  ;;  %v3331_v0 = vmax.f32 %v3089_v40, 1e-08  ;;  %v2968_v45 = vpop.xlane.xlu0 %2967 }
 0x4ec   : > { %3487 = vst.msk [vmem:[%s7696_s13 + $0x40] sm:$0xff] %vm2357_vm0, %v3455_v5  ;;  %vm3113_vm7 = vcmp.eq.f32.partialorder %v2968_v45, inf  ;;  %v3116_v60 = vand.u32 2147483648, %v2968_v45  ;;  %vm3115_vm10 = vcmp.eq.f32.partialorder %v2968_v45, 0.0 }
 0x4ed   : > { %v4584_v15 = vpop.eup %4583  ;;  %v3093_v25 = vsel %vm3092_vm1, %v2962_v19, %v3091_v37  ;;  %v3395_v48 = vmul.f32 %v3363_v53, %v3331_v0 }
 0x4ee   : > { %v3456_v33 = vmul.f32 %v4584_v15, %v7785_v7  ;;  %v4586_v20 = vpop.eup %4585  ;;  %v3096_v23 = vsel %vm3094_vm2, %v3095_v59, %v3093_v25  ;;  %v3286_v7 = vpop.xlane.xlu1 %3285 }
 0x4ef   : > { %4593 = vrcp.f32 %v3395_v48  ;;  %v3332_v41 = vmax.f32 %v3096_v23, 1e-08  ;;  %v3098_v44 = vmul.f32 %v4586_v20, %v2964_v61  ;;  %v4588_v50 = vpop.eup %4587  ;;  %v2972_v27 = vpop.xlane.xlu0 %2971 }
 0x4f0   : > { %3488 = vst.msk [vmem:[%s7696_s13 + $0x48] sm:$0xff] %vm2357_vm0, %v3456_v33  ;;  %v3457_v39 = vmul.f32 %v4588_v50, %v7877_v28  ;;  %vm3127_vm9 = vcmp.eq.f32.partialorder %v2972_v27, inf  ;;  %v3130_v25 = vand.u32 2147483648, %v2972_v27  ;;  %vm3129_vm12 = vcmp.eq.f32.partialorder %v2972_v27, 0.0  ;;  %v8622_v50 = vld [vmem:[#allocation44_spill] sm:$0xff] }
 0x4f1   : > { %v3396_v22 = vmul.f32 %v3364_v13, %v3332_v41  ;;  %v3100_v56 = vsel %vm3099_vm3, %v2964_v61, %v3098_v44  ;;  %v4590_v16 = vpop.eup %4589 }
 0x4f2   : > { %v3103_v12 = vsel %vm3101_vm4, %v3102_v62, %v3100_v56  ;;  %v3105_v35 = vmul.f32 %v4590_v16, %v2966_v1  ;;  %3489 = vst.msk [vmem:[%s7696_s13 + $0x50] sm:$0xff] %vm2357_vm0, %v3457_v39  ;;  %v2970_v17 = vpop.xlane.xlu1 %2969 }
 0x4f3   : > { %4595 = vrcp.f32 %v3396_v22  ;;  %v3333_v30 = vmax.f32 %v3103_v12, 1e-08  ;;  %v4592_v19 = vpop.eup %4591  ;;  %v7961_v24 = vpop.xlane.xlu0 %2975  ;;  %vm3120_vm8 = vcmp.eq.f32.partialorder %v2970_v17, inf  ;;  %v3123_v53 = vand.u32 2147483648, %v2970_v17 }
 0x4f4   : > { %v3107_v18 = vsel %vm3106_vm5, %v2966_v1, %v3105_v35  ;;  %v3458_v3 = vmul.f32 %v4592_v19, %v7911_v34  ;;  %vm3122_vm11 = vcmp.eq.f32.partialorder %v2970_v17, 0.0  ;;  %v3367_v22 = vmax.f32 %v8622_v50, 1e-08 }
 0x4f5   : > { %v3397_v43 = vmul.f32 %v3365_v29, %v3333_v30  ;;  %v3110_v28 = vsel %vm3108_vm6, %v3109_v6, %v3107_v18  ;;  %vm3141_vm15 = vcmp.eq.f32.partialorder %v7961_v24, inf  ;;  %v3144_v29 = vand.u32 2147483648, %v7961_v24  ;;  %v8624_v6 = vld [vmem:[#allocation46_spill] sm:$0xff] }
 0x4f6   : > { %v3334_v55 = vmax.f32 %v3110_v28, 1e-08  ;;  %3490 = vst.msk [vmem:[%s7696_s13 + $0x58] sm:$0xff] %vm2357_vm0, %v3458_v3  ;;  %v2974_v34 = vpop.xlane.xlu1 %2973  ;;  %v3369_v19 = vmax.f32 %v8624_v6, 1e-08  ;;  %vm3143_vm2 = vcmp.eq.f32.partialorder %v7961_v24, 0.0 }
 0x4f7   : > { %4597 = vrcp.f32 %v3397_v43  ;;  %v7968_v4 = vpop.xlane.xlu0 %2979  ;;  %vm3134_vm13 = vcmp.eq.f32.partialorder %v2974_v34, inf  ;;  %v3137_v44 = vand.u32 2147483648, %v2974_v34  ;;  %vm3136_vm14 = vcmp.eq.f32.partialorder %v2974_v34, 0.0 }
 0x4f8   : > { %v3398_v21 = vmul.f32 %v3366_v46, %v3334_v55  ;;  %4599 = vrsqrt.f32 %v2968_v45  ;;  %vm3155_vm3 = vcmp.eq.f32.partialorder %v7968_v4, inf  ;;  %vm3157_vm5 = vcmp.eq.f32.partialorder %v7968_v4, 0.0 }
 0x4f9   : > { %v4594_v11 = vpop.eup %4593  ;;  %4601 = vrsqrt.f32 %v2970_v17 }
 0x4fa   : > { %v3459_v61 = vmul.f32 %v4594_v11, %v7921_v51  ;;  %4603 = vrcp.f32 %v3398_v21  ;;  %v7965_v32 = vpop.xlane.xlu1 %2977 }
 0x4fb   : > { %4605 = vrsqrt.f32 %v2972_v27  ;;  %v7979_v40 = vpop.xlane.xlu0 %2983  ;;  %vm3148_vm1 = vcmp.eq.f32.partialorder %v7965_v32, inf  ;;  %vm3150_vm4 = vcmp.eq.f32.partialorder %v7965_v32, 0.0 }
 0x4fc   : > { %3491 = vst.msk [vmem:[%s7696_s13 + $0x60] sm:$0xff] %vm2357_vm0, %v3459_v61  ;;  %4607 = vrsqrt.f32 %v2974_v34 }
 0x4fd   : > { %v4596_v10 = vpop.eup %4595  ;;  %4609 = vrsqrt.f32 %v7961_v24 }
 0x4fe   : > { %v3460_v42 = vmul.f32 %v4596_v10, %v7931_v54  ;;  %4611 = vrsqrt.f32 %v7965_v32  ;;  %v7976_v5 = vpop.xlane.xlu1 %2981  ;;  %v3158_v10 = vand.u32 2147483648, %v7968_v4 }
 0x4ff   : > { %4613 = vrsqrt.f32 %v7968_v4  ;;  %v7992_v30 = vpop.xlane.xlu0 %2987  ;;  %vm3162_vm6 = vcmp.eq.f32.partialorder %v7976_v5, inf }
 0x500   : > { %3492 = vst.msk [vmem:[%s7696_s13 + $0x68] sm:$0xff] %vm2357_vm0, %v3460_v42  ;;  %4615 = vrsqrt.f32 %v7976_v5 }
 0x501   : > { %v4598_v8 = vpop.eup %4597  ;;  %4617 = vrsqrt.f32 %v7979_v40 }
 0x502   : > { %v3461_v51 = vmul.f32 %v4598_v8, %v3284_v58  ;;  %v4600_v49 = vpop.eup %4599  ;;  %v7983_v23 = vpop.xlane.xlu1 %2985 }
 0x503   : > { %v4602_v36 = vpop.eup %4601  ;;  %v3112_v63 = vmul.f32 %v4600_v49, %v2968_v45  ;;  %4619 = vrsqrt.f32 %v7983_v23 }
 0x504   : > { %3493 = vst.msk [vmem:[%s7696_s13 + $0x70] sm:$0xff] %vm2357_vm0, %v3461_v51  ;;  %v4604_v54 = vpop.eup %4603  ;;  %v3119_v1 = vmul.f32 %v4602_v36, %v2970_v17  ;;  %4621 = vrsqrt.f32 %v7992_v30  ;;  %v8626_v36 = vld [vmem:[#allocation48_spill] sm:$0xff] }
 0x505   : > { %v4606_v52 = vpop.eup %4605  ;;  %v3462_v57 = vmul.f32 %v4604_v54, %v3286_v7  ;;  %v3114_v14 = vsel %vm3113_vm7, %v2968_v45, %v3112_v63  ;;  %v8623_v7 = vld [vmem:[#allocation45_spill] sm:$0xff]  ;;  %v3151_v45 = vand.u32 2147483648, %v7965_v32  ;;  %v3371_v54 = vmax.f32 %v8626_v36, 1e-08 }
 0x506   : > { %v4608_v26 = vpop.eup %4607  ;;  %v3126_v38 = vmul.f32 %v4606_v52, %v2972_v27  ;;  %v3121_v0 = vsel %vm3120_vm8, %v2970_v17, %v3119_v1  ;;  %v3117_v33 = vsel %vm3115_vm10, %v3116_v60, %v3114_v14  ;;  %v3368_v16 = vmax.f32 %v8623_v7, 1e-08  ;;  %v8004_v11 = vpop.xlane.xlu1 %2989  ;;  %v8627_v63 = vld [vmem:[#allocation49_spill] sm:$0xff] }
 0x507   : > { %3494 = vst.msk [vmem:[%s7696_s13 + $0x78] sm:$0xff] %vm2357_vm0, %v3462_v57  ;;  %v4610_v37 = vpop.eup %4609  ;;  %v3133_v9 = vmul.f32 %v4608_v26, %v2974_v34  ;;  %v3124_v48 = vsel %vm3122_vm11, %v3123_v53, %v3121_v0  ;;  %v3335_v62 = vmax.f32 %v3117_v33, 1e-08  ;;  %4623 = vrsqrt.f32 %v8004_v11  ;;  %v8014_v52 = vpop.xlane.xlu0 %2991  ;;  %v8628_v53 = vld [vmem:[#allocation50_spill] sm:$0xff] }
 0x508   : > { %v3128_v15 = vsel %vm3127_vm9, %v2972_v27, %v3126_v38  ;;  %v4612_v59 = vpop.eup %4611  ;;  %v3140_v20 = vmul.f32 %v4610_v37, %v7961_v24  ;;  %v3336_v56 = vmax.f32 %v3124_v48, 1e-08  ;;  %v8625_v27 = vld [vmem:[#allocation47_spill] sm:$0xff]  ;;  %v3372_v1 = vmax.f32 %v8627_v63, 1e-08 }
 0x509   : > { %v4614_v41 = vpop.eup %4613  ;;  %v3131_v31 = vsel %vm3129_vm12, %v3130_v25, %v3128_v15  ;;  %v3135_v13 = vsel %vm3134_vm13, %v2974_v34, %v3133_v9  ;;  %v3147_v58 = vmul.f32 %v4612_v59, %v7965_v32  ;;  %v3399_v3 = vmul.f32 %v3367_v22, %v3335_v62 }
 0x50a   : > { %v3138_v39 = vsel %vm3136_vm14, %v3137_v44, %v3135_v13  ;;  %v3142_v12 = vsel %vm3141_vm15, %v7961_v24, %v3140_v20  ;;  %v3154_v35 = vmul.f32 %v4614_v41, %v7968_v4  ;;  %v3337_v2 = vmax.f32 %v3131_v31, 1e-08  ;;  %v4616_v18 = vpop.eup %4615  ;;  %v8028_v25 = vpop.xlane.xlu1 %2993  ;;  %v8629_v31 = vld [vmem:[#allocation51_spill] sm:$0xff] }
 0x50b   : > { %v3149_v43 = vsel %vm3148_vm1, %v7965_v32, %v3147_v58  ;;  %v4618_v28 = vpop.eup %4617  ;;  %v3145_v55 = vsel %vm3143_vm2, %v3144_v29, %v3142_v12  ;;  %v3400_v47 = vmul.f32 %v3368_v16, %v3336_v56  ;;  %v3338_v46 = vmax.f32 %v3138_v39, 1e-08  ;;  %v8039_v56 = vpop.xlane.xlu0 %2995  ;;  %v8631_v29 = vld [vmem:[#allocation53_spill] sm:$0xff] }
 0x50c   : > { %v3156_v17 = vsel %vm3155_vm3, %v7968_v4, %v3154_v35  ;;  %v3401_v21 = vmul.f32 %v3369_v19, %v3337_v2  ;;  %v3370_v61 = vmax.f32 %v8625_v27, 1e-08  ;;  %v3152_v34 = vsel %vm3150_vm4, %v3151_v45, %v3149_v43  ;;  %v8630_v35 = vld [vmem:[#allocation52_spill] sm:$0xff] }
 0x50d   : > { %v3161_v42 = vmul.f32 %v4616_v18, %v7976_v5  ;;  %v3168_v24 = vmul.f32 %v4618_v28, %v7979_v40  ;;  %4625 = vrcp.f32 %v3399_v3  ;;  %v3339_v8 = vmax.f32 %v3145_v55, 1e-08  ;;  %v4620_v32 = vpop.eup %4619 }
 0x50e   : > { %v3159_v51 = vsel %vm3157_vm5, %v3158_v10, %v3156_v17  ;;  %4627 = vrcp.f32 %v3400_v47  ;;  %v3402_v49 = vmul.f32 %v3370_v61, %v3338_v46  ;;  %v3340_v57 = vmax.f32 %v3152_v34, 1e-08  ;;  %v4622_v0 = vpop.eup %4621  ;;  %v8051_v55 = vpop.xlane.xlu1 %2997 }
 0x50f   : > { %4629 = vrcp.f32 %v3401_v21  ;;  %v3163_v4 = vsel %vm3162_vm6, %v7976_v5, %v3161_v42  ;;  %v3165_v26 = vand.u32 2147483648, %v7976_v5  ;;  %vm3169_vm7 = vcmp.eq.f32.partialorder %v7979_v40, inf  ;;  %v3288_v47 = vpop.xlane.xlu0 %3287 }
 0x510   : > { %4631 = vrsqrt.f32 %v8014_v52  ;;  %v3170_v38 = vsel %vm3169_vm7, %v7979_v40, %v3168_v24  ;;  %v3175_v14 = vmul.f32 %v4620_v32, %v7983_v23  ;;  %v3403_v60 = vmul.f32 %v3371_v54, %v3339_v8  ;;  %v8632_v24 = vld [vmem:[#allocation54_spill] sm:$0xff] }
 0x511   : > { %v3341_v37 = vmax.f32 %v3159_v51, 1e-08  ;;  %vm3164_vm8 = vcmp.eq.f32.partialorder %v7976_v5, 0.0  ;;  %v3172_v9 = vand.u32 2147483648, %v7979_v40  ;;  %4633 = vrcp.f32 %v3402_v49  ;;  %v4624_v44 = vpop.eup %4623 }
 0x512   : > { %v3373_v15 = vmax.f32 %v8628_v53, 1e-08  ;;  %v3166_v59 = vsel %vm3164_vm8, %v3165_v26, %v3163_v4  ;;  %vm3171_vm9 = vcmp.eq.f32.partialorder %v7979_v40, 0.0  ;;  %v3182_v33 = vmul.f32 %v4622_v0, %v7992_v30  ;;  %v3290_v49 = vpop.xlane.xlu1 %3289  ;;  %v8633_v0 = vld [vmem:[#allocation55_spill] sm:$0xff]  ;;  %v8634_v53 = vld [vmem:[#allocation56_spill] sm:$0xff] }
 0x513   : > { %v3404_v48 = vmul.f32 %v3372_v1, %v3340_v57  ;;  %v3173_v20 = vsel %vm3171_vm9, %v3172_v9, %v3170_v38  ;;  %vm3176_vm10 = vcmp.eq.f32.partialorder %v7983_v23, inf  ;;  %4635 = vrsqrt.f32 %v8028_v25  ;;  %v3292_v36 = vpop.xlane.xlu0 %3291 }
 0x514   : > { %v3177_v5 = vsel %vm3176_vm10, %v7983_v23, %v3175_v14  ;;  %4637 = vrcp.f32 %v3403_v60  ;;  %v3405_v41 = vmul.f32 %v3373_v15, %v3341_v37  ;;  %v3374_v13 = vmax.f32 %v8629_v31, 1e-08 }
 0x515   : > { %vm3178_vm11 = vcmp.eq.f32.partialorder %v7983_v23, 0.0  ;;  %v3179_v40 = vand.u32 2147483648, %v7983_v23  ;;  %vm3183_vm12 = vcmp.eq.f32.partialorder %v7992_v30, inf  ;;  %v3342_v58 = vmax.f32 %v3166_v59, 1e-08 }
 0x516   : > { %v3184_v50 = vsel %vm3183_vm12, %v7992_v30, %v3182_v33  ;;  %v3189_v22 = vmul.f32 %v4624_v44, %v8004_v11  ;;  %4639 = vrcp.f32 %v3404_v48  ;;  %v3343_v7 = vmax.f32 %v3173_v20, 1e-08  ;;  %v3294_v48 = vpop.xlane.xlu1 %3293 }
 0x517   : > { %v4626_v62 = vpop.eup %4625  ;;  %v3180_v39 = vsel %vm3178_vm11, %v3179_v40, %v3177_v5  ;;  %v3186_v12 = vand.u32 2147483648, %v7992_v30  ;;  %4641 = vrsqrt.f32 %v8039_v56  ;;  %v3375_v23 = vmax.f32 %v8630_v35, 1e-08  ;;  %v3296_v20 = vpop.xlane.xlu0 %3295 }
 0x518   : > { %v4628_v16 = vpop.eup %4627  ;;  %vm3185_vm13 = vcmp.eq.f32.partialorder %v7992_v30, 0.0  ;;  %vm3190_vm14 = vcmp.eq.f32.partialorder %v8004_v11, inf  ;;  %4643 = vrcp.f32 %v3405_v41  ;;  %v3376_v6 = vmax.f32 %v8631_v29, 1e-08 }
 0x519   : > { %v4630_v2 = vpop.eup %4629  ;;  %v3187_v18 = vsel %vm3185_vm13, %v3186_v12, %v3184_v50  ;;  %v3191_v43 = vsel %vm3190_vm14, %v8004_v11, %v3189_v22  ;;  %vm3192_vm15 = vcmp.eq.f32.partialorder %v8004_v11, 0.0  ;;  %v3406_v45 = vmul.f32 %v3374_v13, %v3342_v58  ;;  %v8635_v50 = vld [vmem:[#allocation57_spill] sm:$0xff] }
 0x51a   : > { %v4632_v19 = vpop.eup %4631  ;;  %v3193_v3 = vand.u32 2147483648, %v8004_v11  ;;  %v3407_v30 = vmul.f32 %v3375_v23, %v3343_v7  ;;  %v3344_v46 = vmax.f32 %v3180_v39, 1e-08  ;;  %vm3197_vm1 = vcmp.eq.f32.partialorder %v8014_v52, inf  ;;  %v8636_v7 = vld [vmem:[#allocation58_spill] sm:$0xff] }
 0x51b   : > { %v3196_v28 = vmul.f32 %v4632_v19, %v8014_v52  ;;  %v4634_v17 = vpop.eup %4633  ;;  %vm3199_vm2 = vcmp.eq.f32.partialorder %v8014_v52, 0.0  ;;  %v3200_v21 = vand.u32 2147483648, %v8014_v52  ;;  %4645 = vrsqrt.f32 %v8051_v55  ;;  %v3300_v35 = vpop.xlane.xlu0 %3299 }
 0x51c   : > { %v3194_v27 = vsel %vm3192_vm15, %v3193_v3, %v3191_v43  ;;  %v3463_v61 = vmul.f32 %v4626_v62, %v3288_v47  ;;  %v3345_v34 = vmax.f32 %v3187_v18, 1e-08  ;;  %4647 = vrcp.f32 %v3406_v45 }
 0x51d   : > { %v3198_v11 = vsel %vm3197_vm1, %v8014_v52, %v3196_v28  ;;  %v4636_v10 = vpop.eup %4635  ;;  %v3377_v8 = vmax.f32 %v8632_v24, 1e-08  ;;  %vm3204_vm3 = vcmp.eq.f32.partialorder %v8028_v25, inf  ;;  %4649 = vrcp.f32 %v3407_v30 }
 0x51e   : > { %v3201_v42 = vsel %vm3199_vm2, %v3200_v21, %v3198_v11  ;;  %v4638_v32 = vpop.eup %4637  ;;  %v3203_v51 = vmul.f32 %v4636_v10, %v8028_v25  ;;  %3495 = vst.msk [vmem:[%s7696_s13 + $0x80] sm:$0xff] %vm2357_vm0, %v3463_v61  ;;  %v3408_v54 = vmul.f32 %v3376_v6, %v3344_v46  ;;  %v3207_v52 = vand.u32 2147483648, %v8028_v25  ;;  %v8637_v46 = vld [vmem:[#allocation59_spill] sm:$0xff] }
 0x51f   : > { %v3464_v57 = vmul.f32 %v4628_v16, %v3290_v49  ;;  %v3465_v63 = vmul.f32 %v4630_v2, %v3292_v36  ;;  %v3346_v1 = vmax.f32 %v3194_v27, 1e-08  ;;  %vm3206_vm4 = vcmp.eq.f32.partialorder %v8028_v25, 0.0  ;;  %v3304_v47 = vpop.xlane.xlu0 %3303 }
 0x520   : > { %v4640_v4 = vpop.eup %4639  ;;  %v3205_v26 = vsel %vm3204_vm3, %v8028_v25, %v3203_v51  ;;  %v3409_v38 = vmul.f32 %v3377_v8, %v3345_v34  ;;  %v3347_v14 = vmax.f32 %v3201_v42, 1e-08  ;;  %v3378_v9 = vmax.f32 %v8633_v0, 1e-08 }
 0x521   : > { %v4642_v60 = vpop.eup %4641  ;;  %v3208_v37 = vsel %vm3206_vm4, %v3207_v52, %v3205_v26  ;;  %3496 = vst.msk [vmem:[%s7696_s13 + $0x88] sm:$0xff] %vm2357_vm0, %v3464_v57  ;;  %3497 = vst.msk [vmem:[%s7696_s13 + $0x90] sm:$0xff] %vm2357_vm0, %v3465_v63  ;;  %v3379_v15 = vmax.f32 %v8634_v53, 1e-08  ;;  %vm3211_vm5 = vcmp.eq.f32.partialorder %v8039_v56, inf  ;;  %v3214_v25 = vand.u32 2147483648, %v8039_v56 }
 0x522   : > { %v4644_v59 = vpop.eup %4643  ;;  %v3210_v33 = vmul.f32 %v4642_v60, %v8039_v56  ;;  %4651 = vrcp.f32 %v3408_v54  ;;  %v3466_v5 = vmul.f32 %v4634_v17, %v3294_v48  ;;  %v3467_v41 = vmul.f32 %v4638_v32, %v3296_v20 }
 0x523   : > { %v3410_v31 = vmul.f32 %v3378_v9, %v3346_v1  ;;  %v3348_v13 = vmax.f32 %v3208_v37, 1e-08  ;;  %vm3213_vm6 = vcmp.eq.f32.partialorder %v8039_v56, 0.0  ;;  %4653 = vrcp.f32 %v3409_v38  ;;  %v3308_v10 = vpop.xlane.xlu0 %3307 }
 0x524   : > { %v3212_v44 = vsel %vm3211_vm5, %v8039_v56, %v3210_v33  ;;  %v3411_v40 = vmul.f32 %v3379_v15, %v3347_v14  ;;  %3498 = vst.msk [vmem:[%s7696_s13 + $0x98] sm:$0xff] %vm2357_vm0, %v3466_v5  ;;  %3499 = vst.msk [vmem:[%s7696_s13 + $0xa0] sm:$0xff] %vm2357_vm0, %v3467_v41  ;;  %v3380_v22 = vmax.f32 %v8635_v50, 1e-08  ;;  %v3381_v16 = vmax.f32 %v8636_v7, 1e-08  ;;  %v3298_v56 = vpop.xlane.xlu1 %3297 }
 0x525   : > { %v4646_v58 = vpop.eup %4645  ;;  %v3215_v62 = vsel %vm3213_vm6, %v3214_v25, %v3212_v44  ;;  %vm3218_vm7 = vcmp.eq.f32.partialorder %v8051_v55, inf  ;;  %v3221_v12 = vand.u32 2147483648, %v8051_v55  ;;  %v3468_v29 = vmul.f32 %v4640_v4, %v3298_v56 }
 0x526   : > { %v3217_v39 = vmul.f32 %v4646_v58, %v8051_v55  ;;  %v3349_v23 = vmax.f32 %v3215_v62, 1e-08  ;;  %v4648_v2 = vpop.eup %4647  ;;  %v3469_v6 = vmul.f32 %v4644_v59, %v3300_v35  ;;  %4655 = vrcp.f32 %v3410_v31 }
 0x527   : > { %v3412_v19 = vmul.f32 %v3380_v22, %v3348_v13  ;;  %v4650_v18 = vpop.eup %4649  ;;  %vm3220_vm8 = vcmp.eq.f32.partialorder %v8051_v55, 0.0  ;;  %4657 = vrcp.f32 %v3411_v40  ;;  %3500 = vst.msk [vmem:[%s7696_s13 + $0xa8] sm:$0xff] %vm2357_vm0, %v3468_v29  ;;  %v3382_v17 = vmax.f32 %v8637_v46, 1e-08  ;;  %v3312_v49 = vpop.xlane.xlu0 %3311 }
 0x528   : > { %v3219_v43 = vsel %vm3218_vm7, %v8051_v55, %v3217_v39  ;;  %v3413_v45 = vmul.f32 %v3381_v16, %v3349_v23  ;;  %3501 = vst.msk [vmem:[%s7696_s13 + $0xb0] sm:$0xff] %vm2357_vm0, %v3469_v6  ;;  %v3302_v28 = vpop.xlane.xlu1 %3301  ;;  %v3471_v27 = vmul.f32 %v4650_v18, %v3304_v47 }
 0x529   : > { %v3222_v3 = vsel %vm3220_vm8, %v3221_v12, %v3219_v43  ;;  %v3470_v21 = vmul.f32 %v4648_v2, %v3302_v28  ;;  %4659 = vrcp.f32 %v3412_v19 }
 0x52a   : > { %v3350_v30 = vmax.f32 %v3222_v3, 1e-08  ;;  %4661 = vrcp.f32 %v3413_v45  ;;  %3503 = vst.msk [vmem:[%s7696_s13 + $0xc0] sm:$0xff] %vm2357_vm0, %v3471_v27 }
 0x52b   : > { %3502 = vst.msk [vmem:[%s7696_s13 + $0xb8] sm:$0xff] %vm2357_vm0, %v3470_v21  ;;  %v3316_v1 = vpop.xlane.xlu0 %3315 }
 0x52c   : > { %v4652_v55 = vpop.eup %4651  ;;  %v3414_v11 = vmul.f32 %v3382_v17, %v3350_v30  ;;  %v3306_v34 = vpop.xlane.xlu1 %3305 }
 0x52d   : > { %v4654_v61 = vpop.eup %4653  ;;  %v3472_v42 = vmul.f32 %v4652_v55, %v3306_v34 }
 0x52e   : > { %v3473_v24 = vmul.f32 %v4654_v61, %v3308_v10  ;;  %4663 = vrcp.f32 %v3414_v11 }
 0x52f   : > { %3504 = vst.msk [vmem:[%s7696_s13 + $0xc8] sm:$0xff] %vm2357_vm0, %v3472_v42 }
 0x530   : > { %v4656_v8 = vpop.eup %4655  ;;  %3505 = vst.msk [vmem:[%s7696_s13 + $0xd0] sm:$0xff] %vm2357_vm0, %v3473_v24  ;;  %v3310_v51 = vpop.xlane.xlu1 %3309 }
 0x531   : > { %v4658_v32 = vpop.eup %4657  ;;  %v3474_v36 = vmul.f32 %v4656_v8, %v3310_v51 }
 0x532   : > { %v3475_v54 = vmul.f32 %v4658_v32, %v3312_v49 }
 0x533   : > { %v4660_v52 = vpop.eup %4659  ;;  %3506 = vst.msk [vmem:[%s7696_s13 + $0xd8] sm:$0xff] %vm2357_vm0, %v3474_v36 }
 0x534   : > { %3507 = vst.msk [vmem:[%s7696_s13 + $0xe0] sm:$0xff] %vm2357_vm0, %v3475_v54  ;;  %v4662_v57 = vpop.eup %4661  ;;  %v3314_v63 = vpop.xlane.xlu1 %3313 }
 0x535   : > { %v3476_v4 = vmul.f32 %v4660_v52, %v3314_v63  ;;  %v3477_v26 = vmul.f32 %v4662_v57, %v3316_v1 }
 0x537   : > { %3508 = vst.msk [vmem:[%s7696_s13 + $0xe8] sm:$0xff] %vm2357_vm0, %v3476_v4  ;;  %3509 = vst.msk [vmem:[%s7696_s13 + $0xf0] sm:$0xff] %vm2357_vm0, %v3477_v26 }
 0x538   : > { %v4664_v38 = vpop.eup %4663  ;;  %v3318_v14 = vpop.xlane.xlu1 %3317 }
 0x539   : > { %v3478_v60 = vmul.f32 %v4664_v38, %v3318_v14 }
 0x53b   : > { %3510 = vst.msk [vmem:[%s7696_s13 + $0xf8] sm:$0xff] %vm2357_vm0, %v3478_v60 }
 0x53c PF: > { %p4177_p5 = scmp.ge.s32.totalorder %s4915_s27, 2  ;;  %s3624_s11 = sand.u32 1, %s4903_s24  }
 0x53d   : > { %s3625_s19 = scalar_lea.sflag [#allocation3], %s3624_s11 }
 0x53e   : > { %p4165_p1 = pnand %p4177_p5, %p5012_p6 }
 0x540   : > { %4890 = dma.done.wait (!%p4165_p1), %s3625_s19, 8192  }
 0x541   : > { %4892 = vsyncadd (!%p4165_p1), %s3625_s19, 4294959104  ;;  %s8638_s17 = sadd.s32 4294967294, %s4915_s27  }
 0x542   : > { %s3633_s14 = sand.u32 1, %s8638_s17  }
 0x543   : > { %s3634_s20 = scalar_lea.sflag [#allocation5], %s3633_s14 }
 0x544   : > { %4894 = dma.done.wait (!%p4165_p1), %s3634_s20, 16384  }
 0x545   : > { %4896 = vsyncadd (!%p4165_p1), %s3634_s20, 4294950912  ;;  %s3660_s0 = scalar_lea.sflag [#allocation8], %s3624_s11 }
 0x546   : > { %4898 = dma.done.wait (!%p4165_p1), %s3660_s0, 4096  }
 0x547   : > { %4900 = vsyncadd (!%p4165_p1), %s3660_s0, 4294963200  ;;  %p24_p2 = scmp.ge.s32.totalorder %s4993_s30, 4   ;;  %s8639_s24 = smov %s4907_s25 }
 0x548   : > { %s8640_s25 = smov %s4911_s26  ;;  %s8641_s26 = smov %s5006_s10 }
 0x549   : > { %s8642_s27 = smov %s4993_s30  ;;  %26 = sbr.rel (!%p24_p2) target bundleno = 12 (0xc), region = 136 }
 0x550   :  { %3673 = vsyncpa [#allocation3], 1 }
 0x551   :  { %3675 = vsyncpa [#allocation3 + $0x1], 1 }
 0x552   :  { %3676 = vsyncpa [#allocation5], 1 }
 0x553   :  { %3678 = vsyncpa [#allocation5 + $0x1], 1 }
 0x554   :  { %3679 = vsyncpa [#allocation8], 1 }
 0x555   :  { %3681 = vsyncpa [#allocation8 + $0x1], 1 }

</bundles_post_ra>
